<compile_context>
chip_gen: v7x
topology: tpu7x:2x2x1
jax: 0.10.0
libtpu: 0.0.40
codegen_flags: <defaults>
</compile_context>

<pallas_src>
import jax
import jax.numpy as jnp
from jax.experimental import pallas as pl
from jax.experimental.pallas import tpu as pltpu

# ----- module hyper-parameters (consistent with the PyTorch module) -----
EMBED_SIZE = 128
FILTER_SIZES = (3, 4, 5)
NUM_CLASSES = 3
NUM_FILTERS = 100
VOCAB_SIZE = 64          # synthetic vocab (module derives it from `texts`)
BATCH = 2
SEQ_LEN = 16

# ----- padded / packed layout constants -----
F_PAD = 128                      # NUM_FILTERS padded to a full lane tile
C_PAD = 128                      # NUM_CLASSES padded to a full lane tile
K_MAX = max(FILTER_SIZES)        # 5 time-shifted embedding copies
NB = len(FILTER_SIZES)           # 3 conv branches
BATCH_TILE = 16                  # examples per grid step (TB*L = 256 MXU rows; use 8 on v5e)

M_ROWS = BATCH_TILE * SEQ_LEN    # conv-matmul M dimension per grid step
KL_ROWS = K_MAX * M_ROWS         # gather-matmul rows per grid step


def textcnn_kernel(ids_ref, table_ref, wbig_ref, biasmask_ref, fcw_ref, fcb_ref, out_ref):
    """One BATCH_TILE block per grid step: gather + fused conv + ReLU + maxpool + FC."""
    V = VOCAB_SIZE

    # ---- embedding gather fused in-kernel as a single one-hot bf16 matmul ----
    ids = ids_ref[...]                                              # (KL_ROWS, 1) int32
    vocab_iota = jax.lax.broadcasted_iota(jnp.int32, (KL_ROWS, V), 1)
    onehot = jnp.where(ids == vocab_iota, 1.0, 0.0).astype(jnp.bfloat16)   # (KL_ROWS, V)
    emb_all = jnp.dot(onehot, table_ref[...],
                      preferred_element_type=jnp.float32)           # (KL_ROWS, E) f32

    # ---- concat the K_MAX time-shifted copies along lanes -> (TB*L, K_MAX*E) bf16 ----
    # (sublane slice starts are multiples of M_ROWS=256, lane offsets are multiples of
    #  128 -> everything tile aligned, no realign copies)
    emb_cat = jnp.concatenate(
        [emb_all[k * M_ROWS:(k + 1) * M_ROWS, :] for k in range(K_MAX)], axis=1
    ).astype(jnp.bfloat16)

    # ---- all filter sizes, shifts and TB examples as ONE MXU matmul (256,640)x(640,384) ----
    conv = jnp.dot(emb_cat, wbig_ref[...],
                   preferred_element_type=jnp.float32)              # (TB*L, NB*F_PAD) f32
    # bias (+ -1e30 on invalid / wrapped time steps), then ReLU: masked rows become 0,
    # which is safe before max-over-time because ReLU output >= 0.
    conv = jnp.maximum(conv + biasmask_ref[...], 0.0)

    # ---- per-example max-over-time, then FC on the padded pooled features ----
    pooled = jnp.max(conv.reshape(BATCH_TILE, SEQ_LEN, NB * F_PAD), axis=1)   # (TB, NB*F_PAD)
    logits = jnp.dot(pooled.astype(jnp.bfloat16), fcw_ref[...],
                     preferred_element_type=jnp.float32) + fcb_ref[...]       # (TB, C_PAD)
    out_ref[...] = logits


def pack_params(emb_table, conv_ws, conv_bs, fcw, fcb):
    """Pack/pad parameters into the lane-dense bf16 layout the kernel consumes."""
    E, F, L = EMBED_SIZE, NUM_FILTERS, SEQ_LEN
    w_big = jnp.zeros((K_MAX * E, NB * F_PAD), jnp.float32)
    fcw_pad = jnp.zeros((NB * F_PAD, C_PAD), jnp.float32)
    fcb_pad = jnp.zeros((1, C_PAD), jnp.float32).at[:, :NUM_CLASSES].set(fcb)
    bias_row = jnp.zeros((NB * F_PAD,), jnp.float32)
    valid = jnp.zeros((L, NB * F_PAD), dtype=bool)
    for j, (fs, w, b) in enumerate(zip(FILTER_SIZES, conv_ws, conv_bs)):
        for k in range(fs):
            w_big = w_big.at[k * E:(k + 1) * E, j * F_PAD:j * F_PAD + F].set(w[k])
        bias_row = bias_row.at[j * F_PAD:j * F_PAD + F].set(b[0])
        valid = valid.at[:L - fs + 1, j * F_PAD:(j + 1) * F_PAD].set(True)
        fcw_pad = fcw_pad.at[j * F_PAD:j * F_PAD + F, :NUM_CLASSES].set(
            fcw[j * F:(j + 1) * F, :])
    # Fold conv bias and the per-branch time-validity mask into one precomputed constant:
    # valid rows get the bias, invalid (wrapped) rows get -1e30 so ReLU maps them to 0.
    biasmask = jnp.tile(jnp.where(valid, bias_row[None, :], -1e30), (BATCH_TILE, 1))
    return (emb_table.astype(jnp.bfloat16), w_big.astype(jnp.bfloat16),
            biasmask.astype(jnp.float32), fcw_pad.astype(jnp.bfloat16), fcb_pad)


@jax.jit
def textcnn_forward(token_ids, table_bf16, w_big, biasmask, fcw_pad, fcb_pad):
    B, L = token_ids.shape
    assert L == SEQ_LEN
    nblk = pl.cdiv(B, BATCH_TILE)
    b_pad = nblk * BATCH_TILE

    # Tiny index glue (the heavy embedding-table gather happens inside the kernel):
    # per block g, row k*(TB*L) + b*L + t holds token_ids[g*TB + b, (t + k) % L].
    ids = jnp.pad(token_ids.astype(jnp.int32), ((0, b_pad - B), (0, 0)))
    rolled = jnp.stack([jnp.roll(ids, -k, axis=1) for k in range(K_MAX)], axis=0)
    rolled = rolled.reshape(K_MAX, nblk, BATCH_TILE, L).transpose(1, 0, 2, 3)
    ids_sh = rolled.reshape(nblk * KL_ROWS, 1)

    const = lambda shape: pl.BlockSpec(shape, lambda g: (0,) * len(shape))
    out = pl.pallas_call(
        textcnn_kernel,
        out_shape=jax.ShapeDtypeStruct((b_pad, C_PAD), jnp.float32),
        grid=(nblk,),
        in_specs=[
            pl.BlockSpec((KL_ROWS, 1), lambda g: (g, 0)),          # shifted token ids
            const((VOCAB_SIZE, EMBED_SIZE)),                       # embedding table (bf16)
            const((K_MAX * EMBED_SIZE, NB * F_PAD)),               # packed conv weights (bf16)
            const((M_ROWS, NB * F_PAD)),                           # fused conv bias + time mask
            const((NB * F_PAD, C_PAD)),                            # padded FC weights (bf16)
            const((1, C_PAD)),                                     # padded FC bias
        ],
        out_specs=pl.BlockSpec((BATCH_TILE, C_PAD), lambda g: (g, 0)),
        compiler_params=pltpu.CompilerParams(dimension_semantics=("parallel",)),
    )(ids_sh, table_bf16, w_big, biasmask, fcw_pad, fcb_pad)
    return out[:B, :NUM_CLASSES]


def reference_forward(token_ids, emb_table, conv_ws, conv_bs, fcw, fcb):
    """Pure-JAX f32 reference with the original module semantics."""
    emb = jnp.take(emb_table, token_ids, axis=0).astype(jnp.float32)   # (B, L, E)
    L = token_ids.shape[1]
    pools = []
    for fs, w, b in zip(FILTER_SIZES, conv_ws, conv_bs):
        l_out = L - fs + 1
        acc = sum(jnp.einsum('ble,ef->blf', emb[:, k:k + l_out, :], w[k])
                  for k in range(fs)) + b[None, :, :]
        pools.append(jnp.max(jnp.maximum(acc, 0.0), axis=1))
    pooled = jnp.concatenate(pools, axis=1)
    return pooled @ fcw + fcb


if __name__ == "__main__":
    key = jax.random.PRNGKey(0)
    k_emb, k3, k4, k5, k_fc, k_tok, k_tok2 = jax.random.split(key, 7)

    # Deterministic parameter init (PyTorch-like scales; synthetic, no checkpoint).
    emb_table = jax.random.normal(k_emb, (VOCAB_SIZE, EMBED_SIZE), jnp.float32)

    def conv_init(k, fs):
        fan_in = 1 * fs * EMBED_SIZE
        bound = 1.0 / (fan_in ** 0.5)
        kw, kb = jax.random.split(k)
        w = jax.random.uniform(kw, (fs, EMBED_SIZE, NUM_FILTERS), jnp.float32, -bound, bound)
        b = jax.random.uniform(kb, (1, NUM_FILTERS), jnp.float32, -bound, bound)
        return w, b

    w3, b3 = conv_init(k3, 3)
    w4, b4 = conv_init(k4, 4)
    w5, b5 = conv_init(k5, 5)
    conv_ws, conv_bs = (w3, w4, w5), (b3, b4, b5)

    fc_in = NB * NUM_FILTERS
    fc_bound = 1.0 / (fc_in ** 0.5)
    kfw, kfb = jax.random.split(k_fc)
    fcw = jax.random.uniform(kfw, (fc_in, NUM_CLASSES), jnp.float32, -fc_bound, fc_bound)
    fcb = jax.random.uniform(kfb, (1, NUM_CLASSES), jnp.float32, -fc_bound, fc_bound)

    packed = pack_params(emb_table, conv_ws, conv_bs, fcw, fcb)

    def check(tok):
        # (review note) the one-hot maps out-of-range ids to a zero embedding, so assert
        # range validity in the wrapper instead of failing silently.
        assert bool(jnp.all((tok >= 0) & (tok < VOCAB_SIZE)))
        logits = textcnn_forward(tok, *packed)
        jax.block_until_ready(logits)
        ref = reference_forward(tok, emb_table, conv_ws, conv_bs, fcw, fcb)
        assert logits.shape == (tok.shape[0], NUM_CLASSES)
        max_err = jnp.max(jnp.abs(logits - ref))
        # bf16 MXU operands with f32 accumulation -> bf16-level tolerance vs the f32 ref.
        assert jnp.allclose(logits, ref, atol=5e-2, rtol=5e-2), f"max abs err {max_err}"

    # Single-block path: batch=2 padded to one 16-example tile.
    check(jax.random.randint(k_tok, (BATCH, SEQ_LEN), 1, VOCAB_SIZE, jnp.int32))
    # Multi-block path: 33 examples -> padded to 48, grid of 3 "parallel" steps.
    check(jax.random.randint(k_tok2, (33, SEQ_LEN), 1, VOCAB_SIZE, jnp.int32))

    print("KERNEL_OK")
</pallas_src>

<mosaic_0001>
module attributes {stable_mosaic.version = 11 : i64} {
  func.func @textcnn_kernel(%arg0: i32, %arg1: memref<1280x1xi32, #tpu.memory_space<vmem>>, %arg2: memref<64x128xbf16, #tpu.memory_space<vmem>>, %arg3: memref<640x384xbf16, #tpu.memory_space<vmem>>, %arg4: memref<256x384xf32, #tpu.memory_space<vmem>>, %arg5: memref<384x128xbf16, #tpu.memory_space<vmem>>, %arg6: memref<1x128xf32, #tpu.memory_space<vmem>>, %arg7: memref<16x128xf32, #tpu.memory_space<vmem>>) attributes {dimension_semantics = [#tpu.dimension_semantics<parallel>], iteration_bounds = array<i64: 1>, scalar_prefetch = 0 : i64, scratch_operands = 0 : i64, tpu.core_type = #tpu.core_type<tc>, window_params = [{transform_indices = @transform_0, window_bounds = array<i64: 1280, 1>}, {pipeline_mode = #tpu.pipeline_mode<synchronous>, transform_indices = @transform_1, window_bounds = array<i64: 64, 128>}, {pipeline_mode = #tpu.pipeline_mode<synchronous>, transform_indices = @transform_2, window_bounds = array<i64: 640, 384>}, {pipeline_mode = #tpu.pipeline_mode<synchronous>, transform_indices = @transform_3, window_bounds = array<i64: 256, 384>}, {pipeline_mode = #tpu.pipeline_mode<synchronous>, transform_indices = @transform_4, window_bounds = array<i64: 384, 128>}, {pipeline_mode = #tpu.pipeline_mode<synchronous>, transform_indices = @transform_5, window_bounds = array<i64: 1, 128>}, {transform_indices = @transform_6, window_bounds = array<i64: 16, 128>}]} {
    %c0 = arith.constant 0 : index
    %c0_0 = arith.constant 0 : index
    %0 = vector.load %arg1[%c0, %c0_0] : memref<1280x1xi32, #tpu.memory_space<vmem>>, vector<1280x1xi32>
    %1 = tpu.iota {dimensions = array<i32: 1>} : vector<1280x64xi32>
    %2 = vector.broadcast %0 : vector<1280x1xi32> to vector<1280x64xi32>
    %3 = arith.cmpi eq, %2, %1 : vector<1280x64xi32>
    %cst = arith.constant 1.000000e+00 : f32
    %cst_1 = arith.constant 0.000000e+00 : f32
    %4 = vector.broadcast %cst : f32 to vector<1280x64xf32>
    %5 = vector.broadcast %cst_1 : f32 to vector<1280x64xf32>
    %6 = arith.select %3, %4, %5 : vector<1280x64xi1>, vector<1280x64xf32>
    %7 = arith.truncf %6 : vector<1280x64xf32> to vector<1280x64xbf16>
    %c0_2 = arith.constant 0 : index
    %c0_3 = arith.constant 0 : index
    %8 = vector.load %arg2[%c0_2, %c0_3] : memref<64x128xbf16, #tpu.memory_space<vmem>>, vector<64x128xbf16>
    %cst_4 = arith.constant dense<0.000000e+00> : vector<1280x128xf32>
    %9 = tpu.matmul %7, %8, %cst_4 {dimension_numbers = #tpu.dot_dimension_numbers<[1], [0], [0], [1], [0, 0, 1, 1], [], []>} : vector<1280x64xbf16>, vector<64x128xbf16>, vector<1280x128xf32> -> vector<1280x128xf32>
    %10 = vector.extract_strided_slice %9 {offsets = [0, 0], sizes = [256, 128], strides = [1, 1]} : vector<1280x128xf32> to vector<256x128xf32>
    %11 = vector.extract_strided_slice %9 {offsets = [256, 0], sizes = [256, 128], strides = [1, 1]} : vector<1280x128xf32> to vector<256x128xf32>
    %12 = vector.extract_strided_slice %9 {offsets = [512, 0], sizes = [256, 128], strides = [1, 1]} : vector<1280x128xf32> to vector<256x128xf32>
    %13 = vector.extract_strided_slice %9 {offsets = [768, 0], sizes = [256, 128], strides = [1, 1]} : vector<1280x128xf32> to vector<256x128xf32>
    %14 = vector.extract_strided_slice %9 {offsets = [1024, 0], sizes = [256, 128], strides = [1, 1]} : vector<1280x128xf32> to vector<256x128xf32>
    %15 = tpu.concatenate %10, %11, %12, %13, %14 in 1 : vector<256x128xf32>, vector<256x128xf32>, vector<256x128xf32>, vector<256x128xf32>, vector<256x128xf32> -> vector<256x640xf32>
    %16 = arith.truncf %15 : vector<256x640xf32> to vector<256x640xbf16>
    %c0_5 = arith.constant 0 : index
    %c0_6 = arith.constant 0 : index
    %17 = vector.load %arg3[%c0_5, %c0_6] : memref<640x384xbf16, #tpu.memory_space<vmem>>, vector<640x384xbf16>
    %cst_7 = arith.constant dense<0.000000e+00> : vector<256x384xf32>
    %18 = tpu.matmul %16, %17, %cst_7 {dimension_numbers = #tpu.dot_dimension_numbers<[1], [0], [0], [1], [0, 0, 1, 1], [], []>} : vector<256x640xbf16>, vector<640x384xbf16>, vector<256x384xf32> -> vector<256x384xf32>
    %c0_8 = arith.constant 0 : index
    %c0_9 = arith.constant 0 : index
    %19 = vector.load %arg4[%c0_8, %c0_9] : memref<256x384xf32, #tpu.memory_space<vmem>>, vector<256x384xf32>
    %20 = arith.addf %18, %19 : vector<256x384xf32>
    %cst_10 = arith.constant 0.000000e+00 : f32
    %21 = vector.broadcast %cst_10 : f32 to vector<256x384xf32>
    %22 = arith.maximumf %20, %21 : vector<256x384xf32>
    %23 = vector.shape_cast %22 : vector<256x384xf32> to vector<16x16x384xf32>
    %cst_11 = arith.constant dense<0xFF800000> : vector<16x384xf32>
    %24 = vector.multi_reduction <maximumf>, %23, %cst_11 [1] : vector<16x16x384xf32> to vector<16x384xf32>
    %25 = arith.truncf %24 : vector<16x384xf32> to vector<16x384xbf16>
    %c0_12 = arith.constant 0 : index
    %c0_13 = arith.constant 0 : index
    %26 = vector.load %arg5[%c0_12, %c0_13] : memref<384x128xbf16, #tpu.memory_space<vmem>>, vector<384x128xbf16>
    %cst_14 = arith.constant dense<0.000000e+00> : vector<16x128xf32>
    %27 = tpu.matmul %25, %26, %cst_14 {dimension_numbers = #tpu.dot_dimension_numbers<[1], [0], [0], [1], [0, 0, 1, 1], [], []>} : vector<16x384xbf16>, vector<384x128xbf16>, vector<16x128xf32> -> vector<16x128xf32>
    %c0_15 = arith.constant 0 : index
    %c0_16 = arith.constant 0 : index
    %28 = vector.load %arg6[%c0_15, %c0_16] : memref<1x128xf32, #tpu.memory_space<vmem>>, vector<1x128xf32>
    %29 = vector.broadcast %28 : vector<1x128xf32> to vector<16x128xf32>
    %30 = arith.addf %27, %29 : vector<16x128xf32>
    %c0_17 = arith.constant 0 : index
    %c0_18 = arith.constant 0 : index
    %31 = vector.load %arg7[%c0_17, %c0_18] : memref<16x128xf32, #tpu.memory_space<vmem>>, vector<16x128xf32>
    tpu.vector_store %arg7[%c0_17, %c0_18], %30 {strides = array<i32>} : memref<16x128xf32, #tpu.memory_space<vmem>>, vector<16x128xf32>,
    return
  }
  func.func @transform_0(%arg0: i32) -> (i32, i32) {
    %c0_i32 = arith.constant 0 : i32
    %c0_i32_0 = arith.constant 0 : i32
    return %arg0, %c0_i32 : i32, i32
  }
  func.func @transform_1(%arg0: i32) -> (i32, i32) {
    %c0_i32 = arith.constant 0 : i32
    %c0_i32_0 = arith.constant 0 : i32
    %c0_i32_1 = arith.constant 0 : i32
    return %c0_i32, %c0_i32_0 : i32, i32
  }
  func.func @transform_2(%arg0: i32) -> (i32, i32) {
    %c0_i32 = arith.constant 0 : i32
    %c0_i32_0 = arith.constant 0 : i32
    %c0_i32_1 = arith.constant 0 : i32
    return %c0_i32, %c0_i32_0 : i32, i32
  }
  func.func @transform_3(%arg0: i32) -> (i32, i32) {
    %c0_i32 = arith.constant 0 : i32
    %c0_i32_0 = arith.constant 0 : i32
    %c0_i32_1 = arith.constant 0 : i32
    return %c0_i32, %c0_i32_0 : i32, i32
  }
  func.func @transform_4(%arg0: i32) -> (i32, i32) {
    %c0_i32 = arith.constant 0 : i32
    %c0_i32_0 = arith.constant 0 : i32
    %c0_i32_1 = arith.constant 0 : i32
    return %c0_i32, %c0_i32_0 : i32, i32
  }
  func.func @transform_5(%arg0: i32) -> (i32, i32) {
    %c0_i32 = arith.constant 0 : i32
    %c0_i32_0 = arith.constant 0 : i32
    %c0_i32_1 = arith.constant 0 : i32
    return %c0_i32, %c0_i32_0 : i32, i32
  }
  func.func @transform_6(%arg0: i32) -> (i32, i32) {
    %c0_i32 = arith.constant 0 : i32
    %c0_i32_0 = arith.constant 0 : i32
    return %arg0, %c0_i32 : i32, i32
  }
}

</mosaic_0001>

<bundles_post_ra>
// kernel: textcnn_forward.1
= control target key start
LH: loop header
LB: loop body
LE: loop exit
PB: predicated region body
PF: predicated region fallthrough
CT: control target
= control target key end

     0   :  { %11 = vsyncpa [#allocation3], 0  ;;  %s6223_s21 = smov [#allocation2]   ;;  %s8201_s0 = inlined_call_operand.vmem [shape: s32[1280,1], index: 0, kind: input, shape index: {}]   ;;  %s8202_s1 = inlined_call_operand.vmem [shape: bf16[64,128], index: 1, kind: input, shape index: {}]   ;;  %s8203_s2 = inlined_call_operand.vmem [shape: bf16[640,384], index: 2, kind: input, shape index: {}]   ;;  %s8204_s3 = inlined_call_operand.hbm [shape: f32[256,384], index: 3, kind: input, shape index: {}]   ;;  %s8205_s4 = inlined_call_operand.vmem [shape: bf16[384,128], index: 4, kind: input, shape index: {}]   ;;  %s8206_s5 = inlined_call_operand.vmem [shape: f32[1,128], index: 5, kind: input, shape index: {}]   ;;  %s8207_s6 = inlined_call_operand.vmem [shape: f32[16,128], index: 6, kind: output, shape index: {}]  }
   0x1   :  { %s23_s22 = sshll.u32 %s6223_s21, 4  ;;  %s6199_s25 = scalar_lea.hbm %s8204_s3, 12288  ;;  %s24_s22 = int_to_ptr.vmem [resolvable:$true] %s23_s22 }
   0x2   :  { %p6200_p0 = scmp.ne.s32.totalorder %s8204_s3, %s6199_s25  ;;  %p6203_p1 = scmp.lt.u32.totalorder %s6199_s25, %s8204_s3 }
   0x4   :  { %p6205_p2 = pnand %p6203_p1, %p6200_p0 }
   0x6   :  { %6208 = shalt.err (!%p6205_p2)
}
   0x7   :  { %s6209_s30 = scalar_lea.vmem %s24_s22, 12288  ;;  %p6214_p4 = scmp.lt.s32.totalorder %s24_s22, %s24_s22 }
   0x8   :  { %p6210_p3 = scmp.ne.s32.totalorder %s24_s22, %s6209_s30  ;;  %p6215_p5 = scmp.lt.s32.totalorder %s6209_s30, %s6209_s30 }
   0xa   :  { %p6216_p6 = por %p6215_p5, %p6214_p4 }
   0xc   :  { %p6217_p7 = pnand %p6216_p6, %p6210_p3 }
   0xe   :  { %6220 = shalt.err (!%p6217_p7)
}
   0xf   :  { %s6224_s7 = smov 384   ;;  %s6225_s8 = smov 24  }
  0x10   :  { %29 = dma.hbm_to_vmem [thread:$0]  %s8204_s3, 12288, %s24_s22, [#allocation3], %s6224_s7, %s6224_s7, %s6225_s8  }
  0x11   :  { %6221 = dma.done.wait [#allocation3], 12288  }
  0x12   :  { %6222 = vsyncadd [#allocation3], 4294955008  ;;  %v6226_v0 = vmov 0   ;;  %v40_v1 = vld [vmem:[%s8201_s0 + $0x10] sm:$0xff]  ;;  %v38_v2 = vld [vmem:[%s8201_s0] sm:$0xff]  ;;  %vm1112_vm4 = vcmask 523264  }
  0x13   :  { %6010 = vset.pattern.permute.xlu1 %v6226_v0  ;;  %6009 = vset.pattern.permute.xlu0 %v6226_v0  ;;  %v41_v3 = vld [vmem:[%s8201_s0 + $0x18] sm:$0xff]  ;;  %v39_v4 = vld [vmem:[%s8201_s0 + $0x8] sm:$0xff]  ;;  %v42_v6 = vld [vmem:[%s8201_s0 + $0x20] sm:$0xff] }
  0x14   :  { %207 = vperm.xlu1 %6010, %v40_v1   ;;  %201 = vperm.xlu0 %6009, %v38_v2   ;;  %v43_v5 = vld [vmem:[%s8201_s0 + $0x28] sm:$0xff]  ;;  %v45_v7 = vld [vmem:[%s8201_s0 + $0x38] sm:$0xff]  ;;  %v44_v8 = vld [vmem:[%s8201_s0 + $0x30] sm:$0xff] }
  0x15   :  { %v47_v9 = vld [vmem:[%s8201_s0 + $0x48] sm:$0xff]  ;;  %v46_v10 = vld [vmem:[%s8201_s0 + $0x40] sm:$0xff]  ;;  %v49_v11 = vld [vmem:[%s8201_s0 + $0x58] sm:$0xff] }
  0x16   :  { %v48_v12 = vld [vmem:[%s8201_s0 + $0x50] sm:$0xff]  ;;  %v51_v13 = vld [vmem:[%s8201_s0 + $0x68] sm:$0xff]  ;;  %v6011_v14 = vld [vmem:[%s8202_s1] sm:$0xff]  }
  0x17   :  { %v50_v15 = vld [vmem:[%s8201_s0 + $0x60] sm:$0xff]  ;;  %5575 = vmatprep.subr.bf16.mxu0 %v6011_v14  ;;  %v6012_v16 = vld [vmem:[%s8202_s1 + $0x8] sm:$0xff]   ;;  %v53_v17 = vld [vmem:[%s8201_s0 + $0x78] sm:$0xff] }
  0x18   :  { %210 = vperm.xlu1 %6010, %v41_v3   ;;  %204 = vperm.xlu0 %6009, %v39_v4   ;;  %v52_v18 = vld [vmem:[%s8201_s0 + $0x70] sm:$0xff]  ;;  %v55_v20 = vld [vmem:[%s8201_s0 + $0x88] sm:$0xff]  ;;  %v54_v21 = vld [vmem:[%s8201_s0 + $0x80] sm:$0xff] }
  0x19   :  { %5576 = vmatpush3.bf16.msra.mxu0 %v6011_v14  ;;  %v6013_v19 = vld [vmem:[%s8202_s1 + $0x10] sm:$0xff]   ;;  %v6014_v22 = vld [vmem:[%s8202_s1 + $0x18] sm:$0xff]   ;;  %v59_v25 = vld [vmem:[%s8201_s0 + $0xa8] sm:$0xff] }
  0x1a   :  { %5577 = vmatprep.subr.bf16.mxu0 %v6012_v16  ;;  %v57_v23 = vld [vmem:[%s8201_s0 + $0x98] sm:$0xff]  ;;  %v56_v24 = vld [vmem:[%s8201_s0 + $0x90] sm:$0xff]  ;;  %v58_v26 = vld [vmem:[%s8201_s0 + $0xa0] sm:$0xff] }
  0x1b   :  { %v61_v27 = vld [vmem:[%s8201_s0 + $0xb8] sm:$0xff]  ;;  %v60_v28 = vld [vmem:[%s8201_s0 + $0xb0] sm:$0xff]  ;;  %v63_v29 = vld [vmem:[%s8201_s0 + $0xc8] sm:$0xff] }
  0x1c   :  { %216 = vperm.xlu1 %6010, %v43_v5   ;;  %213 = vperm.xlu0 %6009, %v42_v6   ;;  %v62_v30 = vld [vmem:[%s8201_s0 + $0xc0] sm:$0xff]  ;;  %v65_v31 = vld [vmem:[%s8201_s0 + $0xd8] sm:$0xff]  ;;  %v64_v32 = vld [vmem:[%s8201_s0 + $0xd0] sm:$0xff]  ;;  %v198_v6 = vlaneseq }
  0x1d   :  { %5578 = vmatpush3.bf16.msra.mxu0 %v6012_v16  ;;  %v67_v33 = vld [vmem:[%s8201_s0 + $0xe8] sm:$0xff]  ;;  %v66_v34 = vld [vmem:[%s8201_s0 + $0xe0] sm:$0xff]  ;;  %v69_v35 = vld [vmem:[%s8201_s0 + $0xf8] sm:$0xff]  ;;  %v8208_v16 = vmov 0.0  }
  0x1e   :  { %5579 = vmatprep.subr.bf16.mxu0 %v6013_v19  ;;  %v68_v36 = vld [vmem:[%s8201_s0 + $0xf0] sm:$0xff]  ;;  %v71_v37 = vld [vmem:[%s8201_s0 + $0x108] sm:$0xff]  ;;  %v70_v38 = vld [vmem:[%s8201_s0 + $0x100] sm:$0xff] }
  0x1f   :  { %v73_v39 = vld [vmem:[%s8201_s0 + $0x118] sm:$0xff]  ;;  %v72_v40 = vld [vmem:[%s8201_s0 + $0x110] sm:$0xff]  ;;  %v75_v41 = vld [vmem:[%s8201_s0 + $0x128] sm:$0xff] }
  0x20   :  { %222 = vperm.xlu1 %6010, %v45_v7   ;;  %219 = vperm.xlu0 %6009, %v44_v8   ;;  %v74_v42 = vld [vmem:[%s8201_s0 + $0x120] sm:$0xff]  ;;  %v77_v43 = vld [vmem:[%s8201_s0 + $0x138] sm:$0xff]  ;;  %v76_v44 = vld [vmem:[%s8201_s0 + $0x130] sm:$0xff] }
  0x21   :  { %5580 = vmatpush3.bf16.msra.mxu0 %v6013_v19  ;;  %v79_v45 = vld [vmem:[%s8201_s0 + $0x148] sm:$0xff]  ;;  %v78_v46 = vld [vmem:[%s8201_s0 + $0x140] sm:$0xff]  ;;  %v81_v47 = vld [vmem:[%s8201_s0 + $0x158] sm:$0xff] }
  0x22   :  { %5581 = vmatprep.subr.bf16.mxu0 %v6014_v22  ;;  %v80_v48 = vld [vmem:[%s8201_s0 + $0x150] sm:$0xff]  ;;  %v83_v49 = vld [vmem:[%s8201_s0 + $0x168] sm:$0xff]  ;;  %v82_v50 = vld [vmem:[%s8201_s0 + $0x160] sm:$0xff] }
  0x23   :  { %v85_v51 = vld [vmem:[%s8201_s0 + $0x178] sm:$0xff]  ;;  %v84_v52 = vld [vmem:[%s8201_s0 + $0x170] sm:$0xff]  ;;  %v87_v53 = vld [vmem:[%s8201_s0 + $0x188] sm:$0xff] }
  0x24   :  { %228 = vperm.xlu1 %6010, %v47_v9   ;;  %225 = vperm.xlu0 %6009, %v46_v10   ;;  %v86_v54 = vld [vmem:[%s8201_s0 + $0x180] sm:$0xff]  ;;  %v89_v55 = vld [vmem:[%s8201_s0 + $0x198] sm:$0xff]  ;;  %v88_v56 = vld [vmem:[%s8201_s0 + $0x190] sm:$0xff]  ;;  %v6488_v9 = vand.u32 127, %v198_v6 }
  0x25   :  { %5582 = vmatpush3.bf16.msra.mxu0 %v6014_v22  ;;  %v91_v57 = vld [vmem:[%s8201_s0 + $0x1a8] sm:$0xff]  ;;  %v90_v58 = vld [vmem:[%s8201_s0 + $0x1a0] sm:$0xff]  ;;  %v93_v59 = vld [vmem:[%s8201_s0 + $0x1b8] sm:$0xff] }
  0x26   :  { %v92_v60 = vld [vmem:[%s8201_s0 + $0x1b0] sm:$0xff]  ;;  %v95_v61 = vld [vmem:[%s8201_s0 + $0x1c8] sm:$0xff]  ;;  %v94_v62 = vld [vmem:[%s8201_s0 + $0x1c0] sm:$0xff] }
  0x27   :  { %v97_v63 = vld [vmem:[%s8201_s0 + $0x1d8] sm:$0xff]  ;;  %v96_v1 = vld [vmem:[%s8201_s0 + $0x1d0] sm:$0xff]  ;;  %v99_v2 = vld [vmem:[%s8201_s0 + $0x1e8] sm:$0xff] }
  0x28   :  { %234 = vperm.xlu1 %6010, %v49_v11   ;;  %231 = vperm.xlu0 %6009, %v48_v12   ;;  %v98_v3 = vld [vmem:[%s8201_s0 + $0x1e0] sm:$0xff]  ;;  %v101_v4 = vld [vmem:[%s8201_s0 + $0x1f8] sm:$0xff]  ;;  %v100_v5 = vld [vmem:[%s8201_s0 + $0x1f0] sm:$0xff] }
  0x29   :  { %v103_v7 = vld [vmem:[%s8201_s0 + $0x208] sm:$0xff]  ;;  %v102_v8 = vld [vmem:[%s8201_s0 + $0x200] sm:$0xff]  ;;  %v105_v12 = vld [vmem:[%s8201_s0 + $0x218] sm:$0xff] }
  0x2a   :  { %v107_v19 = vld [vmem:[%s8201_s0 + $0x228] sm:$0xff] }
  0x2c   :  { %240 = vperm.xlu1 %6010, %v51_v13   ;;  %237 = vperm.xlu0 %6009, %v50_v15   ;;  %v104_v13 = vld [vmem:[%s8201_s0 + $0x210] sm:$0xff] }
  0x30   :  { %246 = vperm.xlu1 %6010, %v53_v17   ;;  %243 = vperm.xlu0 %6009, %v52_v18  }
  0x34   :  { %252 = vperm.xlu1 %6010, %v55_v20   ;;  %249 = vperm.xlu0 %6009, %v54_v21   ;;  %v106_v20 = vld [vmem:[%s8201_s0 + $0x220] sm:$0xff] }
  0x38   :  { %258 = vperm.xlu1 %6010, %v57_v23   ;;  %255 = vperm.xlu0 %6009, %v56_v24  }
  0x3c   :  { %264 = vperm.xlu1 %6010, %v59_v25   ;;  %261 = vperm.xlu0 %6009, %v58_v26  }
  0x40   :  { %270 = vperm.xlu1 %6010, %v61_v27   ;;  %267 = vperm.xlu0 %6009, %v60_v28  }
  0x44   :  { %276 = vperm.xlu1 %6010, %v63_v29   ;;  %273 = vperm.xlu0 %6009, %v62_v30   ;;  %v109_v29 = vld [vmem:[%s8201_s0 + $0x238] sm:$0xff]  ;;  %v108_v30 = vld [vmem:[%s8201_s0 + $0x230] sm:$0xff] }
  0x48   :  { %282 = vperm.xlu1 %6010, %v65_v31   ;;  %279 = vperm.xlu0 %6009, %v64_v32  }
  0x4c   :  { %288 = vperm.xlu1 %6010, %v67_v33   ;;  %285 = vperm.xlu0 %6009, %v66_v34  }
  0x50   :  { %294 = vperm.xlu1 %6010, %v69_v35   ;;  %291 = vperm.xlu0 %6009, %v68_v36   ;;  %v111_v36 = vld [vmem:[%s8201_s0 + $0x248] sm:$0xff] }
  0x54   :  { %300 = vperm.xlu1 %6010, %v71_v37   ;;  %297 = vperm.xlu0 %6009, %v70_v38   ;;  %v110_v37 = vld [vmem:[%s8201_s0 + $0x240] sm:$0xff] }
  0x58   :  { %306 = vperm.xlu1 %6010, %v73_v39   ;;  %303 = vperm.xlu0 %6009, %v72_v40  }
  0x5c   :  { %312 = vperm.xlu1 %6010, %v75_v41   ;;  %309 = vperm.xlu0 %6009, %v74_v42  }
  0x60   :  { %318 = vperm.xlu1 %6010, %v77_v43   ;;  %315 = vperm.xlu0 %6009, %v76_v44   ;;  %v113_v43 = vld [vmem:[%s8201_s0 + $0x258] sm:$0xff]  ;;  %v112_v44 = vld [vmem:[%s8201_s0 + $0x250] sm:$0xff] }
  0x64   :  { %324 = vperm.xlu1 %6010, %v79_v45   ;;  %321 = vperm.xlu0 %6009, %v78_v46  }
  0x68   :  { %330 = vperm.xlu1 %6010, %v81_v47   ;;  %327 = vperm.xlu0 %6009, %v80_v48  }
  0x6c   :  { %336 = vperm.xlu1 %6010, %v83_v49   ;;  %333 = vperm.xlu0 %6009, %v82_v50   ;;  %v115_v50 = vld [vmem:[%s8201_s0 + $0x268] sm:$0xff] }
  0x70   :  { %342 = vperm.xlu1 %6010, %v85_v51   ;;  %339 = vperm.xlu0 %6009, %v84_v52   ;;  %v114_v51 = vld [vmem:[%s8201_s0 + $0x260] sm:$0xff] }
  0x74   :  { %348 = vperm.xlu1 %6010, %v87_v53   ;;  %345 = vperm.xlu0 %6009, %v86_v54  }
  0x78   :  { %354 = vperm.xlu1 %6010, %v89_v55   ;;  %351 = vperm.xlu0 %6009, %v88_v56  }
  0x7c   :  { %360 = vperm.xlu1 %6010, %v91_v57   ;;  %357 = vperm.xlu0 %6009, %v90_v58   ;;  %v117_v57 = vld [vmem:[%s8201_s0 + $0x278] sm:$0xff]  ;;  %v116_v58 = vld [vmem:[%s8201_s0 + $0x270] sm:$0xff] }
  0x80   :  { %366 = vperm.xlu1 %6010, %v93_v59   ;;  %363 = vperm.xlu0 %6009, %v92_v60  }
  0x84   :  { %372 = vperm.xlu1 %6010, %v95_v61   ;;  %369 = vperm.xlu0 %6009, %v94_v62  }
  0x88   :  { %378 = vperm.xlu1 %6010, %v97_v63   ;;  %375 = vperm.xlu0 %6009, %v96_v1   ;;  %v119_v1 = vld [vmem:[%s8201_s0 + $0x288] sm:$0xff] }
  0x8c   :  { %384 = vperm.xlu1 %6010, %v99_v2   ;;  %381 = vperm.xlu0 %6009, %v98_v3   ;;  %v118_v2 = vld [vmem:[%s8201_s0 + $0x280] sm:$0xff] }
  0x90   :  { %390 = vperm.xlu1 %6010, %v101_v4   ;;  %387 = vperm.xlu0 %6009, %v100_v5  }
  0x93   :  { %v208_v10 = vpop.permute.xlu1 %207  ;;  %v202_v11 = vpop.permute.xlu0 %201 }
  0x94   :  { %396 = vperm.xlu1 %6010, %v103_v7   ;;  %393 = vperm.xlu0 %6009, %v102_v8   ;;  %vm682_vm0 = vcmp.eq.s32.totalorder %v208_v10, %v6488_v9  ;;  %vm680_vm1 = vcmp.eq.s32.totalorder %v202_v11, %v6488_v9  ;;  %v121_v8 = vld [vmem:[%s8201_s0 + $0x298] sm:$0xff]  ;;  %v120_v10 = vld [vmem:[%s8201_s0 + $0x290] sm:$0xff] }
  0x95   :  { %v842_v17 = vsel %vm682_vm0, 1.0, %v8208_v16  ;;  %v840_v21 = vsel %vm680_vm1, 1.0, %v8208_v16 }
  0x97   :  { %v211_v14 = vpop.permute.xlu1 %210  ;;  %v205_v15 = vpop.permute.xlu0 %204 }
  0x98   :  { %vm683_vm2 = vcmp.eq.s32.totalorder %v211_v14, %v6488_v9  ;;  %vm681_vm3 = vcmp.eq.s32.totalorder %v205_v15, %v6488_v9  ;;  %402 = vperm.xlu1 %6010, %v105_v12   ;;  %399 = vperm.xlu0 %6009, %v104_v13  }
  0x99   :  { %v843_v18 = vsel %vm683_vm2, 1.0, %v8208_v16  ;;  %v841_v22 = vsel %vm681_vm3, 1.0, %v8208_v16 }
  0x9a   :  { %v1001_v23 = vpack.c.bf16 %v843_v18, %v842_v17  ;;  %v1000_v24 = vpack.c.bf16 %v841_v22, %v840_v21  ;;  %v123_v17 = vld [vmem:[%s8201_s0 + $0x2a8] sm:$0xff]  ;;  %v122_v18 = vld [vmem:[%s8201_s0 + $0x2a0] sm:$0xff] }
  0x9b   :  { %v217_v25 = vpop.permute.xlu1 %216  ;;  %v214_v26 = vpop.permute.xlu0 %213 }
  0x9c   :  { %vm685_vm5 = vcmp.eq.s32.totalorder %v217_v25, %v6488_v9  ;;  %vm684_vm6 = vcmp.eq.s32.totalorder %v214_v26, %v6488_v9  ;;  %408 = vperm.xlu1 %6010, %v107_v19   ;;  %405 = vperm.xlu0 %6009, %v106_v20   ;;  %v124_v25 = vld [vmem:[%s8201_s0 + $0x2b0] sm:$0xff] }
  0x9d   :  { %v845_v27 = vsel %vm685_vm5, 1.0, %v8208_v16  ;;  %v844_v28 = vsel %vm684_vm6, 1.0, %v8208_v16  ;;  %5583 = vmatprep.mubr.msk.bf16.mxu0 %vm1112_vm4, %v1000_v24  ;;  %v125_v24 = vld [vmem:[%s8201_s0 + $0x2b8] sm:$0xff] }
  0x9e   :  { %v1002_v31 = vpack.c.bf16 %v845_v27, %v844_v28  ;;  %5584 = vmatmul.mubr.msk.bf16.vlgmr.msra.gmra.mrb[0].mxu0 %vm1112_vm4, %v1001_v23 }
  0x9f   :  { %v223_v32 = vpop.permute.xlu1 %222  ;;  %v220_v33 = vpop.permute.xlu0 %219 }
  0xa0   :  { %vm687_vm7 = vcmp.eq.s32.totalorder %v223_v32, %v6488_v9  ;;  %vm686_vm8 = vcmp.eq.s32.totalorder %v220_v33, %v6488_v9  ;;  %414 = vperm.xlu1 %6010, %v109_v29   ;;  %411 = vperm.xlu0 %6009, %v108_v30   ;;  %v126_v32 = vld [vmem:[%s8201_s0 + $0x2c0] sm:$0xff] }
  0xa1   :  { %v847_v34 = vsel %vm687_vm7, 1.0, %v8208_v16  ;;  %v846_v35 = vsel %vm686_vm8, 1.0, %v8208_v16  ;;  %5587 = vmatprep.mubr.msk.bf16.mxu0 %vm1112_vm4, %v1002_v31  ;;  %v127_v31 = vld [vmem:[%s8201_s0 + $0x2c8] sm:$0xff] }
  0xa2   :  { %v1003_v38 = vpack.c.bf16 %v847_v34, %v846_v35 }
  0xa3   :  { %v229_v39 = vpop.permute.xlu1 %228  ;;  %v226_v40 = vpop.permute.xlu0 %225 }
  0xa4   :  { %vm689_vm9 = vcmp.eq.s32.totalorder %v229_v39, %v6488_v9  ;;  %vm688_vm10 = vcmp.eq.s32.totalorder %v226_v40, %v6488_v9  ;;  %420 = vperm.xlu1 %6010, %v111_v36   ;;  %417 = vperm.xlu0 %6009, %v110_v37   ;;  %v128_v39 = vld [vmem:[%s8201_s0 + $0x2d0] sm:$0xff] }
  0xa5   :  { %v849_v41 = vsel %vm689_vm9, 1.0, %v8208_v16  ;;  %v848_v42 = vsel %vm688_vm10, 1.0, %v8208_v16 }
  0xa6   :  { %v1004_v45 = vpack.c.bf16 %v849_v41, %v848_v42  ;;  %5588 = vmatmul.mubr.msk.bf16.gmra.mrb[4].mxu0 %vm1112_vm4, %v1003_v38  ;;  %v129_v38 = vld [vmem:[%s8201_s0 + $0x2d8] sm:$0xff] }
  0xa7   :  { %v235_v46 = vpop.permute.xlu1 %234  ;;  %v232_v47 = vpop.permute.xlu0 %231 }
  0xa8   :  { %vm691_vm11 = vcmp.eq.s32.totalorder %v235_v46, %v6488_v9  ;;  %vm690_vm12 = vcmp.eq.s32.totalorder %v232_v47, %v6488_v9  ;;  %426 = vperm.xlu1 %6010, %v113_v43   ;;  %423 = vperm.xlu0 %6009, %v112_v44   ;;  %v130_v46 = vld [vmem:[%s8201_s0 + $0x2e0] sm:$0xff] }
  0xa9   :  { %v851_v48 = vsel %vm691_vm11, 1.0, %v8208_v16  ;;  %v850_v49 = vsel %vm690_vm12, 1.0, %v8208_v16  ;;  %5591 = vmatprep.mubr.msk.bf16.mxu0 %vm1112_vm4, %v1004_v45  ;;  %v131_v45 = vld [vmem:[%s8201_s0 + $0x2e8] sm:$0xff] }
  0xaa   :  { %v1005_v52 = vpack.c.bf16 %v851_v48, %v850_v49 }
  0xab   :  { %v241_v53 = vpop.permute.xlu1 %240  ;;  %v238_v54 = vpop.permute.xlu0 %237 }
  0xac   :  { %vm693_vm13 = vcmp.eq.s32.totalorder %v241_v53, %v6488_v9  ;;  %vm692_vm14 = vcmp.eq.s32.totalorder %v238_v54, %v6488_v9  ;;  %432 = vperm.xlu1 %6010, %v115_v50   ;;  %429 = vperm.xlu0 %6009, %v114_v51   ;;  %v132_v53 = vld [vmem:[%s8201_s0 + $0x2f0] sm:$0xff] }
  0xad   :  { %v853_v55 = vsel %vm693_vm13, 1.0, %v8208_v16  ;;  %v852_v56 = vsel %vm692_vm14, 1.0, %v8208_v16 }
  0xae   :  { %v1006_v59 = vpack.c.bf16 %v853_v55, %v852_v56  ;;  %5592 = vmatmul.mubr.msk.bf16.gmra.mrb[8].mxu0 %vm1112_vm4, %v1005_v52  ;;  %v133_v52 = vld [vmem:[%s8201_s0 + $0x2f8] sm:$0xff] }
  0xaf   :  { %v247_v60 = vpop.permute.xlu1 %246  ;;  %v244_v61 = vpop.permute.xlu0 %243 }
  0xb0   :  { %vm695_vm15 = vcmp.eq.s32.totalorder %v247_v60, %v6488_v9  ;;  %vm694_vm0 = vcmp.eq.s32.totalorder %v244_v61, %v6488_v9  ;;  %438 = vperm.xlu1 %6010, %v117_v57   ;;  %435 = vperm.xlu0 %6009, %v116_v58   ;;  %v134_v60 = vld [vmem:[%s8201_s0 + $0x300] sm:$0xff] }
  0xb1   :  { %v855_v62 = vsel %vm695_vm15, 1.0, %v8208_v16  ;;  %v854_v63 = vsel %vm694_vm0, 1.0, %v8208_v16  ;;  %5595 = vmatprep.mubr.msk.bf16.mxu0 %vm1112_vm4, %v1006_v59  ;;  %v135_v59 = vld [vmem:[%s8201_s0 + $0x308] sm:$0xff] }
  0xb2   :  { %v1007_v3 = vpack.c.bf16 %v855_v62, %v854_v63 }
  0xb3   :  { %v253_v4 = vpop.permute.xlu1 %252  ;;  %v250_v5 = vpop.permute.xlu0 %249 }
  0xb4   :  { %vm697_vm1 = vcmp.eq.s32.totalorder %v253_v4, %v6488_v9  ;;  %vm696_vm2 = vcmp.eq.s32.totalorder %v250_v5, %v6488_v9  ;;  %444 = vperm.xlu1 %6010, %v119_v1   ;;  %441 = vperm.xlu0 %6009, %v118_v2   ;;  %v136_v4 = vld [vmem:[%s8201_s0 + $0x310] sm:$0xff] }
  0xb5   :  { %v857_v6 = vsel %vm697_vm1, 1.0, %v8208_v16  ;;  %v856_v7 = vsel %vm696_vm2, 1.0, %v8208_v16 }
  0xb6   :  { %v1008_v11 = vpack.c.bf16 %v857_v6, %v856_v7  ;;  %5596 = vmatmul.mubr.msk.bf16.gmra.mrb[12].mxu0 %vm1112_vm4, %v1007_v3  ;;  %v137_v3 = vld [vmem:[%s8201_s0 + $0x318] sm:$0xff] }
  0xb7   :  { %v259_v12 = vpop.permute.xlu1 %258  ;;  %v256_v13 = vpop.permute.xlu0 %255 }
  0xb8   :  { %vm699_vm3 = vcmp.eq.s32.totalorder %v259_v12, %v6488_v9  ;;  %vm698_vm5 = vcmp.eq.s32.totalorder %v256_v13, %v6488_v9  ;;  %450 = vperm.xlu1 %6010, %v121_v8   ;;  %447 = vperm.xlu0 %6009, %v120_v10   ;;  %v138_v12 = vld [vmem:[%s8201_s0 + $0x320] sm:$0xff] }
  0xb9   :  { %v859_v14 = vsel %vm699_vm3, 1.0, %v8208_v16  ;;  %v858_v15 = vsel %vm698_vm5, 1.0, %v8208_v16  ;;  %5599 = vmatprep.mubr.msk.bf16.mxu0 %vm1112_vm4, %v1008_v11  ;;  %v139_v11 = vld [vmem:[%s8201_s0 + $0x328] sm:$0xff] }
  0xba   :  { %v1009_v19 = vpack.c.bf16 %v859_v14, %v858_v15 }
  0xbb   :  { %v265_v20 = vpop.permute.xlu1 %264  ;;  %v262_v21 = vpop.permute.xlu0 %261 }
  0xbc   :  { %vm701_vm6 = vcmp.eq.s32.totalorder %v265_v20, %v6488_v9  ;;  %vm700_vm7 = vcmp.eq.s32.totalorder %v262_v21, %v6488_v9  ;;  %456 = vperm.xlu1 %6010, %v123_v17   ;;  %453 = vperm.xlu0 %6009, %v122_v18   ;;  %v140_v20 = vld [vmem:[%s8201_s0 + $0x330] sm:$0xff] }
  0xbd   :  { %v861_v22 = vsel %vm701_vm6, 1.0, %v8208_v16  ;;  %v860_v23 = vsel %vm700_vm7, 1.0, %v8208_v16 }
  0xbe   :  { %v1010_v26 = vpack.c.bf16 %v861_v22, %v860_v23  ;;  %5600 = vmatmul.mubr.msk.bf16.gmra.mrb[16].mxu0 %vm1112_vm4, %v1009_v19  ;;  %v141_v19 = vld [vmem:[%s8201_s0 + $0x338] sm:$0xff] }
  0xbf   :  { %v271_v27 = vpop.permute.xlu1 %270  ;;  %v268_v28 = vpop.permute.xlu0 %267 }
  0xc0   :  { %vm703_vm8 = vcmp.eq.s32.totalorder %v271_v27, %v6488_v9  ;;  %vm702_vm9 = vcmp.eq.s32.totalorder %v268_v28, %v6488_v9  ;;  %462 = vperm.xlu1 %6010, %v125_v24   ;;  %459 = vperm.xlu0 %6009, %v124_v25   ;;  %v142_v27 = vld [vmem:[%s8201_s0 + $0x340] sm:$0xff] }
  0xc1   :  { %v863_v29 = vsel %vm703_vm8, 1.0, %v8208_v16  ;;  %v862_v30 = vsel %vm702_vm9, 1.0, %v8208_v16  ;;  %5603 = vmatprep.mubr.msk.bf16.mxu0 %vm1112_vm4, %v1010_v26  ;;  %v143_v26 = vld [vmem:[%s8201_s0 + $0x348] sm:$0xff] }
  0xc2   :  { %v1011_v33 = vpack.c.bf16 %v863_v29, %v862_v30 }
  0xc3   :  { %v277_v34 = vpop.permute.xlu1 %276  ;;  %v274_v35 = vpop.permute.xlu0 %273 }
  0xc4   :  { %vm705_vm10 = vcmp.eq.s32.totalorder %v277_v34, %v6488_v9  ;;  %vm704_vm11 = vcmp.eq.s32.totalorder %v274_v35, %v6488_v9  ;;  %468 = vperm.xlu1 %6010, %v127_v31   ;;  %465 = vperm.xlu0 %6009, %v126_v32   ;;  %v144_v34 = vld [vmem:[%s8201_s0 + $0x350] sm:$0xff] }
  0xc5   :  { %v865_v36 = vsel %vm705_vm10, 1.0, %v8208_v16  ;;  %v864_v37 = vsel %vm704_vm11, 1.0, %v8208_v16 }
  0xc6   :  { %v1012_v40 = vpack.c.bf16 %v865_v36, %v864_v37  ;;  %5604 = vmatmul.mubr.msk.bf16.gmra.mrb[20].mxu0 %vm1112_vm4, %v1011_v33  ;;  %v145_v33 = vld [vmem:[%s8201_s0 + $0x358] sm:$0xff] }
  0xc7   :  { %v283_v41 = vpop.permute.xlu1 %282  ;;  %v280_v42 = vpop.permute.xlu0 %279 }
  0xc8   :  { %vm707_vm12 = vcmp.eq.s32.totalorder %v283_v41, %v6488_v9  ;;  %vm706_vm13 = vcmp.eq.s32.totalorder %v280_v42, %v6488_v9  ;;  %474 = vperm.xlu1 %6010, %v129_v38   ;;  %471 = vperm.xlu0 %6009, %v128_v39   ;;  %v146_v41 = vld [vmem:[%s8201_s0 + $0x360] sm:$0xff] }
  0xc9   :  { %v867_v43 = vsel %vm707_vm12, 1.0, %v8208_v16  ;;  %v866_v44 = vsel %vm706_vm13, 1.0, %v8208_v16  ;;  %5607 = vmatprep.mubr.msk.bf16.mxu0 %vm1112_vm4, %v1012_v40  ;;  %v147_v40 = vld [vmem:[%s8201_s0 + $0x368] sm:$0xff] }
  0xca   :  { %v1013_v47 = vpack.c.bf16 %v867_v43, %v866_v44 }
  0xcb   :  { %v289_v48 = vpop.permute.xlu1 %288  ;;  %v286_v49 = vpop.permute.xlu0 %285 }
  0xcc   :  { %vm709_vm14 = vcmp.eq.s32.totalorder %v289_v48, %v6488_v9  ;;  %vm708_vm15 = vcmp.eq.s32.totalorder %v286_v49, %v6488_v9  ;;  %480 = vperm.xlu1 %6010, %v131_v45   ;;  %477 = vperm.xlu0 %6009, %v130_v46   ;;  %v148_v48 = vld [vmem:[%s8201_s0 + $0x370] sm:$0xff] }
  0xcd   :  { %v869_v50 = vsel %vm709_vm14, 1.0, %v8208_v16  ;;  %v868_v51 = vsel %vm708_vm15, 1.0, %v8208_v16 }
  0xce   :  { %v1014_v54 = vpack.c.bf16 %v869_v50, %v868_v51  ;;  %5608 = vmatmul.mubr.msk.bf16.gmra.mrb[24].mxu0 %vm1112_vm4, %v1013_v47  ;;  %v149_v47 = vld [vmem:[%s8201_s0 + $0x378] sm:$0xff] }
  0xcf   :  { %v295_v55 = vpop.permute.xlu1 %294  ;;  %v292_v56 = vpop.permute.xlu0 %291 }
  0xd0   :  { %vm711_vm0 = vcmp.eq.s32.totalorder %v295_v55, %v6488_v9  ;;  %vm710_vm1 = vcmp.eq.s32.totalorder %v292_v56, %v6488_v9  ;;  %486 = vperm.xlu1 %6010, %v133_v52   ;;  %483 = vperm.xlu0 %6009, %v132_v53   ;;  %v150_v55 = vld [vmem:[%s8201_s0 + $0x380] sm:$0xff] }
  0xd1   :  { %v871_v57 = vsel %vm711_vm0, 1.0, %v8208_v16  ;;  %v870_v58 = vsel %vm710_vm1, 1.0, %v8208_v16  ;;  %5611 = vmatprep.mubr.msk.bf16.mxu0 %vm1112_vm4, %v1014_v54  ;;  %v151_v54 = vld [vmem:[%s8201_s0 + $0x388] sm:$0xff] }
  0xd2   :  { %v1015_v61 = vpack.c.bf16 %v871_v57, %v870_v58 }
  0xd3   :  { %v301_v62 = vpop.permute.xlu1 %300  ;;  %v298_v63 = vpop.permute.xlu0 %297 }
  0xd4   :  { %vm713_vm2 = vcmp.eq.s32.totalorder %v301_v62, %v6488_v9  ;;  %vm712_vm3 = vcmp.eq.s32.totalorder %v298_v63, %v6488_v9  ;;  %492 = vperm.xlu1 %6010, %v135_v59   ;;  %489 = vperm.xlu0 %6009, %v134_v60   ;;  %v152_v62 = vld [vmem:[%s8201_s0 + $0x390] sm:$0xff] }
  0xd5   :  { %v873_v1 = vsel %vm713_vm2, 1.0, %v8208_v16  ;;  %v872_v2 = vsel %vm712_vm3, 1.0, %v8208_v16 }
  0xd6   :  { %v1016_v5 = vpack.c.bf16 %v873_v1, %v872_v2  ;;  %5612 = vmatmul.mubr.msk.bf16.gmra.mrb[28].mxu0 %vm1112_vm4, %v1015_v61  ;;  %v153_v61 = vld [vmem:[%s8201_s0 + $0x398] sm:$0xff]  ;;  %v6015_v1 = vld [vmem:[%s8203_s2 + $0x4] ss:$12 sps:$4 sm:$0xff]  }
  0xd7   :  { %v307_v6 = vpop.permute.xlu1 %306  ;;  %v304_v7 = vpop.permute.xlu0 %303  ;;  %3002 = vmatprep.subr.bf16.mxu1 %v6015_v1  ;;  %v166_v1 = vld [vmem:[%s8201_s0 + $0x400] sm:$0xff] }
  0xd8   :  { %vm715_vm5 = vcmp.eq.s32.totalorder %v307_v6, %v6488_v9  ;;  %vm714_vm6 = vcmp.eq.s32.totalorder %v304_v7, %v6488_v9  ;;  %498 = vperm.xlu1 %6010, %v137_v3   ;;  %495 = vperm.xlu0 %6009, %v136_v4   ;;  %v6017_v4 = vld [vmem:[%s8203_s2] ss:$12 sps:$4 sm:$0xff]  }
  0xd9   :  { %v875_v8 = vsel %vm715_vm5, 1.0, %v8208_v16  ;;  %v874_v10 = vsel %vm714_vm6, 1.0, %v8208_v16  ;;  %5615 = vmatprep.mubr.msk.bf16.mxu0 %vm1112_vm4, %v1016_v5  ;;  %v155_v7 = vld [vmem:[%s8201_s0 + $0x3a8] sm:$0xff]  ;;  %3003 = vmatpush1.bf16.msra.mxu1 %v6017_v4 }
  0xda   :  { %v1017_v13 = vpack.c.bf16 %v875_v8, %v874_v10  ;;  %v154_v8 = vld [vmem:[%s8201_s0 + $0x3a0] sm:$0xff] }
  0xdb   :  { %v313_v14 = vpop.permute.xlu1 %312  ;;  %v310_v15 = vpop.permute.xlu0 %309 }
  0xdc   :  { %vm717_vm7 = vcmp.eq.s32.totalorder %v313_v14, %v6488_v9  ;;  %vm716_vm8 = vcmp.eq.s32.totalorder %v310_v15, %v6488_v9  ;;  %504 = vperm.xlu1 %6010, %v139_v11   ;;  %501 = vperm.xlu0 %6009, %v138_v12   ;;  %v6018_v11 = vld [vmem:[%s8203_s2 + $0x1c] ss:$12 sps:$4 sm:$0xff]   ;;  %v6020_v14 = vld [vmem:[%s8203_s2 + $0x18] ss:$12 sps:$4 sm:$0xff]  }
  0xdd   :  { %v877_v17 = vsel %vm717_vm7, 1.0, %v8208_v16  ;;  %v876_v18 = vsel %vm716_vm8, 1.0, %v8208_v16  ;;  %3004 = vmatprep.subr.bf16.mxu1 %v6018_v11  ;;  %v168_v11 = vld [vmem:[%s8201_s0 + $0x410] sm:$0xff] }
  0xde   :  { %v1018_v21 = vpack.c.bf16 %v877_v17, %v876_v18  ;;  %5616 = vmatmul.mubr.msk.bf16.gmra.mrb[32].mxu0 %vm1112_vm4, %v1017_v13  ;;  %v157_v18 = vld [vmem:[%s8201_s0 + $0x3b8] sm:$0xff]  ;;  %3005 = vmatpush1.bf16.msra.mxu1 %v6020_v14 }
  0xdf   :  { %v319_v22 = vpop.permute.xlu1 %318  ;;  %v316_v23 = vpop.permute.xlu0 %315 }
  0xe0   :  { %vm719_vm9 = vcmp.eq.s32.totalorder %v319_v22, %v6488_v9  ;;  %vm718_vm10 = vcmp.eq.s32.totalorder %v316_v23, %v6488_v9  ;;  %510 = vperm.xlu1 %6010, %v141_v19   ;;  %507 = vperm.xlu0 %6009, %v140_v20   ;;  %v156_v19 = vld [vmem:[%s8201_s0 + $0x3b0] sm:$0xff] }
  0xe1   :  { %v879_v24 = vsel %vm719_vm9, 1.0, %v8208_v16  ;;  %v878_v25 = vsel %vm718_vm10, 1.0, %v8208_v16  ;;  %5619 = vmatprep.mubr.msk.bf16.mxu0 %vm1112_vm4, %v1018_v21  ;;  %v6021_v21 = vld [vmem:[%s8203_s2 + $0x34] ss:$12 sps:$4 sm:$0xff]  }
  0xe2   :  { %v1019_v28 = vpack.c.bf16 %v879_v24, %v878_v25  ;;  %v6023_v24 = vld [vmem:[%s8203_s2 + $0x30] ss:$12 sps:$4 sm:$0xff]   ;;  %3006 = vmatprep.subr.bf16.mxu1 %v6021_v21  ;;  %v170_v21 = vld [vmem:[%s8201_s0 + $0x420] sm:$0xff] }
  0xe3   :  { %v325_v29 = vpop.permute.xlu1 %324  ;;  %v322_v30 = vpop.permute.xlu0 %321  ;;  %3007 = vmatpush1.bf16.msra.mxu1 %v6023_v24 }
  0xe4   :  { %vm721_vm11 = vcmp.eq.s32.totalorder %v325_v29, %v6488_v9  ;;  %vm720_vm12 = vcmp.eq.s32.totalorder %v322_v30, %v6488_v9  ;;  %516 = vperm.xlu1 %6010, %v143_v26   ;;  %513 = vperm.xlu0 %6009, %v142_v27   ;;  %v159_v27 = vld [vmem:[%s8201_s0 + $0x3c8] sm:$0xff] }
  0xe5   :  { %v881_v31 = vsel %vm721_vm11, 1.0, %v8208_v16  ;;  %v880_v32 = vsel %vm720_vm12, 1.0, %v8208_v16  ;;  %v6024_v30 = vld [vmem:[%s8203_s2 + $0x4c] ss:$12 sps:$4 sm:$0xff]  }
  0xe6   :  { %v1020_v35 = vpack.c.bf16 %v881_v31, %v880_v32  ;;  %5620 = vmatmul.mubr.msk.bf16.gmra.mrb[36].mxu0 %vm1112_vm4, %v1019_v28  ;;  %v158_v28 = vld [vmem:[%s8201_s0 + $0x3c0] sm:$0xff]  ;;  %3008 = vmatprep.subr.bf16.mxu1 %v6024_v30  ;;  %v172_v30 = vld [vmem:[%s8201_s0 + $0x430] sm:$0xff] }
  0xe7   :  { %v331_v36 = vpop.permute.xlu1 %330  ;;  %v328_v37 = vpop.permute.xlu0 %327 }
  0xe8   :  { %vm723_vm13 = vcmp.eq.s32.totalorder %v331_v36, %v6488_v9  ;;  %vm722_vm14 = vcmp.eq.s32.totalorder %v328_v37, %v6488_v9  ;;  %522 = vperm.xlu1 %6010, %v145_v33   ;;  %519 = vperm.xlu0 %6009, %v144_v34   ;;  %v6026_v33 = vld [vmem:[%s8203_s2 + $0x48] ss:$12 sps:$4 sm:$0xff]   ;;  %v161_v36 = vld [vmem:[%s8201_s0 + $0x3d8] sm:$0xff] }
  0xe9   :  { %v883_v38 = vsel %vm723_vm13, 1.0, %v8208_v16  ;;  %v882_v39 = vsel %vm722_vm14, 1.0, %v8208_v16  ;;  %5623 = vmatprep.mubr.msk.bf16.mxu0 %vm1112_vm4, %v1020_v35  ;;  %v160_v37 = vld [vmem:[%s8201_s0 + $0x3d0] sm:$0xff]  ;;  %3009 = vmatpush1.bf16.msra.mxu1 %v6026_v33 }
  0xea   :  { %v1021_v42 = vpack.c.bf16 %v883_v38, %v882_v39  ;;  %v6027_v39 = vld [vmem:[%s8203_s2 + $0x64] ss:$12 sps:$4 sm:$0xff]  }
  0xeb   :  { %v337_v43 = vpop.permute.xlu1 %336  ;;  %v334_v44 = vpop.permute.xlu0 %333  ;;  %3010 = vmatprep.subr.bf16.mxu1 %v6027_v39  ;;  %v174_v39 = vld [vmem:[%s8201_s0 + $0x440] sm:$0xff] }
  0xec   :  { %vm725_vm15 = vcmp.eq.s32.totalorder %v337_v43, %v6488_v9  ;;  %vm724_vm0 = vcmp.eq.s32.totalorder %v334_v44, %v6488_v9  ;;  %528 = vperm.xlu1 %6010, %v147_v40   ;;  %525 = vperm.xlu0 %6009, %v146_v41  }
  0xed   :  { %v885_v45 = vsel %vm725_vm15, 1.0, %v8208_v16  ;;  %v884_v46 = vsel %vm724_vm0, 1.0, %v8208_v16 }
  0xee   :  { %v1022_v49 = vpack.c.bf16 %v885_v45, %v884_v46  ;;  %5624 = vmatmul.mubr.msk.bf16.gmra.mrb[40].mxu0 %vm1112_vm4, %v1021_v42  ;;  %v6029_v42 = vld [vmem:[%s8203_s2 + $0x60] ss:$12 sps:$4 sm:$0xff]  }
  0xef   :  { %v343_v50 = vpop.permute.xlu1 %342  ;;  %v340_v51 = vpop.permute.xlu0 %339  ;;  %v163_v45 = vld [vmem:[%s8201_s0 + $0x3e8] sm:$0xff]  ;;  %v162_v46 = vld [vmem:[%s8201_s0 + $0x3e0] sm:$0xff]  ;;  %3011 = vmatpush1.bf16.msra.mxu1 %v6029_v42 }
  0xf0   :  { %vm727_vm1 = vcmp.eq.s32.totalorder %v343_v50, %v6488_v9  ;;  %vm726_vm2 = vcmp.eq.s32.totalorder %v340_v51, %v6488_v9  ;;  %534 = vperm.xlu1 %6010, %v149_v47   ;;  %531 = vperm.xlu0 %6009, %v148_v48   ;;  %v6030_v48 = vld [vmem:[%s8203_s2 + $0x7c] ss:$12 sps:$4 sm:$0xff]   ;;  %v6032_v51 = vld [vmem:[%s8203_s2 + $0x78] ss:$12 sps:$4 sm:$0xff]  }
  0xf1   :  { %v887_v52 = vsel %vm727_vm1, 1.0, %v8208_v16  ;;  %v886_v53 = vsel %vm726_vm2, 1.0, %v8208_v16  ;;  %5627 = vmatprep.mubr.msk.bf16.mxu0 %vm1112_vm4, %v1022_v49  ;;  %3012 = vmatprep.subr.bf16.mxu1 %v6030_v48  ;;  %v176_v48 = vld [vmem:[%s8201_s0 + $0x450] sm:$0xff] }
  0xf2   :  { %v1023_v56 = vpack.c.bf16 %v887_v52, %v886_v53 }
  0xf3   :  { %v349_v57 = vpop.permute.xlu1 %348  ;;  %v346_v58 = vpop.permute.xlu0 %345  ;;  %3013 = vmatpush1.bf16.msra.mxu1 %v6032_v51 }
  0xf4   :  { %vm729_vm3 = vcmp.eq.s32.totalorder %v349_v57, %v6488_v9  ;;  %vm728_vm5 = vcmp.eq.s32.totalorder %v346_v58, %v6488_v9  ;;  %540 = vperm.xlu1 %6010, %v151_v54   ;;  %537 = vperm.xlu0 %6009, %v150_v55   ;;  %v165_v54 = vld [vmem:[%s8201_s0 + $0x3f8] sm:$0xff]  ;;  %v164_v55 = vld [vmem:[%s8201_s0 + $0x3f0] sm:$0xff] }
  0xf5   :  { %v889_v59 = vsel %vm729_vm3, 1.0, %v8208_v16  ;;  %v888_v60 = vsel %vm728_vm5, 1.0, %v8208_v16  ;;  %v6033_v57 = vld [vmem:[%s8203_s2 + $0x94] ss:$12 sps:$4 sm:$0xff]  }
  0xf6   :  { %v1024_v63 = vpack.c.bf16 %v889_v59, %v888_v60  ;;  %5628 = vmatmul.mubr.msk.bf16.gmra.mrb[44].mxu0 %vm1112_vm4, %v1023_v56  ;;  %v6035_v60 = vld [vmem:[%s8203_s2 + $0x90] ss:$12 sps:$4 sm:$0xff]   ;;  %3014 = vmatprep.subr.bf16.mxu1 %v6033_v57  ;;  %v178_v57 = vld [vmem:[%s8201_s0 + $0x460] sm:$0xff] }
  0xf7   :  { %v355_v2 = vpop.permute.xlu1 %354  ;;  %v352_v3 = vpop.permute.xlu0 %351  ;;  %3015 = vmatpush1.bf16.msra.mxu1 %v6035_v60 }
  0xf8   :  { %vm731_vm6 = vcmp.eq.s32.totalorder %v355_v2, %v6488_v9  ;;  %vm730_vm7 = vcmp.eq.s32.totalorder %v352_v3, %v6488_v9  ;;  %546 = vperm.xlu1 %6010, %v153_v61   ;;  %543 = vperm.xlu0 %6009, %v152_v62   ;;  %v6036_v3 = vld [vmem:[%s8203_s2 + $0xac] ss:$12 sps:$4 sm:$0xff]  }
  0xf9   :  { %v891_v5 = vsel %vm731_vm6, 1.0, %v8208_v16  ;;  %v890_v6 = vsel %vm730_vm7, 1.0, %v8208_v16  ;;  %5631 = vmatprep.mubr.msk.bf16.mxu0 %vm1112_vm4, %v1024_v63  ;;  %v167_v63 = vld [vmem:[%s8201_s0 + $0x408] sm:$0xff]  ;;  %3016 = vmatprep.subr.bf16.mxu1 %v6036_v3  ;;  %v180_v3 = vld [vmem:[%s8201_s0 + $0x470] sm:$0xff] }
  0xfa   :  { %v1025_v10 = vpack.c.bf16 %v891_v5, %v890_v6  ;;  %v6038_v6 = vld [vmem:[%s8203_s2 + $0xa8] ss:$12 sps:$4 sm:$0xff]  }
  0xfb   :  { %v361_v12 = vpop.permute.xlu1 %360  ;;  %v358_v13 = vpop.permute.xlu0 %357  ;;  %3017 = vmatpush1.bf16.msra.mxu1 %v6038_v6 }
  0xfc   :  { %vm733_vm8 = vcmp.eq.s32.totalorder %v361_v12, %v6488_v9  ;;  %vm732_vm9 = vcmp.eq.s32.totalorder %v358_v13, %v6488_v9  ;;  %552 = vperm.xlu1 %6010, %v155_v7   ;;  %549 = vperm.xlu0 %6009, %v154_v8   ;;  %v6039_v13 = vld [vmem:[%s8203_s2 + $0xc4] ss:$12 sps:$4 sm:$0xff]  }
  0xfd   :  { %v893_v15 = vsel %vm733_vm8, 1.0, %v8208_v16  ;;  %v892_v17 = vsel %vm732_vm9, 1.0, %v8208_v16  ;;  %3018 = vmatprep.subr.bf16.mxu1 %v6039_v13  ;;  %v182_v13 = vld [vmem:[%s8201_s0 + $0x480] sm:$0xff] }
  0xfe   :  { %v1026_v20 = vpack.c.bf16 %v893_v15, %v892_v17  ;;  %5632 = vmatmul.mubr.msk.bf16.gmra.mrb[48].mxu0 %vm1112_vm4, %v1025_v10  ;;  %v169_v10 = vld [vmem:[%s8201_s0 + $0x418] sm:$0xff]  ;;  %v6041_v17 = vld [vmem:[%s8203_s2 + $0xc0] ss:$12 sps:$4 sm:$0xff]  }
  0xff   :  { %v367_v22 = vpop.permute.xlu1 %366  ;;  %v364_v23 = vpop.permute.xlu0 %363  ;;  %3019 = vmatpush1.bf16.msra.mxu1 %v6041_v17 }
 0x100   :  { %vm735_vm10 = vcmp.eq.s32.totalorder %v367_v22, %v6488_v9  ;;  %vm734_vm11 = vcmp.eq.s32.totalorder %v364_v23, %v6488_v9  ;;  %558 = vperm.xlu1 %6010, %v157_v18   ;;  %555 = vperm.xlu0 %6009, %v156_v19   ;;  %v6042_v23 = vld [vmem:[%s8203_s2 + $0xdc] ss:$12 sps:$4 sm:$0xff]  }
 0x101   :  { %v895_v25 = vsel %vm735_vm10, 1.0, %v8208_v16  ;;  %v894_v26 = vsel %vm734_vm11, 1.0, %v8208_v16  ;;  %5635 = vmatprep.mubr.msk.bf16.mxu0 %vm1112_vm4, %v1026_v20  ;;  %v171_v20 = vld [vmem:[%s8201_s0 + $0x428] sm:$0xff]  ;;  %3020 = vmatprep.subr.bf16.mxu1 %v6042_v23  ;;  %v184_v23 = vld [vmem:[%s8201_s0 + $0x490] sm:$0xff] }
 0x102   :  { %v1027_v29 = vpack.c.bf16 %v895_v25, %v894_v26  ;;  %v6044_v26 = vld [vmem:[%s8203_s2 + $0xd8] ss:$12 sps:$4 sm:$0xff]  }
 0x103   :  { %v373_v31 = vpop.permute.xlu1 %372  ;;  %v370_v32 = vpop.permute.xlu0 %369  ;;  %3021 = vmatpush1.bf16.msra.mxu1 %v6044_v26 }
 0x104   :  { %vm737_vm12 = vcmp.eq.s32.totalorder %v373_v31, %v6488_v9  ;;  %vm736_vm13 = vcmp.eq.s32.totalorder %v370_v32, %v6488_v9  ;;  %564 = vperm.xlu1 %6010, %v159_v27   ;;  %561 = vperm.xlu0 %6009, %v158_v28   ;;  %v6045_v32 = vld [vmem:[%s8203_s2 + $0xf4] ss:$12 sps:$4 sm:$0xff]  }
 0x105   :  { %v897_v34 = vsel %vm737_vm12, 1.0, %v8208_v16  ;;  %v896_v35 = vsel %vm736_vm13, 1.0, %v8208_v16  ;;  %3022 = vmatprep.subr.bf16.mxu1 %v6045_v32 }
 0x106   :  { %v1028_v38 = vpack.c.bf16 %v897_v34, %v896_v35  ;;  %5636 = vmatmul.mubr.msk.bf16.gmra.mrb[52].mxu0 %vm1112_vm4, %v1027_v29  ;;  %v173_v29 = vld [vmem:[%s8201_s0 + $0x438] sm:$0xff] }
 0x107   :  { %v379_v40 = vpop.permute.xlu1 %378  ;;  %v376_v41 = vpop.permute.xlu0 %375  ;;  %v6047_v35 = vld [vmem:[%s8203_s2 + $0xf0] ss:$12 sps:$4 sm:$0xff]  }
 0x108   :  { %vm739_vm14 = vcmp.eq.s32.totalorder %v379_v40, %v6488_v9  ;;  %vm738_vm15 = vcmp.eq.s32.totalorder %v376_v41, %v6488_v9  ;;  %570 = vperm.xlu1 %6010, %v161_v36   ;;  %567 = vperm.xlu0 %6009, %v160_v37   ;;  %v6048_v41 = vld [vmem:[%s8203_s2 + $0x10c] ss:$12 sps:$4 sm:$0xff]  }
 0x109   :  { %v899_v43 = vsel %vm739_vm14, 1.0, %v8208_v16  ;;  %v898_v44 = vsel %vm738_vm15, 1.0, %v8208_v16  ;;  %5639 = vmatprep.mubr.msk.bf16.mxu0 %vm1112_vm4, %v1028_v38  ;;  %v175_v38 = vld [vmem:[%s8201_s0 + $0x448] sm:$0xff]  ;;  %3023 = vmatpush1.bf16.msra.mxu1 %v6047_v35 }
 0x10a   :  { %v1029_v47 = vpack.c.bf16 %v899_v43, %v898_v44  ;;  %v6050_v44 = vld [vmem:[%s8203_s2 + $0x108] ss:$12 sps:$4 sm:$0xff]   ;;  %3024 = vmatprep.subr.bf16.mxu1 %v6048_v41 }
 0x10b   :  { %v385_v49 = vpop.permute.xlu1 %384  ;;  %v382_v50 = vpop.permute.xlu0 %381  ;;  %v6066_v35 = vld [vmem:[%s8203_s2 + $0xc8] ss:$12 sps:$4 sm:$0xff]  }
 0x10c   :  { %vm741_vm0 = vcmp.eq.s32.totalorder %v385_v49, %v6488_v9  ;;  %vm740_vm1 = vcmp.eq.s32.totalorder %v382_v50, %v6488_v9  ;;  %576 = vperm.xlu1 %6010, %v163_v45   ;;  %573 = vperm.xlu0 %6009, %v162_v46   ;;  %v6051_v50 = vld [vmem:[%s8203_s2 + $0x124] ss:$12 sps:$4 sm:$0xff]  }
 0x10d   :  { %v901_v52 = vsel %vm741_vm0, 1.0, %v8208_v16  ;;  %v900_v53 = vsel %vm740_vm1, 1.0, %v8208_v16  ;;  %3025 = vmatpush1.bf16.msra.mxu1 %v6050_v44  ;;  %5296 = vmatprep.subr.bf16.mxu0 %v6066_v35  ;;  %v6092_v35 = vld [vmem:[%s8203_s2 + $0x170] ss:$12 sps:$4 sm:$0xff]  }
 0x10e   :  { %v1030_v56 = vpack.c.bf16 %v901_v52, %v900_v53  ;;  %5640 = vmatmul.mubr.msk.bf16.gmra.mrb[56].mxu0 %vm1112_vm4, %v1029_v47  ;;  %v177_v47 = vld [vmem:[%s8201_s0 + $0x458] sm:$0xff]  ;;  %v6053_v53 = vld [vmem:[%s8203_s2 + $0x120] ss:$12 sps:$4 sm:$0xff]   ;;  %3026 = vmatprep.subr.bf16.mxu1 %v6051_v50 }
 0x10f   :  { %v391_v58 = vpop.permute.xlu1 %390  ;;  %v388_v59 = vpop.permute.xlu0 %387  ;;  %v6072_v50 = vld [vmem:[%s8203_s2 + $0x20] ss:$12 sps:$4 sm:$0xff]  }
 0x110   :  { %vm743_vm2 = vcmp.eq.s32.totalorder %v391_v58, %v6488_v9  ;;  %vm742_vm3 = vcmp.eq.s32.totalorder %v388_v59, %v6488_v9  ;;  %582 = vperm.xlu1 %6010, %v165_v54   ;;  %579 = vperm.xlu0 %6009, %v164_v55   ;;  %v6054_v59 = vld [vmem:[%s8203_s2 + $0x13c] ss:$12 sps:$4 sm:$0xff]  }
 0x111   :  { %v903_v61 = vsel %vm743_vm2, 1.0, %v8208_v16  ;;  %v902_v62 = vsel %vm742_vm3, 1.0, %v8208_v16  ;;  %5643 = vmatprep.mubr.msk.bf16.mxu0 %vm1112_vm4, %v1030_v56  ;;  %v179_v56 = vld [vmem:[%s8201_s0 + $0x468] sm:$0xff]  ;;  %3027 = vmatpush1.bf16.msra.mxu1 %v6053_v53 }
 0x112   :  { %v1031_v2 = vpack.c.bf16 %v903_v61, %v902_v62  ;;  %v6056_v62 = vld [vmem:[%s8203_s2 + $0x138] ss:$12 sps:$4 sm:$0xff]   ;;  %3028 = vmatprep.subr.bf16.mxu1 %v6054_v59 }
 0x113   :  { %v397_v4 = vpop.permute.xlu1 %396  ;;  %v394_v5 = vpop.permute.xlu0 %393  ;;  %v6077_v59 = vld [vmem:[%s8203_s2 + $0x38] ss:$12 sps:$4 sm:$0xff]  }
 0x114   :  { %vm745_vm5 = vcmp.eq.s32.totalorder %v397_v4, %v6488_v9  ;;  %vm744_vm6 = vcmp.eq.s32.totalorder %v394_v5, %v6488_v9  ;;  %588 = vperm.xlu1 %6010, %v167_v63   ;;  %585 = vperm.xlu0 %6009, %v166_v1   ;;  %v6057_v5 = vld [vmem:[%s8203_s2 + $0x154] ss:$12 sps:$4 sm:$0xff]  }
 0x115   :  { %v905_v7 = vsel %vm745_vm5, 1.0, %v8208_v16  ;;  %v904_v8 = vsel %vm744_vm6, 1.0, %v8208_v16  ;;  %3029 = vmatpush1.bf16.msra.mxu1 %v6056_v62 }
 0x116   :  { %v1032_v12 = vpack.c.bf16 %v905_v7, %v904_v8  ;;  %5644 = vmatmul.mubr.msk.bf16.gmra.mrb[60].mxu0 %vm1112_vm4, %v1031_v2  ;;  %v181_v2 = vld [vmem:[%s8201_s0 + $0x478] sm:$0xff]  ;;  %3030 = vmatprep.subr.bf16.mxu1 %v6057_v5 }
 0x117   :  { %v403_v14 = vpop.permute.xlu1 %402  ;;  %v400_v15 = vpop.permute.xlu0 %399  ;;  %v6059_v8 = vld [vmem:[%s8203_s2 + $0x150] ss:$12 sps:$4 sm:$0xff]  }
 0x118   :  { %vm747_vm7 = vcmp.eq.s32.totalorder %v403_v14, %v6488_v9  ;;  %vm746_vm8 = vcmp.eq.s32.totalorder %v400_v15, %v6488_v9  ;;  %594 = vperm.xlu1 %6010, %v169_v10   ;;  %591 = vperm.xlu0 %6009, %v168_v11   ;;  %v6060_v15 = vld [vmem:[%s8203_s2 + $0x16c] ss:$12 sps:$4 sm:$0xff]   ;;  %v6079_v5 = vld [vmem:[%s8203_s2 + $0x50] ss:$12 sps:$4 sm:$0xff]  }
 0x119   :  { %v907_v18 = vsel %vm747_vm7, 1.0, %v8208_v16  ;;  %v906_v19 = vsel %vm746_vm8, 1.0, %v8208_v16  ;;  %5647 = vmatprep.mubr.msk.bf16.mxu0 %vm1112_vm4, %v1032_v12  ;;  %v183_v12 = vld [vmem:[%s8201_s0 + $0x488] sm:$0xff]  ;;  %3031 = vmatpush1.bf16.msra.mxu1 %v6059_v8 }
 0x11a   :  { %v1033_v22 = vpack.c.bf16 %v907_v18, %v906_v19  ;;  %v6062_v19 = vld [vmem:[%s8203_s2 + $0x168] ss:$12 sps:$4 sm:$0xff]   ;;  %3032 = vmatprep.subr.bf16.mxu1 %v6060_v15 }
 0x11b   :  { %v409_v24 = vpop.permute.xlu1 %408  ;;  %v406_v25 = vpop.permute.xlu0 %405  ;;  %v6084_v15 = vld [vmem:[%s8203_s2 + $0x68] ss:$12 sps:$4 sm:$0xff]  }
 0x11c   :  { %vm749_vm9 = vcmp.eq.s32.totalorder %v409_v24, %v6488_v9  ;;  %vm748_vm10 = vcmp.eq.s32.totalorder %v406_v25, %v6488_v9  ;;  %600 = vperm.xlu1 %6010, %v171_v20   ;;  %597 = vperm.xlu0 %6009, %v170_v21  }
 0x11d   :  { %v909_v27 = vsel %vm749_vm9, 1.0, %v8208_v16  ;;  %v908_v28 = vsel %vm748_vm10, 1.0, %v8208_v16  ;;  %3033 = vmatpush1.bf16.msra.mxu1 %v6062_v19 }
 0x11e   :  { %v1034_v31 = vpack.c.bf16 %v909_v27, %v908_v28  ;;  %5648 = vmatmul.mubr.msk.bf16.gmra.mrb[64].mxu0 %vm1112_vm4, %v1033_v22  ;;  %v185_v22 = vld [vmem:[%s8201_s0 + $0x498] sm:$0xff]  ;;  %v6065_v27 = vld [vmem:[%s8203_s2 + $0x184] ss:$12 sps:$4 sm:$0xff]  }
 0x11f   :  { %v415_v33 = vpop.permute.xlu1 %414  ;;  %v412_v34 = vpop.permute.xlu0 %411  ;;  %3195 = vmatprep.subr.bf16.mxu1 %v6065_v27 }
 0x120   :  { %vm751_vm11 = vcmp.eq.s32.totalorder %v415_v33, %v6488_v9  ;;  %vm750_vm12 = vcmp.eq.s32.totalorder %v412_v34, %v6488_v9  ;;  %606 = vperm.xlu1 %6010, %v173_v29   ;;  %603 = vperm.xlu0 %6009, %v172_v30   ;;  %v187_v30 = vld [vmem:[%s8201_s0 + $0x4a8] sm:$0xff] }
 0x121   :  { %v911_v36 = vsel %vm751_vm11, 1.0, %v8208_v16  ;;  %v910_v37 = vsel %vm750_vm12, 1.0, %v8208_v16  ;;  %5651 = vmatprep.mubr.msk.bf16.mxu0 %vm1112_vm4, %v1034_v31  ;;  %v186_v31 = vld [vmem:[%s8201_s0 + $0x4a0] sm:$0xff] }
 0x122   :  { %v1035_v40 = vpack.c.bf16 %v911_v36, %v910_v37  ;;  %v6067_v36 = vld [vmem:[%s8203_s2 + $0x8] ss:$12 sps:$4 sm:$0xff]  }
 0x123   :  { %v421_v42 = vpop.permute.xlu1 %420  ;;  %v418_v43 = vpop.permute.xlu0 %417  ;;  %5297 = vmatpush3.bf16.msra.mxu0 %v6067_v36 }
 0x124   :  { %vm753_vm13 = vcmp.eq.s32.totalorder %v421_v42, %v6488_v9  ;;  %vm752_vm14 = vcmp.eq.s32.totalorder %v418_v43, %v6488_v9  ;;  %612 = vperm.xlu1 %6010, %v175_v38   ;;  %609 = vperm.xlu0 %6009, %v174_v39   ;;  %v189_v39 = vld [vmem:[%s8201_s0 + $0x4b8] sm:$0xff] }
 0x125   :  { %v913_v45 = vsel %vm753_vm13, 1.0, %v8208_v16  ;;  %v912_v46 = vsel %vm752_vm14, 1.0, %v8208_v16 }
 0x126   :  { %v1036_v49 = vpack.c.bf16 %v913_v45, %v912_v46  ;;  %5652 = vmatmul.mubr.msk.bf16.gmra.mrb[68].mxu0 %vm1112_vm4, %v1035_v40  ;;  %v188_v40 = vld [vmem:[%s8201_s0 + $0x4b0] sm:$0xff]  ;;  %v191_v46 = vld [vmem:[%s8201_s0 + $0x4c8] sm:$0xff] }
 0x127   :  { %v427_v51 = vpop.permute.xlu1 %426  ;;  %v424_v52 = vpop.permute.xlu0 %423 }
 0x128   :  { %vm755_vm15 = vcmp.eq.s32.totalorder %v427_v51, %v6488_v9  ;;  %vm754_vm0 = vcmp.eq.s32.totalorder %v424_v52, %v6488_v9  ;;  %618 = vperm.xlu1 %6010, %v177_v47   ;;  %615 = vperm.xlu0 %6009, %v176_v48   ;;  %v190_v47 = vld [vmem:[%s8201_s0 + $0x4c0] sm:$0xff] }
 0x129   :  { %v915_v54 = vsel %vm755_vm15, 1.0, %v8208_v16  ;;  %v914_v55 = vsel %vm754_vm0, 1.0, %v8208_v16  ;;  %5655 = vmatprep.mubr.msk.bf16.mxu0 %vm1112_vm4, %v1036_v49  ;;  %v6071_v48 = vld [vmem:[%s8203_s2 + $0xe0] ss:$12 sps:$4 sm:$0xff]  }
 0x12a   :  { %v1037_v58 = vpack.c.bf16 %v915_v54, %v914_v55  ;;  %5298 = vmatprep.subr.bf16.mxu0 %v6071_v48  ;;  %v193_v55 = vld [vmem:[%s8201_s0 + $0x4d8] sm:$0xff] }
 0x12b   :  { %v433_v60 = vpop.permute.xlu1 %432  ;;  %v430_v61 = vpop.permute.xlu0 %429  ;;  %5299 = vmatpush3.bf16.msra.mxu0 %v6072_v50 }
 0x12c   :  { %vm757_vm1 = vcmp.eq.s32.totalorder %v433_v60, %v6488_v9  ;;  %vm756_vm2 = vcmp.eq.s32.totalorder %v430_v61, %v6488_v9  ;;  %624 = vperm.xlu1 %6010, %v179_v56   ;;  %621 = vperm.xlu0 %6009, %v178_v57   ;;  %v192_v56 = vld [vmem:[%s8201_s0 + $0x4d0] sm:$0xff]  ;;  %v6073_v57 = vld [vmem:[%s8203_s2 + $0xf8] ss:$12 sps:$4 sm:$0xff]  }
 0x12d   :  { %v917_v63 = vsel %vm757_vm1, 1.0, %v8208_v16  ;;  %v916_v1 = vsel %vm756_vm2, 1.0, %v8208_v16  ;;  %5300 = vmatprep.subr.bf16.mxu0 %v6073_v57 }
 0x12e   :  { %v1038_v4 = vpack.c.bf16 %v917_v63, %v916_v1  ;;  %5656 = vmatmul.mubr.msk.bf16.gmra.mrb[72].mxu0 %vm1112_vm4, %v1037_v58  ;;  %v195_v1 = vld [vmem:[%s8201_s0 + $0x4e8] sm:$0xff] }
 0x12f   :  { %v439_v6 = vpop.permute.xlu1 %438  ;;  %v436_v7 = vpop.permute.xlu0 %435  ;;  %5301 = vmatpush3.bf16.msra.mxu0 %v6077_v59 }
 0x130   :  { %vm759_vm3 = vcmp.eq.s32.totalorder %v439_v6, %v6488_v9  ;;  %vm758_vm5 = vcmp.eq.s32.totalorder %v436_v7, %v6488_v9  ;;  %630 = vperm.xlu1 %6010, %v181_v2   ;;  %627 = vperm.xlu0 %6009, %v180_v3   ;;  %v194_v2 = vld [vmem:[%s8201_s0 + $0x4e0] sm:$0xff]  ;;  %v6078_v3 = vld [vmem:[%s8203_s2 + $0x110] ss:$12 sps:$4 sm:$0xff]  }
 0x131   :  { %v919_v10 = vsel %vm759_vm3, 1.0, %v8208_v16  ;;  %v918_v11 = vsel %vm758_vm5, 1.0, %v8208_v16  ;;  %5659 = vmatprep.mubr.msk.bf16.mxu0 %vm1112_vm4, %v1038_v4  ;;  %5302 = vmatprep.subr.bf16.mxu0 %v6078_v3 }
 0x132   :  { %v1039_v14 = vpack.c.bf16 %v919_v10, %v918_v11  ;;  %v197_v11 = vld [vmem:[%s8201_s0 + $0x4f8] sm:$0xff] }
 0x133   :  { %v445_v17 = vpop.permute.xlu1 %444  ;;  %v442_v18 = vpop.permute.xlu0 %441  ;;  %5303 = vmatpush3.bf16.msra.mxu0 %v6079_v5 }
 0x134   :  { %vm761_vm6 = vcmp.eq.s32.totalorder %v445_v17, %v6488_v9  ;;  %vm760_vm7 = vcmp.eq.s32.totalorder %v442_v18, %v6488_v9  ;;  %636 = vperm.xlu1 %6010, %v183_v12   ;;  %633 = vperm.xlu0 %6009, %v182_v13   ;;  %v196_v12 = vld [vmem:[%s8201_s0 + $0x4f0] sm:$0xff] }
 0x135   :  { %v921_v20 = vsel %vm761_vm6, 1.0, %v8208_v16  ;;  %v920_v21 = vsel %vm760_vm7, 1.0, %v8208_v16  ;;  %v6080_v13 = vld [vmem:[%s8203_s2 + $0x128] ss:$12 sps:$4 sm:$0xff]  }
 0x136   :  { %v1040_v24 = vpack.c.bf16 %v921_v20, %v920_v21  ;;  %5660 = vmatmul.mubr.msk.bf16.gmra.mrb[76].mxu0 %vm1112_vm4, %v1039_v14  ;;  %5304 = vmatprep.subr.bf16.mxu0 %v6080_v13  ;;  %v6085_v21 = vld [vmem:[%s8203_s2 + $0x140] ss:$12 sps:$4 sm:$0xff]  }
 0x137   :  { %v451_v25 = vpop.permute.xlu1 %450  ;;  %v448_v26 = vpop.permute.xlu0 %447  ;;  %5305 = vmatpush3.bf16.msra.mxu0 %v6084_v15 }
 0x138   :  { %vm763_vm8 = vcmp.eq.s32.totalorder %v451_v25, %v6488_v9  ;;  %vm762_vm9 = vcmp.eq.s32.totalorder %v448_v26, %v6488_v9  ;;  %642 = vperm.xlu1 %6010, %v185_v22   ;;  %639 = vperm.xlu0 %6009, %v184_v23   ;;  %v6086_v23 = vld [vmem:[%s8203_s2 + $0x80] ss:$12 sps:$4 sm:$0xff]  }
 0x139   :  { %v923_v28 = vsel %vm763_vm8, 1.0, %v8208_v16  ;;  %v922_v29 = vsel %vm762_vm9, 1.0, %v8208_v16  ;;  %5663 = vmatprep.mubr.msk.bf16.mxu0 %vm1112_vm4, %v1040_v24  ;;  %5306 = vmatprep.subr.bf16.mxu0 %v6085_v21 }
 0x13a   :  { %v1041_v32 = vpack.c.bf16 %v923_v28, %v922_v29  ;;  %v6087_v28 = vld [vmem:[%s8203_s2 + $0x158] ss:$12 sps:$4 sm:$0xff]  }
 0x13b   :  { %v457_v33 = vpop.permute.xlu1 %456  ;;  %v454_v34 = vpop.permute.xlu0 %453  ;;  %5307 = vmatpush3.bf16.msra.mxu0 %v6086_v23 }
 0x13c   :  { %vm765_vm10 = vcmp.eq.s32.totalorder %v457_v33, %v6488_v9  ;;  %vm764_vm11 = vcmp.eq.s32.totalorder %v454_v34, %v6488_v9  ;;  %648 = vperm.xlu1 %6010, %v187_v30   ;;  %645 = vperm.xlu0 %6009, %v186_v31   ;;  %v6091_v30 = vld [vmem:[%s8203_s2 + $0x98] ss:$12 sps:$4 sm:$0xff]  }
 0x13d   :  { %v925_v37 = vsel %vm765_vm10, 1.0, %v8208_v16  ;;  %v924_v38 = vsel %vm764_vm11, 1.0, %v8208_v16  ;;  %5308 = vmatprep.subr.bf16.mxu0 %v6087_v28 }
 0x13e   :  { %v1042_v41 = vpack.c.bf16 %v925_v37, %v924_v38  ;;  %5664 = vmatmul.mubr.msk.bf16.gmra.mrb[80].mxu0 %vm1112_vm4, %v1041_v32  ;;  %v6093_v37 = vld [vmem:[%s8203_s2 + $0xb0] ss:$12 sps:$4 sm:$0xff]  }
 0x13f   :  { %v463_v42 = vpop.permute.xlu1 %462  ;;  %v460_v43 = vpop.permute.xlu0 %459  ;;  %5309 = vmatpush3.bf16.msra.mxu0 %v6091_v30 }
 0x140   :  { %vm767_vm12 = vcmp.eq.s32.totalorder %v463_v42, %v6488_v9  ;;  %vm766_vm13 = vcmp.eq.s32.totalorder %v460_v43, %v6488_v9  ;;  %654 = vperm.xlu1 %6010, %v189_v39   ;;  %651 = vperm.xlu0 %6009, %v188_v40  }
 0x141   :  { %v927_v44 = vsel %vm767_vm12, 1.0, %v8208_v16  ;;  %v926_v45 = vsel %vm766_vm13, 1.0, %v8208_v16  ;;  %5667 = vmatprep.mubr.msk.bf16.mxu0 %vm1112_vm4, %v1042_v41  ;;  %5310 = vmatprep.subr.bf16.mxu0 %v6092_v35 }
 0x142   :  { %v1043_v49 = vpack.c.bf16 %v927_v44, %v926_v45 }
 0x143   :  { %v469_v51 = vpop.permute.xlu1 %468  ;;  %v466_v52 = vpop.permute.xlu0 %465  ;;  %5311 = vmatpush3.bf16.msra.mxu0 %v6093_v37 }
 0x144   :  { %vm769_vm14 = vcmp.eq.s32.totalorder %v469_v51, %v6488_v9  ;;  %vm768_vm15 = vcmp.eq.s32.totalorder %v466_v52, %v6488_v9  ;;  %660 = vperm.xlu1 %6010, %v191_v46   ;;  %657 = vperm.xlu0 %6009, %v190_v47  }
 0x145   :  { %v929_v53 = vsel %vm769_vm14, 1.0, %v8208_v16  ;;  %v928_v54 = vsel %vm768_vm15, 1.0, %v8208_v16 }
 0x146   :  { %v1044_v58 = vpack.c.bf16 %v929_v53, %v928_v54  ;;  %5668 = vmatmul.mubr.msk.bf16.gmra.mrb[84].mxu0 %vm1112_vm4, %v1043_v49 }
 0x147   :  { %v475_v60 = vpop.permute.xlu1 %474  ;;  %v472_v61 = vpop.permute.xlu0 %471 }
 0x148   :  { %vm771_vm0 = vcmp.eq.s32.totalorder %v475_v60, %v6488_v9  ;;  %vm770_vm1 = vcmp.eq.s32.totalorder %v472_v61, %v6488_v9  ;;  %666 = vperm.xlu1 %6010, %v193_v55   ;;  %663 = vperm.xlu0 %6009, %v192_v56  }
 0x149   :  { %v931_v62 = vsel %vm771_vm0, 1.0, %v8208_v16  ;;  %v930_v63 = vsel %vm770_vm1, 1.0, %v8208_v16  ;;  %5671 = vmatprep.mubr.msk.bf16.mxu0 %vm1112_vm4, %v1044_v58 }
 0x14a   :  { %v1045_v4 = vpack.c.bf16 %v931_v62, %v930_v63 }
 0x14b   :  { %v481_v6 = vpop.permute.xlu1 %480  ;;  %v478_v7 = vpop.permute.xlu0 %477 }
 0x14c   :  { %vm773_vm2 = vcmp.eq.s32.totalorder %v481_v6, %v6488_v9  ;;  %vm772_vm3 = vcmp.eq.s32.totalorder %v478_v7, %v6488_v9  ;;  %672 = vperm.xlu1 %6010, %v195_v1   ;;  %669 = vperm.xlu0 %6009, %v194_v2  }
 0x14d   :  { %v933_v8 = vsel %vm773_vm2, 1.0, %v8208_v16  ;;  %v932_v10 = vsel %vm772_vm3, 1.0, %v8208_v16 }
 0x14e   :  { %v1046_v14 = vpack.c.bf16 %v933_v8, %v932_v10  ;;  %5672 = vmatmul.mubr.msk.bf16.gmra.mrb[88].mxu0 %vm1112_vm4, %v1045_v4 }
 0x14f   :  { %v487_v17 = vpop.permute.xlu1 %486  ;;  %v484_v18 = vpop.permute.xlu0 %483 }
 0x150   :  { %vm775_vm5 = vcmp.eq.s32.totalorder %v487_v17, %v6488_v9  ;;  %vm774_vm6 = vcmp.eq.s32.totalorder %v484_v18, %v6488_v9  ;;  %678 = vperm.xlu1 %6010, %v197_v11   ;;  %675 = vperm.xlu0 %6009, %v196_v12  }
 0x151   :  { %v935_v19 = vsel %vm775_vm5, 1.0, %v8208_v16  ;;  %v934_v20 = vsel %vm774_vm6, 1.0, %v8208_v16  ;;  %5675 = vmatprep.mubr.msk.bf16.mxu0 %vm1112_vm4, %v1046_v14 }
 0x152   :  { %v1047_v22 = vpack.c.bf16 %v935_v19, %v934_v20 }
 0x153   :  { %v493_v24 = vpop.permute.xlu1 %492  ;;  %v490_v25 = vpop.permute.xlu0 %489 }
 0x154   :  { %vm777_vm7 = vcmp.eq.s32.totalorder %v493_v24, %v6488_v9  ;;  %vm776_vm8 = vcmp.eq.s32.totalorder %v490_v25, %v6488_v9 }
 0x155   :  { %v937_v26 = vsel %vm777_vm7, 1.0, %v8208_v16  ;;  %v936_v27 = vsel %vm776_vm8, 1.0, %v8208_v16 }
 0x156   :  { %v1048_v29 = vpack.c.bf16 %v937_v26, %v936_v27  ;;  %5676 = vmatmul.mubr.msk.bf16.gmra.mrb[92].mxu0 %vm1112_vm4, %v1047_v22 }
 0x157   :  { %v499_v31 = vpop.permute.xlu1 %498  ;;  %v496_v32 = vpop.permute.xlu0 %495 }
 0x158   :  { %vm779_vm9 = vcmp.eq.s32.totalorder %v499_v31, %v6488_v9  ;;  %vm778_vm10 = vcmp.eq.s32.totalorder %v496_v32, %v6488_v9  ;;  %5679 = vmatprep.mubr.msk.bf16.mxu0 %vm1112_vm4, %v1048_v29 }
 0x159   :  { %v939_v33 = vsel %vm779_vm9, 1.0, %v8208_v16  ;;  %v938_v34 = vsel %vm778_vm10, 1.0, %v8208_v16 }
 0x15a   :  { %v1049_v36 = vpack.c.bf16 %v939_v33, %v938_v34 }
 0x15b   :  { %v505_v38 = vpop.permute.xlu1 %504  ;;  %v502_v39 = vpop.permute.xlu0 %501 }
 0x15c   :  { %vm781_vm11 = vcmp.eq.s32.totalorder %v505_v38, %v6488_v9  ;;  %vm780_vm12 = vcmp.eq.s32.totalorder %v502_v39, %v6488_v9 }
 0x15d   :  { %v941_v40 = vsel %vm781_vm11, 1.0, %v8208_v16  ;;  %v940_v41 = vsel %vm780_vm12, 1.0, %v8208_v16 }
 0x15e   :  { %v1050_v42 = vpack.c.bf16 %v941_v40, %v940_v41  ;;  %5680 = vmatmul.mubr.msk.bf16.gmra.mrb[96].mxu0 %vm1112_vm4, %v1049_v36 }
 0x15f   :  { %v511_v43 = vpop.permute.xlu1 %510  ;;  %v508_v44 = vpop.permute.xlu0 %507 }
 0x160   :  { %vm783_vm13 = vcmp.eq.s32.totalorder %v511_v43, %v6488_v9  ;;  %vm782_vm14 = vcmp.eq.s32.totalorder %v508_v44, %v6488_v9  ;;  %5683 = vmatprep.mubr.msk.bf16.mxu0 %vm1112_vm4, %v1050_v42 }
 0x161   :  { %v943_v45 = vsel %vm783_vm13, 1.0, %v8208_v16  ;;  %v942_v46 = vsel %vm782_vm14, 1.0, %v8208_v16 }
 0x162   :  { %v1051_v47 = vpack.c.bf16 %v943_v45, %v942_v46 }
 0x163   :  { %v517_v48 = vpop.permute.xlu1 %516  ;;  %v514_v49 = vpop.permute.xlu0 %513 }
 0x164   :  { %vm785_vm15 = vcmp.eq.s32.totalorder %v517_v48, %v6488_v9  ;;  %vm784_vm0 = vcmp.eq.s32.totalorder %v514_v49, %v6488_v9 }
 0x165   :  { %v945_v50 = vsel %vm785_vm15, 1.0, %v8208_v16  ;;  %v944_v51 = vsel %vm784_vm0, 1.0, %v8208_v16 }
 0x166   :  { %v1052_v52 = vpack.c.bf16 %v945_v50, %v944_v51  ;;  %5684 = vmatmul.mubr.msk.bf16.gmra.mrb[100].mxu0 %vm1112_vm4, %v1051_v47 }
 0x167   :  { %v523_v53 = vpop.permute.xlu1 %522  ;;  %v520_v54 = vpop.permute.xlu0 %519 }
 0x168   :  { %vm787_vm1 = vcmp.eq.s32.totalorder %v523_v53, %v6488_v9  ;;  %vm786_vm2 = vcmp.eq.s32.totalorder %v520_v54, %v6488_v9  ;;  %5687 = vmatprep.mubr.msk.bf16.mxu0 %vm1112_vm4, %v1052_v52 }
 0x169   :  { %v947_v55 = vsel %vm787_vm1, 1.0, %v8208_v16  ;;  %v946_v56 = vsel %vm786_vm2, 1.0, %v8208_v16 }
 0x16a   :  { %v1053_v57 = vpack.c.bf16 %v947_v55, %v946_v56 }
 0x16b   :  { %v529_v58 = vpop.permute.xlu1 %528  ;;  %v526_v59 = vpop.permute.xlu0 %525 }
 0x16c   :  { %vm789_vm3 = vcmp.eq.s32.totalorder %v529_v58, %v6488_v9  ;;  %vm788_vm5 = vcmp.eq.s32.totalorder %v526_v59, %v6488_v9 }
 0x16d   :  { %v949_v60 = vsel %vm789_vm3, 1.0, %v8208_v16  ;;  %v948_v61 = vsel %vm788_vm5, 1.0, %v8208_v16 }
 0x16e   :  { %v1054_v62 = vpack.c.bf16 %v949_v60, %v948_v61  ;;  %5688 = vmatmul.mubr.msk.bf16.gmra.mrb[104].mxu0 %vm1112_vm4, %v1053_v57 }
 0x16f   :  { %v535_v63 = vpop.permute.xlu1 %534  ;;  %v532_v1 = vpop.permute.xlu0 %531 }
 0x170   :  { %vm791_vm6 = vcmp.eq.s32.totalorder %v535_v63, %v6488_v9  ;;  %vm790_vm7 = vcmp.eq.s32.totalorder %v532_v1, %v6488_v9  ;;  %5691 = vmatprep.mubr.msk.bf16.mxu0 %vm1112_vm4, %v1054_v62 }
 0x171   :  { %v951_v2 = vsel %vm791_vm6, 1.0, %v8208_v16  ;;  %v950_v3 = vsel %vm790_vm7, 1.0, %v8208_v16  ;;  %v5585_v4 = vpop.f32.mrb[0].mxu0 }
 0x172   :  { %v1055_v5 = vpack.c.bf16 %v951_v2, %v950_v3  ;;  %v1387_v6 = vpop.f32.mrb[1].mxu0 }
 0x173   :  { %v5586_v7 = vpop.f32.mrb[2].mxu0  ;;  %v541_v8 = vpop.permute.xlu1 %540 }
 0x174   :  { %v7198_v10 = vpack.c.bf16 %v5586_v7, %v5585_v4  ;;  %vm793_vm8 = vcmp.eq.s32.totalorder %v541_v8, %v6488_v9  ;;  %v1390_v11 = vpop.f32.mrb[3].mxu0  ;;  %v538_v12 = vpop.permute.xlu0 %537 }
 0x175   :  { %v953_v13 = vsel %vm793_vm8, 1.0, %v8208_v16  ;;  %v7202_v14 = vpack.c.bf16 %v1390_v11, %v1387_v6  ;;  %vm792_vm9 = vcmp.eq.s32.totalorder %v538_v12, %v6488_v9 }
 0x176   :  { %v952_v15 = vsel %vm792_vm9, 1.0, %v8208_v16  ;;  %5692 = vmatmul.mubr.msk.bf16.gmra.mrb[108].mxu0 %vm1112_vm4, %v1055_v5 }
 0x177   :  { %v1056_v17 = vpack.c.bf16 %v953_v13, %v952_v15  ;;  %v547_v18 = vpop.permute.xlu1 %546 }
 0x178   :  { %vm795_vm10 = vcmp.eq.s32.totalorder %v547_v18, %v6488_v9  ;;  %v544_v19 = vpop.permute.xlu0 %543 }
 0x179   :  { %v955_v20 = vsel %vm795_vm10, 1.0, %v8208_v16  ;;  %vm794_vm11 = vcmp.eq.s32.totalorder %v544_v19, %v6488_v9  ;;  %v5589_v21 = vpop.f32.mrb[4].mxu0  ;;  %5695 = vmatprep.mubr.msk.bf16.mxu0 %vm1112_vm4, %v1056_v17 }
 0x17a   :  { %v954_v22 = vsel %vm794_vm11, 1.0, %v8208_v16  ;;  %v1403_v23 = vpop.f32.mrb[5].mxu0 }
 0x17b   :  { %v1057_v24 = vpack.c.bf16 %v955_v20, %v954_v22  ;;  %v5590_v25 = vpop.f32.mrb[6].mxu0  ;;  %v553_v26 = vpop.permute.xlu1 %552 }
 0x17c   :  { %v7212_v27 = vpack.c.bf16 %v5590_v25, %v5589_v21  ;;  %vm797_vm12 = vcmp.eq.s32.totalorder %v553_v26, %v6488_v9  ;;  %v1406_v28 = vpop.f32.mrb[7].mxu0  ;;  %v550_v29 = vpop.permute.xlu0 %549 }
 0x17d   :  { %v957_v30 = vsel %vm797_vm12, 1.0, %v8208_v16  ;;  %v7216_v31 = vpack.c.bf16 %v1406_v28, %v1403_v23  ;;  %vm796_vm13 = vcmp.eq.s32.totalorder %v550_v29, %v6488_v9 }
 0x17e   :  { %v956_v32 = vsel %vm796_vm13, 1.0, %v8208_v16  ;;  %5696 = vmatmul.mubr.msk.bf16.gmra.mrb[112].mxu0 %vm1112_vm4, %v1057_v24 }
 0x17f   :  { %v1058_v33 = vpack.c.bf16 %v957_v30, %v956_v32  ;;  %v559_v34 = vpop.permute.xlu1 %558 }
 0x180   :  { %vm799_vm14 = vcmp.eq.s32.totalorder %v559_v34, %v6488_v9  ;;  %v556_v35 = vpop.permute.xlu0 %555 }
 0x181   :  { %v959_v36 = vsel %vm799_vm14, 1.0, %v8208_v16  ;;  %vm798_vm15 = vcmp.eq.s32.totalorder %v556_v35, %v6488_v9  ;;  %v5593_v37 = vpop.f32.mrb[8].mxu0  ;;  %5699 = vmatprep.mubr.msk.bf16.mxu0 %vm1112_vm4, %v1058_v33 }
 0x182   :  { %v958_v38 = vsel %vm798_vm15, 1.0, %v8208_v16  ;;  %v1419_v39 = vpop.f32.mrb[9].mxu0 }
 0x183   :  { %v1059_v40 = vpack.c.bf16 %v959_v36, %v958_v38  ;;  %v5594_v41 = vpop.f32.mrb[10].mxu0  ;;  %v565_v42 = vpop.permute.xlu1 %564 }
 0x184   :  { %v7226_v43 = vpack.c.bf16 %v5594_v41, %v5593_v37  ;;  %vm801_vm0 = vcmp.eq.s32.totalorder %v565_v42, %v6488_v9  ;;  %v1422_v44 = vpop.f32.mrb[11].mxu0  ;;  %v562_v45 = vpop.permute.xlu0 %561 }
 0x185   :  { %v961_v46 = vsel %vm801_vm0, 1.0, %v8208_v16  ;;  %v7230_v47 = vpack.c.bf16 %v1422_v44, %v1419_v39  ;;  %vm800_vm1 = vcmp.eq.s32.totalorder %v562_v45, %v6488_v9 }
 0x186   :  { %v960_v48 = vsel %vm800_vm1, 1.0, %v8208_v16  ;;  %5700 = vmatmul.mubr.msk.bf16.gmra.mrb[116].mxu0 %vm1112_vm4, %v1059_v40 }
 0x187   :  { %v1060_v49 = vpack.c.bf16 %v961_v46, %v960_v48  ;;  %v571_v50 = vpop.permute.xlu1 %570 }
 0x188   :  { %vm803_vm2 = vcmp.eq.s32.totalorder %v571_v50, %v6488_v9  ;;  %v568_v51 = vpop.permute.xlu0 %567 }
 0x189   :  { %v963_v52 = vsel %vm803_vm2, 1.0, %v8208_v16  ;;  %vm802_vm3 = vcmp.eq.s32.totalorder %v568_v51, %v6488_v9  ;;  %v5597_v53 = vpop.f32.mrb[12].mxu0  ;;  %5703 = vmatprep.mubr.msk.bf16.mxu0 %vm1112_vm4, %v1060_v49 }
 0x18a   :  { %v962_v54 = vsel %vm802_vm3, 1.0, %v8208_v16  ;;  %v1435_v55 = vpop.f32.mrb[13].mxu0 }
 0x18b   :  { %v1061_v56 = vpack.c.bf16 %v963_v52, %v962_v54  ;;  %v5598_v57 = vpop.f32.mrb[14].mxu0  ;;  %v577_v58 = vpop.permute.xlu1 %576 }
 0x18c   :  { %v7240_v59 = vpack.c.bf16 %v5598_v57, %v5597_v53  ;;  %vm805_vm5 = vcmp.eq.s32.totalorder %v577_v58, %v6488_v9  ;;  %v1438_v60 = vpop.f32.mrb[15].mxu0  ;;  %v574_v61 = vpop.permute.xlu0 %573 }
 0x18d   :  { %v965_v62 = vsel %vm805_vm5, 1.0, %v8208_v16  ;;  %v7244_v63 = vpack.c.bf16 %v1438_v60, %v1435_v55  ;;  %vm804_vm6 = vcmp.eq.s32.totalorder %v574_v61, %v6488_v9 }
 0x18e   :  { %v964_v1 = vsel %vm804_vm6, 1.0, %v8208_v16  ;;  %5704 = vmatmul.mubr.msk.bf16.gmra.mrb[120].mxu0 %vm1112_vm4, %v1061_v56 }
 0x18f   :  { %v1062_v2 = vpack.c.bf16 %v965_v62, %v964_v1  ;;  %v583_v3 = vpop.permute.xlu1 %582 }
 0x190   :  { %vm807_vm7 = vcmp.eq.s32.totalorder %v583_v3, %v6488_v9  ;;  %v580_v4 = vpop.permute.xlu0 %579 }
 0x191   :  { %v967_v5 = vsel %vm807_vm7, 1.0, %v8208_v16  ;;  %vm806_vm8 = vcmp.eq.s32.totalorder %v580_v4, %v6488_v9  ;;  %v5601_v6 = vpop.f32.mrb[16].mxu0  ;;  %5707 = vmatprep.mubr.msk.bf16.mxu0 %vm1112_vm4, %v1062_v2 }
 0x192   :  { %v966_v7 = vsel %vm806_vm8, 1.0, %v8208_v16  ;;  %v1451_v8 = vpop.f32.mrb[17].mxu0 }
 0x193   :  { %v1063_v11 = vpack.c.bf16 %v967_v5, %v966_v7  ;;  %v5602_v12 = vpop.f32.mrb[18].mxu0  ;;  %v589_v13 = vpop.permute.xlu1 %588 }
 0x194   :  { %v7254_v15 = vpack.c.bf16 %v5602_v12, %v5601_v6  ;;  %vm809_vm9 = vcmp.eq.s32.totalorder %v589_v13, %v6488_v9  ;;  %v1454_v17 = vpop.f32.mrb[19].mxu0  ;;  %v586_v18 = vpop.permute.xlu0 %585 }
 0x195   :  { %v969_v19 = vsel %vm809_vm9, 1.0, %v8208_v16  ;;  %v7258_v20 = vpack.c.bf16 %v1454_v17, %v1451_v8  ;;  %vm808_vm10 = vcmp.eq.s32.totalorder %v586_v18, %v6488_v9 }
 0x196   :  { %v968_v21 = vsel %vm808_vm10, 1.0, %v8208_v16  ;;  %5708 = vmatmul.mubr.msk.bf16.gmra.mrb[124].mxu0 %vm1112_vm4, %v1063_v11 }
 0x197   :  { %v1064_v22 = vpack.c.bf16 %v969_v19, %v968_v21  ;;  %v595_v23 = vpop.permute.xlu1 %594 }
 0x198   :  { %vm811_vm11 = vcmp.eq.s32.totalorder %v595_v23, %v6488_v9  ;;  %v592_v24 = vpop.permute.xlu0 %591 }
 0x199   :  { %v971_v25 = vsel %vm811_vm11, 1.0, %v8208_v16  ;;  %vm810_vm12 = vcmp.eq.s32.totalorder %v592_v24, %v6488_v9  ;;  %v5605_v26 = vpop.f32.mrb[20].mxu0  ;;  %5711 = vmatprep.mubr.msk.bf16.mxu0 %vm1112_vm4, %v1064_v22 }
 0x19a   :  { %v970_v28 = vsel %vm810_vm12, 1.0, %v8208_v16  ;;  %v1467_v29 = vpop.f32.mrb[21].mxu0 }
 0x19b   :  { %v1065_v30 = vpack.c.bf16 %v971_v25, %v970_v28  ;;  %v5606_v32 = vpop.f32.mrb[22].mxu0  ;;  %v601_v33 = vpop.permute.xlu1 %600 }
 0x19c   :  { %v7268_v34 = vpack.c.bf16 %v5606_v32, %v5605_v26  ;;  %vm813_vm13 = vcmp.eq.s32.totalorder %v601_v33, %v6488_v9  ;;  %v1470_v35 = vpop.f32.mrb[23].mxu0  ;;  %v598_v36 = vpop.permute.xlu0 %597 }
 0x19d   :  { %v973_v37 = vsel %vm813_vm13, 1.0, %v8208_v16  ;;  %v7272_v38 = vpack.c.bf16 %v1470_v35, %v1467_v29  ;;  %vm812_vm14 = vcmp.eq.s32.totalorder %v598_v36, %v6488_v9 }
 0x19e   :  { %v972_v39 = vsel %vm812_vm14, 1.0, %v8208_v16  ;;  %5712 = vmatmul.mubr.msk.bf16.gmra.mrb[128].mxu0 %vm1112_vm4, %v1065_v30 }
 0x19f   :  { %v1066_v40 = vpack.c.bf16 %v973_v37, %v972_v39  ;;  %v607_v41 = vpop.permute.xlu1 %606  ;;  %v6063_v37 = vld [vmem:[%s8203_s2 + $0x180] ss:$12 sps:$4 sm:$0xff]  }
 0x1a0   :  { %vm815_vm15 = vcmp.eq.s32.totalorder %v607_v41, %v6488_v9  ;;  %v604_v42 = vpop.permute.xlu0 %603 }
 0x1a1   :  { %v975_v44 = vsel %vm815_vm15, 1.0, %v8208_v16  ;;  %vm814_vm0 = vcmp.eq.s32.totalorder %v604_v42, %v6488_v9  ;;  %v5609_v45 = vpop.f32.mrb[24].mxu0  ;;  %5715 = vmatprep.mubr.msk.bf16.mxu0 %vm1112_vm4, %v1066_v40  ;;  %v6070_v40 = vld [vmem:[%s8203_s2 + $0x19c] ss:$12 sps:$4 sm:$0xff]  }
 0x1a2   :  { %v974_v46 = vsel %vm814_vm0, 1.0, %v8208_v16  ;;  %v1483_v48 = vpop.f32.mrb[25].mxu0 }
 0x1a3   :  { %v1067_v49 = vpack.c.bf16 %v975_v44, %v974_v46  ;;  %v5610_v50 = vpop.f32.mrb[26].mxu0  ;;  %v613_v51 = vpop.permute.xlu1 %612 }
 0x1a4   :  { %v7282_v52 = vpack.c.bf16 %v5610_v50, %v5609_v45  ;;  %vm817_vm1 = vcmp.eq.s32.totalorder %v613_v51, %v6488_v9  ;;  %v1486_v53 = vpop.f32.mrb[27].mxu0  ;;  %v610_v54 = vpop.permute.xlu0 %609  ;;  %v6076_v51 = vld [vmem:[%s8203_s2 + $0x1b4] ss:$12 sps:$4 sm:$0xff]  }
 0x1a5   :  { %v977_v55 = vsel %vm817_vm1, 1.0, %v8208_v16  ;;  %v7286_v56 = vpack.c.bf16 %v1486_v53, %v1483_v48  ;;  %vm816_vm2 = vcmp.eq.s32.totalorder %v610_v54, %v6488_v9  ;;  %v6068_v48 = vld [vmem:[%s8203_s2 + $0x198] ss:$12 sps:$4 sm:$0xff]  }
 0x1a6   :  { %v976_v57 = vsel %vm816_vm2, 1.0, %v8208_v16  ;;  %5716 = vmatmul.mubr.msk.bf16.gmra.mrb[132].mxu0 %vm1112_vm4, %v1067_v49 }
 0x1a7   :  { %v1068_v58 = vpack.c.bf16 %v977_v55, %v976_v57  ;;  %v619_v60 = vpop.permute.xlu1 %618 }
 0x1a8   :  { %vm819_vm3 = vcmp.eq.s32.totalorder %v619_v60, %v6488_v9  ;;  %v616_v61 = vpop.permute.xlu0 %615 }
 0x1a9   :  { %v979_v62 = vsel %vm819_vm3, 1.0, %v8208_v16  ;;  %vm818_vm5 = vcmp.eq.s32.totalorder %v616_v61, %v6488_v9  ;;  %v5613_v1 = vpop.f32.mrb[28].mxu0  ;;  %5719 = vmatprep.mubr.msk.bf16.mxu0 %vm1112_vm4, %v1068_v58 }
 0x1aa   :  { %v978_v2 = vsel %vm818_vm5, 1.0, %v8208_v16  ;;  %v1499_v3 = vpop.f32.mrb[29].mxu0 }
 0x1ab   :  { %v1069_v4 = vpack.c.bf16 %v979_v62, %v978_v2  ;;  %v5614_v5 = vpop.f32.mrb[30].mxu0  ;;  %v625_v6 = vpop.permute.xlu1 %624  ;;  %v6074_v2 = vld [vmem:[%s8203_s2 + $0x1b0] ss:$12 sps:$4 sm:$0xff]  }
 0x1ac   :  { %v7296_v7 = vpack.c.bf16 %v5614_v5, %v5613_v1  ;;  %vm821_vm6 = vcmp.eq.s32.totalorder %v625_v6, %v6488_v9  ;;  %v1502_v8 = vpop.f32.mrb[31].mxu0  ;;  %v622_v11 = vpop.permute.xlu0 %621  ;;  %v6083_v5 = vld [vmem:[%s8203_s2 + $0x1cc] ss:$12 sps:$4 sm:$0xff]  }
 0x1ad   :  { %v981_v12 = vsel %vm821_vm6, 1.0, %v8208_v16  ;;  %v7300_v13 = vpack.c.bf16 %v1502_v8, %v1499_v3  ;;  %vm820_vm7 = vcmp.eq.s32.totalorder %v622_v11, %v6488_v9 }
 0x1ae   :  { %v980_v17 = vsel %vm820_vm7, 1.0, %v8208_v16  ;;  %5720 = vmatmul.mubr.msk.bf16.gmra.mrb[136].mxu0 %vm1112_vm4, %v1069_v4 }
 0x1af   :  { %v1070_v18 = vpack.c.bf16 %v981_v12, %v980_v17  ;;  %v631_v19 = vpop.permute.xlu1 %630 }
 0x1b0   :  { %vm823_vm8 = vcmp.eq.s32.totalorder %v631_v19, %v6488_v9  ;;  %v628_v21 = vpop.permute.xlu0 %627 }
 0x1b1   :  { %v983_v22 = vsel %vm823_vm8, 1.0, %v8208_v16  ;;  %vm822_vm9 = vcmp.eq.s32.totalorder %v628_v21, %v6488_v9  ;;  %v5617_v23 = vpop.f32.mrb[32].mxu0  ;;  %5723 = vmatprep.mubr.msk.bf16.mxu0 %vm1112_vm4, %v1070_v18  ;;  %v6081_v18 = vld [vmem:[%s8203_s2 + $0x1c8] ss:$12 sps:$4 sm:$0xff]  }
 0x1b2   :  { %v982_v24 = vsel %vm822_vm9, 1.0, %v8208_v16  ;;  %v1515_v25 = vpop.f32.mrb[33].mxu0 }
 0x1b3   :  { %v1071_v26 = vpack.c.bf16 %v983_v22, %v982_v24  ;;  %v5618_v28 = vpop.f32.mrb[34].mxu0  ;;  %v637_v29 = vpop.permute.xlu1 %636 }
 0x1b4   :  { %v7310_v30 = vpack.c.bf16 %v5618_v28, %v5617_v23  ;;  %vm825_vm10 = vcmp.eq.s32.totalorder %v637_v29, %v6488_v9  ;;  %v1518_v32 = vpop.f32.mrb[35].mxu0  ;;  %v634_v33 = vpop.permute.xlu0 %633  ;;  %v6090_v23 = vld [vmem:[%s8203_s2 + $0x1e4] ss:$12 sps:$4 sm:$0xff]  }
 0x1b5   :  { %v985_v35 = vsel %vm825_vm10, 1.0, %v8208_v16  ;;  %v7314_v36 = vpack.c.bf16 %v1518_v32, %v1515_v25  ;;  %vm824_vm11 = vcmp.eq.s32.totalorder %v634_v33, %v6488_v9  ;;  %v6088_v33 = vld [vmem:[%s8203_s2 + $0x1e0] ss:$12 sps:$4 sm:$0xff]  }
 0x1b6   :  { %v984_v39 = vsel %vm824_vm11, 1.0, %v8208_v16  ;;  %5724 = vmatmul.mubr.msk.bf16.gmra.mrb[140].mxu0 %vm1112_vm4, %v1071_v26  ;;  %vm4697_vm11 = vcmask 1042434  }
 0x1b7   :  { %v1072_v41 = vpack.c.bf16 %v985_v35, %v984_v39  ;;  %3034 = vmatprep.mubr.bf16.mxu1 %v7314_v36  ;;  %v643_v42 = vpop.permute.xlu1 %642  ;;  %v6096_v39 = vld [vmem:[%s8203_s2 + $0x1fc] ss:$12 sps:$4 sm:$0xff]  }
 0x1b8   :  { %vm827_vm12 = vcmp.eq.s32.totalorder %v643_v42, %v6488_v9  ;;  %3035 = vmatmul.mubr.bf16.vlgmr.msra.gmra.mrb[0].mxu1 %v7202_v14  ;;  %v640_v44 = vpop.permute.xlu0 %639 }
 0x1b9   :  { %v987_v45 = vsel %vm827_vm12, 1.0, %v8208_v16  ;;  %3196 = vmatpush1.bf16.msra.mxu1 %v6063_v37  ;;  %vm826_vm13 = vcmp.eq.s32.totalorder %v640_v44, %v6488_v9  ;;  %v5621_v46 = vpop.f32.mrb[36].mxu0  ;;  %5727 = vmatprep.mubr.msk.bf16.mxu0 %vm1112_vm4, %v1072_v41  ;;  %vm4699_vm12 = vcmask 1043459  }
 0x1ba   :  { %v986_v49 = vsel %vm826_vm13, 1.0, %v8208_v16  ;;  %3044 = vmatprep.mubr.bf16.mxu1 %v7310_v30  ;;  %v1531_v50 = vpop.f32.mrb[37].mxu0  ;;  %3197 = vmatprep.subr.bf16.mxu1 %v6070_v40  ;;  %vm4701_vm13 = vcmask 1044484  }
 0x1bb   :  { %v1073_v53 = vpack.c.bf16 %v987_v45, %v986_v49  ;;  %v5622_v54 = vpop.f32.mrb[38].mxu0  ;;  %v649_v55 = vpop.permute.xlu1 %648 }
 0x1bc   :  { %v7339_v57 = vpack.c.bf16 %v5622_v54, %v5621_v46  ;;  %vm829_vm14 = vcmp.eq.s32.totalorder %v649_v55, %v6488_v9  ;;  %v1534_v58 = vpop.f32.mrb[39].mxu0  ;;  %v646_v60 = vpop.permute.xlu0 %645  ;;  %v6094_v46 = vld [vmem:[%s8203_s2 + $0x1f8] ss:$12 sps:$4 sm:$0xff]  }
 0x1bd   :  { %v989_v61 = vsel %vm829_vm14, 1.0, %v8208_v16  ;;  %v7343_v62 = vpack.c.bf16 %v1534_v58, %v1531_v50  ;;  %vm828_vm15 = vcmp.eq.s32.totalorder %v646_v60, %v6488_v9  ;;  %3198 = vmatpush1.bf16.msra.mxu1 %v6068_v48  ;;  %vm4703_vm14 = vcmask 1045509  }
 0x1be   :  { %v988_v1 = vsel %vm828_vm15, 1.0, %v8208_v16  ;;  %5728 = vmatmul.mubr.msk.bf16.gmra.mrb[144].mxu0 %vm1112_vm4, %v1073_v53  ;;  %3199 = vmatprep.subr.bf16.mxu1 %v6076_v51  ;;  %v6099_v51 = vld [vmem:[%s8203_s2 + $0x214] ss:$12 sps:$4 sm:$0xff]   ;;  %vm4705_vm15 = vcmask 1046534  }
 0x1bf   :  { %v1074_v3 = vpack.c.bf16 %v989_v61, %v988_v1  ;;  %v655_v4 = vpop.permute.xlu1 %654  ;;  %v6097_v1 = vld [vmem:[%s8203_s2 + $0x210] ss:$12 sps:$4 sm:$0xff]  }
 0x1c0   :  { %vm831_vm0 = vcmp.eq.s32.totalorder %v655_v4, %v6488_v9  ;;  %3045 = vmatmul.mubr.bf16.gmra.mrb[4].mxu1 %v7198_v10  ;;  %v652_v6 = vpop.permute.xlu0 %651  ;;  %v6102_v4 = vld [vmem:[%s8203_s2 + $0x22c] ss:$12 sps:$4 sm:$0xff]  }
 0x1c1   :  { %v991_v8 = vsel %vm831_vm0, 1.0, %v8208_v16  ;;  %vm830_vm1 = vcmp.eq.s32.totalorder %v652_v6, %v6488_v9  ;;  %v5625_v11 = vpop.f32.mrb[40].mxu0  ;;  %5731 = vmatprep.mubr.msk.bf16.mxu0 %vm1112_vm4, %v1074_v3  ;;  %3054 = vmatprep.mubr.bf16.mxu1 %v7343_v62  ;;  %vm4707_vm0 = vcmask 1047559  }
 0x1c2   :  { %v990_v12 = vsel %vm830_vm1, 1.0, %v8208_v16  ;;  %v1547_v17 = vpop.f32.mrb[41].mxu0  ;;  %3200 = vmatpush1.bf16.msra.mxu1 %v6074_v2  ;;  %vm6228_vm1 = vmmov 0  }
 0x1c3   :  { %v1075_v19 = vpack.c.bf16 %v991_v8, %v990_v12  ;;  %v5626_v21 = vpop.f32.mrb[42].mxu0  ;;  %v661_v22 = vpop.permute.xlu1 %660  ;;  %3201 = vmatprep.subr.bf16.mxu1 %v6083_v5 }
 0x1c4   :  { %v7367_v24 = vpack.c.bf16 %v5626_v21, %v5625_v11  ;;  %vm833_vm2 = vcmp.eq.s32.totalorder %v661_v22, %v6488_v9  ;;  %v1550_v25 = vpop.f32.mrb[43].mxu0  ;;  %v658_v26 = vpop.permute.xlu0 %657 }
 0x1c5   :  { %v993_v28 = vsel %vm833_vm2, 1.0, %v8208_v16  ;;  %v7371_v29 = vpack.c.bf16 %v1550_v25, %v1547_v17  ;;  %vm832_vm3 = vcmp.eq.s32.totalorder %v658_v26, %v6488_v9  ;;  %v6100_v17 = vld [vmem:[%s8203_s2 + $0x228] ss:$12 sps:$4 sm:$0xff]   ;;  %v6103_v25 = vld [vmem:[%s8203_s2 + $0x240] ss:$12 sps:$4 sm:$0xff]  }
 0x1c6   :  { %v992_v32 = vsel %vm832_vm3, 1.0, %v8208_v16  ;;  %5732 = vmatmul.mubr.msk.bf16.gmra.mrb[148].mxu0 %vm1112_vm4, %v1075_v19  ;;  %3202 = vmatpush1.bf16.msra.mxu1 %v6081_v18  ;;  %v6108_v26 = vld [vmem:[%s8203_s2 + $0x25c] ss:$12 sps:$4 sm:$0xff]  }
 0x1c7   :  { %v1076_v35 = vpack.c.bf16 %v993_v28, %v992_v32  ;;  %v667_v37 = vpop.permute.xlu1 %666  ;;  %3203 = vmatprep.subr.bf16.mxu1 %v6090_v23  ;;  %v6136_v28 = vld [vmem:[%s8203_s2 + $0x308] ss:$12 sps:$4 sm:$0xff]  }
 0x1c8   :  { %vm835_vm5 = vcmp.eq.s32.totalorder %v667_v37, %v6488_v9  ;;  %3055 = vmatmul.mubr.bf16.gmra.mrb[8].mxu1 %v7216_v31  ;;  %v664_v40 = vpop.permute.xlu0 %663  ;;  %5743 = vmatprep.subr.bf16.mxu0 %v6136_v28  ;;  %v6111_v37 = vld [vmem:[%s8203_s2 + $0x274] ss:$12 sps:$4 sm:$0xff]  }
 0x1c9   :  { %v995_v41 = vsel %vm835_vm5, 1.0, %v8208_v16  ;;  %vm834_vm6 = vcmp.eq.s32.totalorder %v664_v40, %v6488_v9  ;;  %v5629_v42 = vpop.f32.mrb[44].mxu0  ;;  %5735 = vmatprep.mubr.msk.bf16.mxu0 %vm1112_vm4, %v1076_v35  ;;  %3064 = vmatprep.mubr.bf16.mxu1 %v7339_v57 }
 0x1ca   :  { %v994_v44 = vsel %vm834_vm6, 1.0, %v8208_v16  ;;  %v1563_v45 = vpop.f32.mrb[45].mxu0  ;;  %3204 = vmatpush1.bf16.msra.mxu1 %v6088_v33 }
 0x1cb   :  { %v1077_v48 = vpack.c.bf16 %v995_v41, %v994_v44  ;;  %v5630_v49 = vpop.f32.mrb[46].mxu0  ;;  %v673_v50 = vpop.permute.xlu1 %672  ;;  %3205 = vmatprep.subr.bf16.mxu1 %v6096_v39  ;;  %v6109_v44 = vld [vmem:[%s8203_s2 + $0x270] ss:$12 sps:$4 sm:$0xff]  }
 0x1cc   :  { %v7395_v53 = vpack.c.bf16 %v5630_v49, %v5629_v42  ;;  %vm837_vm7 = vcmp.eq.s32.totalorder %v673_v50, %v6488_v9  ;;  %v1566_v54 = vpop.f32.mrb[47].mxu0  ;;  %v670_v55 = vpop.permute.xlu0 %669  ;;  %v6137_v42 = vld [vmem:[%s8203_s2 + $0x320] ss:$12 sps:$4 sm:$0xff]   ;;  %v6117_v50 = vld [vmem:[%s8203_s2 + $0x2a4] ss:$12 sps:$4 sm:$0xff]  }
 0x1cd   :  { %v997_v58 = vsel %vm837_vm7, 1.0, %v8208_v16  ;;  %v7399_v60 = vpack.c.bf16 %v1566_v54, %v1563_v45  ;;  %vm836_vm8 = vcmp.eq.s32.totalorder %v670_v55, %v6488_v9  ;;  %v6114_v45 = vld [vmem:[%s8203_s2 + $0x28c] ss:$12 sps:$4 sm:$0xff]  }
 0x1ce   :  { %v996_v61 = vsel %vm836_vm8, 1.0, %v8208_v16  ;;  %5736 = vmatmul.mubr.msk.bf16.gmra.mrb[152].mxu0 %vm1112_vm4, %v1077_v48  ;;  %3206 = vmatpush1.bf16.msra.mxu1 %v6094_v46 }
 0x1cf   :  { %v1078_v2 = vpack.c.bf16 %v997_v58, %v996_v61  ;;  %v679_v3 = vpop.permute.xlu1 %678  ;;  %3207 = vmatprep.subr.bf16.mxu1 %v6099_v51  ;;  %v6139_v58 = vld [vmem:[%s8203_s2 + $0x350] ss:$12 sps:$4 sm:$0xff]   ;;  %v6115_v61 = vld [vmem:[%s8203_s2 + $0x2a0] ss:$12 sps:$4 sm:$0xff]  }
 0x1d0   :  { %vm839_vm9 = vcmp.eq.s32.totalorder %v679_v3, %v6488_v9  ;;  %3065 = vmatmul.mubr.bf16.gmra.mrb[12].mxu1 %v7212_v27  ;;  %v676_v5 = vpop.permute.xlu0 %675 }
 0x1d1   :  { %v999_v6 = vsel %vm839_vm9, 1.0, %v8208_v16  ;;  %vm838_vm10 = vcmp.eq.s32.totalorder %v676_v5, %v6488_v9  ;;  %v5633_v8 = vpop.f32.mrb[48].mxu0  ;;  %5739 = vmatprep.mubr.msk.bf16.mxu0 %vm1112_vm4, %v1078_v2  ;;  %3074 = vmatprep.mubr.bf16.mxu1 %v7371_v29  ;;  %v6105_v9 = vld [vmem:[%s8203_s2 + $0x244] ss:$12 sps:$4 sm:$0xff]   ;;  %v6123_v5 = vld [vmem:[%s8203_s2 + $0x2d4] ss:$12 sps:$4 sm:$0xff]  }
 0x1d2   :  { %v998_v11 = vsel %vm838_vm10, 1.0, %v8208_v16  ;;  %v1579_v12 = vpop.f32.mrb[49].mxu0  ;;  %3208 = vmatpush1.bf16.msra.mxu1 %v6097_v1  ;;  %v6120_v1 = vld [vmem:[%s8203_s2 + $0x2bc] ss:$12 sps:$4 sm:$0xff]  }
 0x1d3   :  { %v1079_v18 = vpack.c.bf16 %v999_v6, %v998_v11  ;;  %v5634_v19 = vpop.f32.mrb[50].mxu0  ;;  %3209 = vmatprep.subr.bf16.mxu1 %v6102_v4 }
 0x1d4   :  { %v7423_v21 = vpack.c.bf16 %v5634_v19, %v5633_v8  ;;  %v1582_v22 = vpop.f32.mrb[51].mxu0 }
 0x1d5   :  { %v7425_v23 = vpack.c.bf16 %v1582_v22, %v1579_v12  ;;  %v6144_v12 = vld [vmem:[%s8203_s2 + $0x380] ss:$12 sps:$4 sm:$0xff]  }
 0x1d6   :  { %5740 = vmatmul.mubr.msk.bf16.gmra.mrb[156].mxu0 %vm1112_vm4, %v1079_v18  ;;  %3210 = vmatpush1.bf16.msra.mxu1 %v6100_v17  ;;  %v6121_v17 = vld [vmem:[%s8203_s2 + $0x2d0] ss:$12 sps:$4 sm:$0xff]   ;;  %v6126_v18 = vld [vmem:[%s8203_s2 + $0x2ec] ss:$12 sps:$4 sm:$0xff]   ;;  %vm4695_vm4 = vcmask 1041409  }
 0x1d7   :  { %3613 = vmatprep.mubr.bf16.mxu0 %v7314_v36  ;;  %3211 = vmatprep.subr.bf16.mxu1 %v6105_v9  ;;  %v6106_v36 = vld [vmem:[%s8203_s2 + $0x258] ss:$12 sps:$4 sm:$0xff]  }
 0x1d8   :  { %3075 = vmatmul.mubr.bf16.gmra.mrb[16].mxu1 %v7230_v47 }
 0x1d9   :  { %v5637_v32 = vpop.f32.mrb[52].mxu0  ;;  %3084 = vmatprep.mubr.bf16.mxu1 %v7367_v24 }
 0x1da   :  { %v1595_v33 = vpop.f32.mrb[53].mxu0  ;;  %3212 = vmatpush1.bf16.msra.mxu1 %v6103_v25  ;;  %v6129_v25 = vld [vmem:[%s8203_s2 + $0x304] ss:$12 sps:$4 sm:$0xff]  }
 0x1db   :  { %v5638_v35 = vpop.f32.mrb[54].mxu0  ;;  %3213 = vmatprep.subr.bf16.mxu1 %v6108_v26 }
 0x1dc   :  { %v7446_v39 = vpack.c.bf16 %v5638_v35, %v5637_v32  ;;  %v1598_v40 = vpop.f32.mrb[55].mxu0 }
 0x1dd   :  { %v7448_v41 = vpack.c.bf16 %v1598_v40, %v1595_v33  ;;  %v6146_v33 = vld [vmem:[%s8203_s2 + $0x3b0] ss:$12 sps:$4 sm:$0xff]  }
 0x1de   :  { %3614 = vmatmul.mubr.bf16.vlgmr.msra.gmra.mrb[160].mxu0 %v7202_v14  ;;  %3214 = vmatpush1.bf16.msra.mxu1 %v6106_v36  ;;  %v6138_v14 = vld [vmem:[%s8203_s2 + $0x338] ss:$12 sps:$4 sm:$0xff]  }
 0x1df   :  { %3621 = vmatprep.mubr.bf16.mxu0 %v7310_v30  ;;  %3215 = vmatprep.subr.bf16.mxu1 %v6111_v37  ;;  %v6112_v30 = vld [vmem:[%s8203_s2 + $0x288] ss:$12 sps:$4 sm:$0xff]  }
 0x1e0   :  { %3085 = vmatmul.mubr.bf16.gmra.mrb[20].mxu1 %v7226_v43  ;;  %5744 = vmatpush3.bf16.msra.mxu0 %v6136_v28 }
 0x1e1   :  { %v5641_v46 = vpop.f32.mrb[56].mxu0  ;;  %3094 = vmatprep.mubr.bf16.mxu1 %v7399_v60  ;;  %5745 = vmatprep.subr.bf16.mxu0 %v6137_v42 }
 0x1e2   :  { %v1611_v48 = vpop.f32.mrb[57].mxu0  ;;  %3216 = vmatpush1.bf16.msra.mxu1 %v6109_v44 }
 0x1e3   :  { %v5642_v49 = vpop.f32.mrb[58].mxu0  ;;  %3217 = vmatprep.subr.bf16.mxu1 %v6114_v45 }
 0x1e4   :  { %v7472_v51 = vpack.c.bf16 %v5642_v49, %v5641_v46  ;;  %v1614_v54 = vpop.f32.mrb[59].mxu0  ;;  %5746 = vmatpush3.bf16.msra.mxu0 %v6137_v42 }
 0x1e5   :  { %v7474_v55 = vpack.c.bf16 %v1614_v54, %v1611_v48  ;;  %5747 = vmatprep.subr.bf16.mxu0 %v6138_v14 }
 0x1e6   :  { %3622 = vmatmul.mubr.bf16.gmra.mrb[164].mxu0 %v7198_v10  ;;  %3218 = vmatpush1.bf16.msra.mxu1 %v6112_v30  ;;  %v6143_v10 = vld [vmem:[%s8203_s2 + $0x368] ss:$12 sps:$4 sm:$0xff]  }
 0x1e7   :  { %3629 = vmatprep.mubr.bf16.mxu0 %v7343_v62  ;;  %3219 = vmatprep.subr.bf16.mxu1 %v6117_v50  ;;  %v6118_v62 = vld [vmem:[%s8203_s2 + $0x2b8] ss:$12 sps:$4 sm:$0xff]  }
 0x1e8   :  { %3095 = vmatmul.mubr.bf16.gmra.mrb[24].mxu1 %v7244_v63  ;;  %5748 = vmatpush3.bf16.msra.mxu0 %v6138_v14 }
 0x1e9   :  { %v5645_v2 = vpop.f32.mrb[60].mxu0  ;;  %3104 = vmatprep.mubr.bf16.mxu1 %v7395_v53  ;;  %5749 = vmatprep.subr.bf16.mxu0 %v6139_v58 }
 0x1ea   :  { %v1627_v3 = vpop.f32.mrb[61].mxu0  ;;  %3220 = vmatpush1.bf16.msra.mxu1 %v6115_v61 }
 0x1eb   :  { %v5646_v4 = vpop.f32.mrb[62].mxu0  ;;  %3221 = vmatprep.subr.bf16.mxu1 %v6120_v1 }
 0x1ec   :  { %v7498_v6 = vpack.c.bf16 %v5646_v4, %v5645_v2  ;;  %v1630_v8 = vpop.f32.mrb[63].mxu0  ;;  %5750 = vmatpush3.bf16.msra.mxu0 %v6139_v58 }
 0x1ed   :  { %v7500_v11 = vpack.c.bf16 %v1630_v8, %v1627_v3  ;;  %5751 = vmatprep.subr.bf16.mxu0 %v6143_v10 }
 0x1ee   :  { %3630 = vmatmul.mubr.bf16.gmra.mrb[168].mxu0 %v7216_v31  ;;  %3222 = vmatpush1.bf16.msra.mxu1 %v6118_v62  ;;  %v6145_v31 = vld [vmem:[%s8203_s2 + $0x398] ss:$12 sps:$4 sm:$0xff]  }
 0x1ef   :  { %3637 = vmatprep.mubr.bf16.mxu0 %v7339_v57  ;;  %3223 = vmatprep.subr.bf16.mxu1 %v6123_v5  ;;  %v6124_v57 = vld [vmem:[%s8203_s2 + $0x2e8] ss:$12 sps:$4 sm:$0xff]  }
 0x1f0   :  { %3105 = vmatmul.mubr.bf16.gmra.mrb[28].mxu1 %v7240_v59  ;;  %5752 = vmatpush3.bf16.msra.mxu0 %v6143_v10 }
 0x1f1   :  { %v5649_v19 = vpop.f32.mrb[64].mxu0  ;;  %3114 = vmatprep.mubr.bf16.mxu1 %v7425_v23  ;;  %5753 = vmatprep.subr.bf16.mxu0 %v6144_v12 }
 0x1f2   :  { %v1643_v9 = vpop.f32.mrb[65].mxu0  ;;  %3224 = vmatpush1.bf16.msra.mxu1 %v6121_v17 }
 0x1f3   :  { %v5650_v22 = vpop.f32.mrb[66].mxu0  ;;  %3225 = vmatprep.subr.bf16.mxu1 %v6126_v18 }
 0x1f4   :  { %v7524_v26 = vpack.c.bf16 %v5650_v22, %v5649_v19  ;;  %v1646_v28 = vpop.f32.mrb[67].mxu0  ;;  %5754 = vmatpush3.bf16.msra.mxu0 %v6144_v12 }
 0x1f5   :  { %v7526_v32 = vpack.c.bf16 %v1646_v28, %v1643_v9  ;;  %5755 = vmatprep.subr.bf16.mxu0 %v6145_v31 }
 0x1f6   :  { %3638 = vmatmul.mubr.bf16.gmra.mrb[172].mxu0 %v7212_v27  ;;  %3226 = vmatpush1.bf16.msra.mxu1 %v6124_v57 }
 0x1f7   :  { %3645 = vmatprep.mubr.bf16.mxu0 %v7371_v29  ;;  %3388 = vmatprep.subr.bf16.mxu1 %v6129_v25 }
 0x1f8   :  { %3115 = vmatmul.mubr.bf16.gmra.mrb[32].mxu1 %v7258_v20  ;;  %5756 = vmatpush3.bf16.msra.mxu0 %v6145_v31 }
 0x1f9   :  { %v5653_v36 = vpop.f32.mrb[68].mxu0  ;;  %3124 = vmatprep.mubr.bf16.mxu1 %v7423_v21  ;;  %5757 = vmatprep.subr.bf16.mxu0 %v6146_v33 }
 0x1fa   :  { %v1659_v35 = vpop.f32.mrb[69].mxu0 }
 0x1fb   :  { %v5654_v37 = vpop.f32.mrb[70].mxu0 }
 0x1fc   :  { %v7535_v40 = vpack.c.bf16 %v5654_v37, %v5653_v36  ;;  %v1662_v42 = vpop.f32.mrb[71].mxu0  ;;  %5758 = vmatpush3.bf16.msra.mxu0 %v6146_v33  ;;  %v6127_v33 = vld [vmem:[%s8203_s2 + $0x300] ss:$12 sps:$4 sm:$0xff]   ;;  %v6130_v36 = vld [vmem:[%s8203_s2 + $0x318] ss:$12 sps:$4 sm:$0xff]  }
 0x1fd   :  { %v7537_v44 = vpack.c.bf16 %v1662_v42, %v1659_v35 }
 0x1fe   :  { %3646 = vmatmul.mubr.bf16.gmra.mrb[176].mxu0 %v7230_v47 }
 0x1ff   :  { %3653 = vmatprep.mubr.bf16.mxu0 %v7367_v24 }
 0x200   :  { %3125 = vmatmul.mubr.bf16.gmra.mrb[36].mxu1 %v7254_v15 }
 0x201   :  { %v5657_v27 = vpop.f32.mrb[72].mxu0  ;;  %3134 = vmatprep.mubr.bf16.mxu1 %v7448_v41 }
 0x202   :  { %v1675_v29 = vpop.f32.mrb[73].mxu0 }
 0x203   :  { %v5658_v45 = vpop.f32.mrb[74].mxu0 }
 0x204   :  { %v7543_v46 = vpack.c.bf16 %v5658_v45, %v5657_v27  ;;  %v1678_v14 = vpop.f32.mrb[75].mxu0  ;;  %v6142_v45 = vld [vmem:[%s8203_s2 + $0x34c] ss:$12 sps:$4 sm:$0xff]  }
 0x205   :  { %v7545_v48 = vpack.c.bf16 %v1678_v14, %v1675_v29  ;;  %v6133_v29 = vld [vmem:[%s8203_s2 + $0x330] ss:$12 sps:$4 sm:$0xff]  }
 0x206   :  { %3654 = vmatmul.mubr.bf16.gmra.mrb[180].mxu0 %v7226_v43 }
 0x207   :  { %3661 = vmatprep.mubr.bf16.mxu0 %v7399_v60 }
 0x208   :  { %3135 = vmatmul.mubr.bf16.gmra.mrb[40].mxu1 %v7272_v38 }
 0x209   :  { %v5661_v47 = vpop.f32.mrb[76].mxu0  ;;  %3144 = vmatprep.mubr.bf16.mxu1 %v7446_v39 }
 0x20a   :  { %v1691_v24 = vpop.f32.mrb[77].mxu0 }
 0x20b   :  { %v5662_v30 = vpop.f32.mrb[78].mxu0 }
 0x20c   :  { %v7551_v49 = vpack.c.bf16 %v5662_v30, %v5661_v47  ;;  %v1694_v50 = vpop.f32.mrb[79].mxu0  ;;  %v6140_v47 = vld [vmem:[%s8203_s2 + $0x348] ss:$12 sps:$4 sm:$0xff]  }
 0x20d   :  { %v7553_v54 = vpack.c.bf16 %v1694_v50, %v1691_v24 }
 0x20e   :  { %3662 = vmatmul.mubr.bf16.gmra.mrb[184].mxu0 %v7244_v63 }
 0x20f   :  { %3669 = vmatprep.mubr.bf16.mxu0 %v7395_v53 }
 0x210   :  { %3145 = vmatmul.mubr.bf16.gmra.mrb[44].mxu1 %v7268_v34 }
 0x211   :  { %v5665_v43 = vpop.f32.mrb[80].mxu0  ;;  %3154 = vmatprep.mubr.bf16.mxu1 %v7474_v55 }
 0x212   :  { %v1707_v60 = vpop.f32.mrb[81].mxu0 }
 0x213   :  { %v5666_v58 = vpop.f32.mrb[82].mxu0 }
 0x214   :  { %v7559_v61 = vpack.c.bf16 %v5666_v58, %v5665_v43  ;;  %v1710_v1 = vpop.f32.mrb[83].mxu0  ;;  %v6152_v58 = vld [vmem:[%s8203_s2 + $0x37c] ss:$12 sps:$4 sm:$0xff]  }
 0x215   :  { %v7561_v2 = vpack.c.bf16 %v1710_v1, %v1707_v60  ;;  %v6147_v60 = vld [vmem:[%s8203_s2 + $0x360] ss:$12 sps:$4 sm:$0xff]  }
 0x216   :  { %3670 = vmatmul.mubr.bf16.gmra.mrb[188].mxu0 %v7240_v59 }
 0x217   :  { %3677 = vmatprep.mubr.bf16.mxu0 %v7425_v23 }
 0x218   :  { %3155 = vmatmul.mubr.bf16.gmra.mrb[48].mxu1 %v7286_v56 }
 0x219   :  { %v5669_v63 = vpop.f32.mrb[84].mxu0  ;;  %3164 = vmatprep.mubr.bf16.mxu1 %v7472_v51 }
 0x21a   :  { %v1723_v53 = vpop.f32.mrb[85].mxu0 }
 0x21b   :  { %v5670_v10 = vpop.f32.mrb[86].mxu0 }
 0x21c   :  { %v7567_v3 = vpack.c.bf16 %v5670_v10, %v5669_v63  ;;  %v1726_v62 = vpop.f32.mrb[87].mxu0  ;;  %v6150_v63 = vld [vmem:[%s8203_s2 + $0x378] ss:$12 sps:$4 sm:$0xff]  }
 0x21d   :  { %v7569_v4 = vpack.c.bf16 %v1726_v62, %v1723_v53 }
 0x21e   :  { %3678 = vmatmul.mubr.bf16.gmra.mrb[192].mxu0 %v7258_v20 }
 0x21f   :  { %3685 = vmatprep.mubr.bf16.mxu0 %v7423_v21 }
 0x220   :  { %3165 = vmatmul.mubr.bf16.gmra.mrb[52].mxu1 %v7282_v52 }
 0x221   :  { %v5673_v59 = vpop.f32.mrb[88].mxu0  ;;  %3174 = vmatprep.mubr.bf16.mxu1 %v7500_v11 }
 0x222   :  { %v1739_v23 = vpop.f32.mrb[89].mxu0 }
 0x223   :  { %v5674_v5 = vpop.f32.mrb[90].mxu0 }
 0x224   :  { %v7575_v8 = vpack.c.bf16 %v5674_v5, %v5673_v59  ;;  %v1742_v12 = vpop.f32.mrb[91].mxu0  ;;  %v6158_v5 = vld [vmem:[%s8203_s2 + $0x3ac] ss:$12 sps:$4 sm:$0xff]  }
 0x225   :  { %v7577_v17 = vpack.c.bf16 %v1742_v12, %v1739_v23  ;;  %v6153_v23 = vld [vmem:[%s8203_s2 + $0x390] ss:$12 sps:$4 sm:$0xff]  }
 0x226   :  { %3686 = vmatmul.mubr.bf16.gmra.mrb[196].mxu0 %v7254_v15 }
 0x227   :  { %3693 = vmatprep.mubr.bf16.mxu0 %v7448_v41 }
 0x228   :  { %3175 = vmatmul.mubr.bf16.gmra.mrb[56].mxu1 %v7300_v13 }
 0x229   :  { %v5677_v20 = vpop.f32.mrb[92].mxu0  ;;  %3184 = vmatprep.mubr.bf16.mxu1 %v7498_v6 }
 0x22a   :  { %v1755_v21 = vpop.f32.mrb[93].mxu0 }
 0x22b   :  { %v5678_v18 = vpop.f32.mrb[94].mxu0 }
 0x22c   :  { %v7583_v19 = vpack.c.bf16 %v5678_v18, %v5677_v20  ;;  %v1758_v31 = vpop.f32.mrb[95].mxu0  ;;  %v6156_v20 = vld [vmem:[%s8203_s2 + $0x3a8] ss:$12 sps:$4 sm:$0xff]  }
 0x22d   :  { %v7585_v9 = vpack.c.bf16 %v1758_v31, %v1755_v21 }
 0x22e   :  { %3694 = vmatmul.mubr.bf16.gmra.mrb[200].mxu0 %v7272_v38  ;;  %v6132_v38 = vld [vmem:[%s8203_s2 + $0x31c] ss:$12 sps:$4 sm:$0xff]  }
 0x22f   :  { %3701 = vmatprep.mubr.bf16.mxu0 %v7446_v39 }
 0x230   :  { %3185 = vmatmul.mubr.bf16.gmra.mrb[60].mxu1 %v7296_v7 }
 0x231   :  { %v5681_v15 = vpop.f32.mrb[96].mxu0 }
 0x232   :  { %v1771_v41 = vpop.f32.mrb[97].mxu0 }
 0x233   :  { %v5682_v57 = vpop.f32.mrb[98].mxu0 }
 0x234   :  { %v7590_v22 = vpack.c.bf16 %v5682_v57, %v5681_v15  ;;  %v1774_v25 = vpop.f32.mrb[99].mxu0 }
 0x235   :  { %v7592_v28 = vpack.c.bf16 %v1774_v25, %v1771_v41 }
 0x236   :  { %3702 = vmatmul.mubr.bf16.gmra.mrb[204].mxu0 %v7268_v34  ;;  %v6135_v34 = vld [vmem:[%s8203_s2 + $0x334] ss:$12 sps:$4 sm:$0xff]  }
 0x237   :  { %3227 = vmatprep.mubr.bf16.mxu1 %v7592_v28  ;;  %3709 = vmatprep.mubr.bf16.mxu0 %v7474_v55 }
 0x238   :  { %3228 = vmatmul.mubr.bf16.vlgmr.msra.gmra.mrb[0].mxu1 %v7526_v32 }
 0x239   :  { %3389 = vmatpush1.bf16.msra.mxu1 %v6127_v33  ;;  %v5685_v39 = vpop.f32.mrb[100].mxu0  ;;  %3237 = vmatprep.mubr.bf16.mxu1 %v7590_v22 }
 0x23a   :  { %v1787_v35 = vpop.f32.mrb[101].mxu0  ;;  %3390 = vmatprep.subr.bf16.mxu1 %v6132_v38 }
 0x23b   :  { %v5686_v37 = vpop.f32.mrb[102].mxu0 }
 0x23c   :  { %v7611_v42 = vpack.c.bf16 %v5686_v37, %v5685_v39  ;;  %v1790_v55 = vpop.f32.mrb[103].mxu0 }
 0x23d   :  { %v7613_v27 = vpack.c.bf16 %v1790_v55, %v1787_v35  ;;  %3391 = vmatpush1.bf16.msra.mxu1 %v6130_v36 }
 0x23e   :  { %3710 = vmatmul.mubr.bf16.gmra.mrb[208].mxu0 %v7286_v56  ;;  %3392 = vmatprep.subr.bf16.mxu1 %v6135_v34  ;;  %v6149_v56 = vld [vmem:[%s8203_s2 + $0x364] ss:$12 sps:$4 sm:$0xff]  }
 0x23f   :  { %3717 = vmatprep.mubr.bf16.mxu0 %v7472_v51 }
 0x240   :  { %3238 = vmatmul.mubr.bf16.gmra.mrb[4].mxu1 %v7524_v26 }
 0x241   :  { %v5689_v14 = vpop.f32.mrb[104].mxu0  ;;  %3247 = vmatprep.mubr.bf16.mxu1 %v7613_v27  ;;  %3393 = vmatpush1.bf16.msra.mxu1 %v6133_v29 }
 0x242   :  { %v1803_v24 = vpop.f32.mrb[105].mxu0  ;;  %3394 = vmatprep.subr.bf16.mxu1 %v6142_v45 }
 0x243   :  { %v5690_v30 = vpop.f32.mrb[106].mxu0 }
 0x244   :  { %v7631_v50 = vpack.c.bf16 %v5690_v30, %v5689_v14  ;;  %v1806_v51 = vpop.f32.mrb[107].mxu0 }
 0x245   :  { %v7633_v43 = vpack.c.bf16 %v1806_v51, %v1803_v24  ;;  %3395 = vmatpush1.bf16.msra.mxu1 %v6140_v47 }
 0x246   :  { %3718 = vmatmul.mubr.bf16.gmra.mrb[212].mxu0 %v7282_v52  ;;  %3396 = vmatprep.subr.bf16.mxu1 %v6149_v56  ;;  %v6155_v52 = vld [vmem:[%s8203_s2 + $0x394] ss:$12 sps:$4 sm:$0xff]  }
 0x247   :  { %3725 = vmatprep.mubr.bf16.mxu0 %v7500_v11 }
 0x248   :  { %3248 = vmatmul.mubr.bf16.gmra.mrb[8].mxu1 %v7537_v44 }
 0x249   :  { %v5693_v1 = vpop.f32.mrb[108].mxu0  ;;  %3257 = vmatprep.mubr.bf16.mxu1 %v7611_v42  ;;  %3397 = vmatpush1.bf16.msra.mxu1 %v6147_v60 }
 0x24a   :  { %v1819_v53 = vpop.f32.mrb[109].mxu0  ;;  %3398 = vmatprep.subr.bf16.mxu1 %v6152_v58 }
 0x24b   :  { %v5694_v10 = vpop.f32.mrb[110].mxu0 }
 0x24c   :  { %v7651_v62 = vpack.c.bf16 %v5694_v10, %v5693_v1  ;;  %v1822_v11 = vpop.f32.mrb[111].mxu0 }
 0x24d   :  { %v7653_v59 = vpack.c.bf16 %v1822_v11, %v1819_v53  ;;  %3399 = vmatpush1.bf16.msra.mxu1 %v6150_v63 }
 0x24e   :  { %3726 = vmatmul.mubr.bf16.gmra.mrb[216].mxu0 %v7300_v13  ;;  %3400 = vmatprep.subr.bf16.mxu1 %v6155_v52  ;;  %v6159_v13 = vld [vmem:[%s8203_s2 + $0x248] ss:$12 sps:$4 sm:$0xff]  }
 0x24f   :  { %3733 = vmatprep.mubr.bf16.mxu0 %v7498_v6 }
 0x250   :  { %3258 = vmatmul.mubr.bf16.gmra.mrb[12].mxu1 %v7535_v40 }
 0x251   :  { %v5697_v12 = vpop.f32.mrb[112].mxu0  ;;  %3267 = vmatprep.mubr.bf16.mxu1 %v7633_v43  ;;  %3401 = vmatpush1.bf16.msra.mxu1 %v6153_v23 }
 0x252   :  { %v1835_v21 = vpop.f32.mrb[113].mxu0  ;;  %3402 = vmatprep.subr.bf16.mxu1 %v6158_v5 }
 0x253   :  { %v5698_v18 = vpop.f32.mrb[114].mxu0 }
 0x254   :  { %v7671_v31 = vpack.c.bf16 %v5698_v18, %v5697_v12  ;;  %v1838_v6 = vpop.f32.mrb[115].mxu0 }
 0x255   :  { %v7673_v15 = vpack.c.bf16 %v1838_v6, %v1835_v21  ;;  %3403 = vmatpush1.bf16.msra.mxu1 %v6156_v20 }
 0x256   :  { %3734 = vmatmul.mubr.bf16.gmra.mrb[220].mxu0 %v7296_v7  ;;  %5408 = vmatprep.subr.bf16.mxu1 %v6159_v13 }
 0x258   :  { %3268 = vmatmul.mubr.bf16.gmra.mrb[16].mxu1 %v7545_v48 }
 0x259   :  { %v5701_v41 = vpop.f32.mrb[116].mxu0  ;;  %3277 = vmatprep.mubr.bf16.mxu1 %v7631_v50 }
 0x25a   :  { %v1851_v57 = vpop.f32.mrb[117].mxu0 }
 0x25b   :  { %v5702_v25 = vpop.f32.mrb[118].mxu0 }
 0x25c   :  { %v7678_v33 = vpack.c.bf16 %v5702_v25, %v5701_v41  ;;  %v1854_v38 = vpop.f32.mrb[119].mxu0 }
 0x25d   :  { %v7680_v39 = vpack.c.bf16 %v1854_v38, %v1851_v57 }
 0x260   :  { %3278 = vmatmul.mubr.bf16.gmra.mrb[20].mxu1 %v7543_v46 }
 0x261   :  { %v5705_v36 = vpop.f32.mrb[120].mxu0  ;;  %3287 = vmatprep.mubr.bf16.mxu1 %v7653_v59 }
 0x262   :  { %v1867_v35 = vpop.f32.mrb[121].mxu0 }
 0x263   :  { %v5706_v7 = vpop.f32.mrb[122].mxu0 }
 0x264   :  { %v7684_v34 = vpack.c.bf16 %v5706_v7, %v5705_v36  ;;  %v1870_v37 = vpop.f32.mrb[123].mxu0 }
 0x265   :  { %v7686_v55 = vpack.c.bf16 %v1870_v37, %v1867_v35 }
 0x268   :  { %3288 = vmatmul.mubr.bf16.gmra.mrb[24].mxu1 %v7553_v54 }
 0x269   :  { %v5709_v29 = vpop.f32.mrb[124].mxu0  ;;  %3297 = vmatprep.mubr.bf16.mxu1 %v7651_v62 }
 0x26a   :  { %v1883_v45 = vpop.f32.mrb[125].mxu0 }
 0x26b   :  { %v5710_v14 = vpop.f32.mrb[126].mxu0 }
 0x26c   :  { %v7690_v47 = vpack.c.bf16 %v5710_v14, %v5709_v29  ;;  %v1886_v24 = vpop.f32.mrb[127].mxu0 }
 0x26d   :  { %v7692_v56 = vpack.c.bf16 %v1886_v24, %v1883_v45 }
 0x270   :  { %3298 = vmatmul.mubr.bf16.gmra.mrb[28].mxu1 %v7551_v49 }
 0x271   :  { %v5713_v30 = vpop.f32.mrb[128].mxu0  ;;  %3307 = vmatprep.mubr.bf16.mxu1 %v7673_v15 }
 0x272   :  { %v1899_v51 = vpop.f32.mrb[129].mxu0 }
 0x273   :  { %v5714_v60 = vpop.f32.mrb[130].mxu0 }
 0x274   :  { %v7696_v58 = vpack.c.bf16 %v5714_v60, %v5713_v30  ;;  %v1902_v1 = vpop.f32.mrb[131].mxu0 }
 0x275   :  { %v7698_v63 = vpack.c.bf16 %v1902_v1, %v1899_v51 }
 0x277   :  { %5759 = vmatprep.mubr.bf16.mxu0 %v7698_v63 }
 0x278   :  { %3308 = vmatmul.mubr.bf16.gmra.mrb[32].mxu1 %v7561_v2  ;;  %5760 = vmatmul.mubr.bf16.vlgmr.msra.gmra.mrb[224].mxu0 %v7696_v58 }
 0x279   :  { %v5717_v53 = vpop.f32.mrb[132].mxu0  ;;  %3317 = vmatprep.mubr.bf16.mxu1 %v7671_v31 }
 0x27a   :  { %v1915_v52 = vpop.f32.mrb[133].mxu0 }
 0x27b   :  { %v5718_v10 = vpop.f32.mrb[134].mxu0 }
 0x27c   :  { %v7704_v11 = vpack.c.bf16 %v5718_v10, %v5717_v53  ;;  %v1918_v23 = vpop.f32.mrb[135].mxu0 }
 0x27d   :  { %v7706_v5 = vpack.c.bf16 %v1918_v23, %v1915_v52 }
 0x27f   :  { %5763 = vmatprep.mubr.bf16.mxu0 %v7706_v5 }
 0x280   :  { %3318 = vmatmul.mubr.bf16.gmra.mrb[36].mxu1 %v7559_v61  ;;  %5764 = vmatmul.mubr.bf16.gmra.mrb[228].mxu0 %v7704_v11 }
 0x281   :  { %v5721_v12 = vpop.f32.mrb[136].mxu0  ;;  %3327 = vmatprep.mubr.bf16.mxu1 %v7680_v39 }
 0x282   :  { %v1931_v20 = vpop.f32.mrb[137].mxu0 }
 0x283   :  { %v5722_v21 = vpop.f32.mrb[138].mxu0 }
 0x284   :  { %v7712_v13 = vpack.c.bf16 %v5722_v21, %v5721_v12  ;;  %v1934_v18 = vpop.f32.mrb[139].mxu0 }
 0x285   :  { %v7714_v6 = vpack.c.bf16 %v1934_v18, %v1931_v20 }
 0x287   :  { %5767 = vmatprep.mubr.bf16.mxu0 %v7714_v6 }
 0x288   :  { %3328 = vmatmul.mubr.bf16.gmra.mrb[40].mxu1 %v7569_v4  ;;  %5768 = vmatmul.mubr.bf16.gmra.mrb[232].mxu0 %v7712_v13 }
 0x289   :  { %v5725_v41 = vpop.f32.mrb[140].mxu0  ;;  %3337 = vmatprep.mubr.bf16.mxu1 %v7678_v33 }
 0x28a   :  { %v1947_v57 = vpop.f32.mrb[141].mxu0 }
 0x28b   :  { %v5726_v25 = vpop.f32.mrb[142].mxu0 }
 0x28c   :  { %v7720_v38 = vpack.c.bf16 %v5726_v25, %v5725_v41  ;;  %v1950_v36 = vpop.f32.mrb[143].mxu0 }
 0x28d   :  { %v7722_v35 = vpack.c.bf16 %v1950_v36, %v1947_v57 }
 0x28f   :  { %5771 = vmatprep.mubr.bf16.mxu0 %v7722_v35 }
 0x290   :  { %3338 = vmatmul.mubr.bf16.gmra.mrb[44].mxu1 %v7567_v3  ;;  %5772 = vmatmul.mubr.bf16.gmra.mrb[236].mxu0 %v7720_v38 }
 0x291   :  { %v5729_v7 = vpop.f32.mrb[144].mxu0  ;;  %3347 = vmatprep.mubr.bf16.mxu1 %v7686_v55 }
 0x292   :  { %v1963_v37 = vpop.f32.mrb[145].mxu0 }
 0x293   :  { %v5730_v29 = vpop.f32.mrb[146].mxu0 }
 0x294   :  { %v7728_v45 = vpack.c.bf16 %v5730_v29, %v5729_v7  ;;  %v1966_v14 = vpop.f32.mrb[147].mxu0 }
 0x295   :  { %v7730_v24 = vpack.c.bf16 %v1966_v14, %v1963_v37 }
 0x297   :  { %5775 = vmatprep.mubr.bf16.mxu0 %v7730_v24 }
 0x298   :  { %3348 = vmatmul.mubr.bf16.gmra.mrb[48].mxu1 %v7577_v17  ;;  %5776 = vmatmul.mubr.bf16.gmra.mrb[240].mxu0 %v7728_v45 }
 0x299   :  { %v5733_v30 = vpop.f32.mrb[148].mxu0  ;;  %3357 = vmatprep.mubr.bf16.mxu1 %v7684_v34 }
 0x29a   :  { %v1979_v51 = vpop.f32.mrb[149].mxu0 }
 0x29b   :  { %v5734_v60 = vpop.f32.mrb[150].mxu0 }
 0x29c   :  { %v7736_v1 = vpack.c.bf16 %v5734_v60, %v5733_v30  ;;  %v1982_v53 = vpop.f32.mrb[151].mxu0 }
 0x29d   :  { %v7738_v52 = vpack.c.bf16 %v1982_v53, %v1979_v51 }
 0x29f   :  { %5779 = vmatprep.mubr.bf16.mxu0 %v7738_v52 }
 0x2a0   :  { %3358 = vmatmul.mubr.bf16.gmra.mrb[52].mxu1 %v7575_v8  ;;  %5780 = vmatmul.mubr.bf16.gmra.mrb[244].mxu0 %v7736_v1 }
 0x2a1   :  { %v5737_v10 = vpop.f32.mrb[152].mxu0  ;;  %3367 = vmatprep.mubr.bf16.mxu1 %v7692_v56 }
 0x2a2   :  { %v1995_v23 = vpop.f32.mrb[153].mxu0 }
 0x2a3   :  { %v5738_v12 = vpop.f32.mrb[154].mxu0 }
 0x2a4   :  { %v7744_v20 = vpack.c.bf16 %v5738_v12, %v5737_v10  ;;  %v1998_v21 = vpop.f32.mrb[155].mxu0  ;;  %v6160_v10 = vld [vmem:[%s8203_s2 + $0x188] ss:$12 sps:$4 sm:$0xff]  }
 0x2a5   :  { %v7746_v18 = vpack.c.bf16 %v1998_v21, %v1995_v23  ;;  %v6161_v23 = vld [vmem:[%s8203_s2 + $0x260] ss:$12 sps:$4 sm:$0xff]  }
 0x2a6   :  { %v6162_v21 = vld [vmem:[%s8203_s2 + $0x1a0] ss:$12 sps:$4 sm:$0xff]  }
 0x2a7   :  { %5783 = vmatprep.mubr.bf16.mxu0 %v7746_v18 }
 0x2a8   :  { %3368 = vmatmul.mubr.bf16.gmra.mrb[56].mxu1 %v7585_v9  ;;  %5784 = vmatmul.mubr.bf16.gmra.mrb[248].mxu0 %v7744_v20 }
 0x2a9   :  { %v5741_v41 = vpop.f32.mrb[156].mxu0  ;;  %3377 = vmatprep.mubr.bf16.mxu1 %v7690_v47 }
 0x2aa   :  { %v2011_v57 = vpop.f32.mrb[157].mxu0 }
 0x2ab   :  { %v5742_v25 = vpop.f32.mrb[158].mxu0 }
 0x2ac   :  { %v7752_v36 = vpack.c.bf16 %v5742_v25, %v5741_v41  ;;  %v2014_v7 = vpop.f32.mrb[159].mxu0 }
 0x2ad   :  { %v7754_v37 = vpack.c.bf16 %v2014_v7, %v2011_v57  ;;  %v6163_v57 = vld [vmem:[%s8203_s2 + $0x278] ss:$12 sps:$4 sm:$0xff]  }
 0x2af   :  { %5787 = vmatprep.mubr.bf16.mxu0 %v7754_v37 }
 0x2b0   :  { %3378 = vmatmul.mubr.bf16.gmra.mrb[60].mxu1 %v7583_v19  ;;  %5788 = vmatmul.mubr.bf16.gmra.mrb[252].mxu0 %v7752_v36 }
 0x2b1   :  { %v5312_v29 = vpop.f32.mrb[160].mxu0  ;;  %3420 = vmatprep.mubr.bf16.mxu1 %v6226_v0 }
 0x2b2   :  { %v5313_v14 = vpop.f32.mrb[161].mxu0 }
 0x2b3   :  { %v7760_v30 = vadd.f32 %v5313_v14, %v5312_v29  ;;  %v5315_v51 = vpop.f32.mrb[162].mxu0 }
 0x2b4   :  { %v5316_v60 = vpop.f32.mrb[163].mxu0 }
 0x2b5   :  { %v7762_v53 = vadd.f32 %v5316_v60, %v5315_v51  ;;  %v6165_v51 = vld [vmem:[%s8203_s2 + $0x290] ss:$12 sps:$4 sm:$0xff]  }
 0x2b8   :  { %3421 = vmatmul.mubr.bf16.vlgmr.msra.gmra.mrb[0].mxu1 %v7698_v63  ;;  %v6164_v63 = vld [vmem:[%s8203_s2 + $0x1b8] ss:$12 sps:$4 sm:$0xff]  }
 0x2b9   :  { %5409 = vmatpush3.bf16.msra.mxu1 %v6160_v10  ;;  %v5318_v12 = vpop.f32.mrb[164].mxu0  ;;  %3430 = vmatprep.mubr.bf16.mxu1 %v6226_v0  ;;  %v6166_v10 = vld [vmem:[%s8203_s2 + $0x1d0] ss:$12 sps:$4 sm:$0xff]  }
 0x2ba   :  { %v5319_v41 = vpop.f32.mrb[165].mxu0  ;;  %5410 = vmatprep.subr.bf16.mxu1 %v6161_v23 }
 0x2bb   :  { %v7778_v25 = vadd.f32 %v5319_v41, %v5318_v12  ;;  %v5321_v7 = vpop.f32.mrb[166].mxu0  ;;  %v6167_v12 = vld [vmem:[%s8203_s2 + $0x2a8] ss:$12 sps:$4 sm:$0xff]  }
 0x2bc   :  { %v5322_v29 = vpop.f32.mrb[167].mxu0 }
 0x2bd   :  { %v7780_v14 = vadd.f32 %v5322_v29, %v5321_v7  ;;  %5411 = vmatpush3.bf16.msra.mxu1 %v6162_v21  ;;  %v6169_v29 = vld [vmem:[%s8203_s2 + $0x2c0] ss:$12 sps:$4 sm:$0xff]  }
 0x2be   :  { %5412 = vmatprep.subr.bf16.mxu1 %v6163_v57 }
 0x2c0   :  { %3431 = vmatmul.mubr.bf16.gmra.mrb[4].mxu1 %v7696_v58  ;;  %v6168_v58 = vld [vmem:[%s8203_s2 + $0x1e8] ss:$12 sps:$4 sm:$0xff]  }
 0x2c1   :  { %v5324_v60 = vpop.f32.mrb[168].mxu0  ;;  %3440 = vmatprep.mubr.bf16.mxu1 %v6226_v0  ;;  %5413 = vmatpush3.bf16.msra.mxu1 %v6164_v63 }
 0x2c2   :  { %v5325_v23 = vpop.f32.mrb[169].mxu0  ;;  %5414 = vmatprep.subr.bf16.mxu1 %v6165_v51  ;;  %v6170_v51 = vld [vmem:[%s8203_s2 + $0x200] ss:$12 sps:$4 sm:$0xff]  }
 0x2c3   :  { %v7796_v21 = vadd.f32 %v5325_v23, %v5324_v60  ;;  %v5327_v41 = vpop.f32.mrb[170].mxu0 }
 0x2c4   :  { %v5328_v57 = vpop.f32.mrb[171].mxu0 }
 0x2c5   :  { %v7798_v7 = vadd.f32 %v5328_v57, %v5327_v41  ;;  %5415 = vmatpush3.bf16.msra.mxu1 %v6166_v10  ;;  %v6171_v10 = vld [vmem:[%s8203_s2 + $0x2d8] ss:$12 sps:$4 sm:$0xff]  }
 0x2c6   :  { %5416 = vmatprep.subr.bf16.mxu1 %v6167_v12 }
 0x2c7   :  { %8210 = vst [vmem:[#allocation5_spill] sm:$0xff] %v7798_v7 }
 0x2c8   :  { %3441 = vmatmul.mubr.bf16.gmra.mrb[8].mxu1 %v7706_v5  ;;  %v6172_v5 = vld [vmem:[%s8203_s2 + $0x218] ss:$12 sps:$4 sm:$0xff]  }
 0x2c9   :  { %v5330_v63 = vpop.f32.mrb[172].mxu0  ;;  %3450 = vmatprep.mubr.bf16.mxu1 %v6226_v0  ;;  %5417 = vmatpush3.bf16.msra.mxu1 %v6168_v58  ;;  %v6173_v58 = vld [vmem:[%s8203_s2 + $0x2f0] ss:$12 sps:$4 sm:$0xff]  }
 0x2ca   :  { %v5331_v60 = vpop.f32.mrb[173].mxu0  ;;  %5418 = vmatprep.subr.bf16.mxu1 %v6169_v29 }
 0x2cb   :  { %v7814_v23 = vadd.f32 %v5331_v60, %v5330_v63  ;;  %v5333_v12 = vpop.f32.mrb[174].mxu0  ;;  %v6174_v63 = vld [vmem:[%s8203_s2 + $0x230] ss:$12 sps:$4 sm:$0xff]  }
 0x2cc   :  { %v5334_v41 = vpop.f32.mrb[175].mxu0 }
 0x2cd   :  { %8211 = vst [vmem:[#allocation6_spill] sm:$0xff] %v7814_v23  ;;  %v7816_v57 = vadd.f32 %v5334_v41, %v5333_v12  ;;  %5419 = vmatpush3.bf16.msra.mxu1 %v6170_v51 }
 0x2ce   :  { %5420 = vmatprep.subr.bf16.mxu1 %v6171_v10 }
 0x2cf   :  { %8212 = vst [vmem:[#allocation7_spill] sm:$0xff] %v7816_v57 }
 0x2d0   :  { %3451 = vmatmul.mubr.bf16.gmra.mrb[12].mxu1 %v7704_v11 }
 0x2d1   :  { %v5336_v29 = vpop.f32.mrb[176].mxu0  ;;  %3460 = vmatprep.mubr.bf16.mxu1 %v6226_v0  ;;  %5421 = vmatpush3.bf16.msra.mxu1 %v6172_v5 }
 0x2d2   :  { %v5337_v51 = vpop.f32.mrb[177].mxu0  ;;  %5422 = vmatprep.subr.bf16.mxu1 %v6173_v58 }
 0x2d3   :  { %v7829_v60 = vadd.f32 %v5337_v51, %v5336_v29  ;;  %v5339_v12 = vpop.f32.mrb[178].mxu0 }
 0x2d4   :  { %v5340_v10 = vpop.f32.mrb[179].mxu0 }
 0x2d5   :  { %v7831_v41 = vadd.f32 %v5340_v10, %v5339_v12  ;;  %5423 = vmatpush3.bf16.msra.mxu1 %v6174_v63 }
 0x2d8   :  { %3461 = vmatmul.mubr.bf16.gmra.mrb[16].mxu1 %v7714_v6 }
 0x2d9   :  { %v5342_v11 = vpop.f32.mrb[180].mxu0  ;;  %3470 = vmatprep.mubr.bf16.mxu1 %v6226_v0 }
 0x2da   :  { %v5343_v16 = vpop.f32.mrb[181].mxu0 }
 0x2db   :  { %v7835_v5 = vadd.f32 %v5343_v16, %v5342_v11  ;;  %v5345_v57 = vpop.f32.mrb[182].mxu0 }
 0x2dc   :  { %v5346_v23 = vpop.f32.mrb[183].mxu0 }
 0x2dd   :  { %v7837_v7 = vadd.f32 %v5346_v23, %v5345_v57 }
 0x2e0   :  { %3471 = vmatmul.mubr.bf16.gmra.mrb[20].mxu1 %v7712_v13 }
 0x2e1   :  { %v5348_v58 = vpop.f32.mrb[184].mxu0  ;;  %3480 = vmatprep.mubr.bf16.mxu1 %v6226_v0 }
 0x2e2   :  { %v5349_v29 = vpop.f32.mrb[185].mxu0 }
 0x2e3   :  { %v7841_v51 = vadd.f32 %v5349_v29, %v5348_v58  ;;  %v5351_v63 = vpop.f32.mrb[186].mxu0 }
 0x2e4   :  { %v5352_v6 = vpop.f32.mrb[187].mxu0 }
 0x2e5   :  { %v7843_v12 = vadd.f32 %v5352_v6, %v5351_v63 }
 0x2e7   :  { %8213 = vst [vmem:[#allocation8_spill] sm:$0xff] %v7843_v12 }
 0x2e8   :  { %3481 = vmatmul.mubr.bf16.gmra.mrb[24].mxu1 %v7722_v35 }
 0x2e9   :  { %v5354_v16 = vpop.f32.mrb[188].mxu0  ;;  %3490 = vmatprep.mubr.bf16.mxu1 %v6226_v0 }
 0x2ea   :  { %v5355_v10 = vpop.f32.mrb[189].mxu0 }
 0x2eb   :  { %v7847_v23 = vadd.f32 %v5355_v10, %v5354_v16  ;;  %v5357_v57 = vpop.f32.mrb[190].mxu0 }
 0x2ec   :  { %v5358_v13 = vpop.f32.mrb[191].mxu0 }
 0x2ed   :  { %v7849_v11 = vadd.f32 %v5358_v13, %v5357_v57 }
 0x2ef   :  { %8214 = vst [vmem:[#allocation9_spill] sm:$0xff] %v7849_v11 }
 0x2f0   :  { %3491 = vmatmul.mubr.bf16.gmra.mrb[28].mxu1 %v7720_v38 }
 0x2f1   :  { %v5360_v58 = vpop.f32.mrb[192].mxu0  ;;  %3500 = vmatprep.mubr.bf16.mxu1 %v6226_v0 }
 0x2f2   :  { %v5361_v29 = vpop.f32.mrb[193].mxu0 }
 0x2f3   :  { %v7853_v63 = vadd.f32 %v5361_v29, %v5360_v58  ;;  %v5363_v6 = vpop.f32.mrb[194].mxu0 }
 0x2f4   :  { %v5364_v35 = vpop.f32.mrb[195].mxu0 }
 0x2f5   :  { %8215 = vst [vmem:[#allocation10_spill] sm:$0xff] %v7853_v63  ;;  %v7855_v12 = vadd.f32 %v5364_v35, %v5363_v6 }
 0x2f7   :  { %8216 = vst [vmem:[#allocation11_spill] sm:$0xff] %v7855_v12 }
 0x2f8   :  { %3501 = vmatmul.mubr.bf16.gmra.mrb[32].mxu1 %v7730_v24 }
 0x2f9   :  { %v5366_v16 = vpop.f32.mrb[196].mxu0  ;;  %3510 = vmatprep.mubr.bf16.mxu1 %v6226_v0 }
 0x2fa   :  { %v5367_v10 = vpop.f32.mrb[197].mxu0 }
 0x2fb   :  { %v7859_v57 = vadd.f32 %v5367_v10, %v5366_v16  ;;  %v5369_v13 = vpop.f32.mrb[198].mxu0 }
 0x2fc   :  { %v5370_v38 = vpop.f32.mrb[199].mxu0 }
 0x2fd   :  { %8217 = vst [vmem:[#allocation12_spill] sm:$0xff] %v7859_v57  ;;  %v7861_v11 = vadd.f32 %v5370_v38, %v5369_v13  ;;  %v2288_v57 = vld [vmem:[#allocation2 + $0xb0] sm:$0xff] }
 0x2ff   :  { %8218 = vst [vmem:[#allocation13_spill] sm:$0xff] %v7861_v11 }
 0x300   :  { %3511 = vmatmul.mubr.bf16.gmra.mrb[36].mxu1 %v7728_v45 }
 0x301   :  { %v5372_v58 = vpop.f32.mrb[200].mxu0  ;;  %3520 = vmatprep.mubr.bf16.mxu1 %v6226_v0 }
 0x302   :  { %v5373_v29 = vpop.f32.mrb[201].mxu0 }
 0x303   :  { %v7865_v6 = vadd.f32 %v5373_v29, %v5372_v58  ;;  %v5375_v35 = vpop.f32.mrb[202].mxu0 }
 0x304   :  { %v5376_v24 = vpop.f32.mrb[203].mxu0 }
 0x305   :  { %8219 = vst [vmem:[#allocation14_spill] sm:$0xff] %v7865_v6  ;;  %v7867_v12 = vadd.f32 %v5376_v24, %v5375_v35 }
 0x307   :  { %8220 = vst [vmem:[#allocation15_spill] sm:$0xff] %v7867_v12 }
 0x308   :  { %3521 = vmatmul.mubr.bf16.gmra.mrb[40].mxu1 %v7738_v52 }
 0x309   :  { %v5378_v16 = vpop.f32.mrb[204].mxu0  ;;  %3530 = vmatprep.mubr.bf16.mxu1 %v6226_v0 }
 0x30a   :  { %v5379_v10 = vpop.f32.mrb[205].mxu0 }
 0x30b   :  { %v7871_v13 = vadd.f32 %v5379_v10, %v5378_v16  ;;  %v5381_v38 = vpop.f32.mrb[206].mxu0 }
 0x30c   :  { %v5382_v45 = vpop.f32.mrb[207].mxu0 }
 0x30d   :  { %8221 = vst [vmem:[#allocation16_spill] sm:$0xff] %v7871_v13  ;;  %v7873_v11 = vadd.f32 %v5382_v45, %v5381_v38 }
 0x30f   :  { %8222 = vst [vmem:[#allocation17_spill] sm:$0xff] %v7873_v11 }
 0x310   :  { %3531 = vmatmul.mubr.bf16.gmra.mrb[44].mxu1 %v7736_v1 }
 0x311   :  { %v5384_v58 = vpop.f32.mrb[208].mxu0  ;;  %3540 = vmatprep.mubr.bf16.mxu1 %v6226_v0 }
 0x312   :  { %v5385_v29 = vpop.f32.mrb[209].mxu0 }
 0x313   :  { %v7877_v35 = vadd.f32 %v5385_v29, %v5384_v58  ;;  %v5387_v24 = vpop.f32.mrb[210].mxu0 }
 0x314   :  { %v5388_v52 = vpop.f32.mrb[211].mxu0 }
 0x315   :  { %8223 = vst [vmem:[#allocation18_spill] sm:$0xff] %v7877_v35  ;;  %v7879_v12 = vadd.f32 %v5388_v52, %v5387_v24 }
 0x317   :  { %8224 = vst [vmem:[#allocation19_spill] sm:$0xff] %v7879_v12 }
 0x318   :  { %3541 = vmatmul.mubr.bf16.gmra.mrb[48].mxu1 %v7746_v18 }
 0x319   :  { %v5390_v16 = vpop.f32.mrb[212].mxu0  ;;  %3550 = vmatprep.mubr.bf16.mxu1 %v6226_v0 }
 0x31a   :  { %v5391_v10 = vpop.f32.mrb[213].mxu0 }
 0x31b   :  { %v7883_v38 = vadd.f32 %v5391_v10, %v5390_v16  ;;  %v5393_v45 = vpop.f32.mrb[214].mxu0 }
 0x31c   :  { %v5394_v1 = vpop.f32.mrb[215].mxu0 }
 0x31d   :  { %8225 = vst [vmem:[#allocation20_spill] sm:$0xff] %v7883_v38  ;;  %v7885_v11 = vadd.f32 %v5394_v1, %v5393_v45 }
 0x31f   :  { %8226 = vst [vmem:[#allocation21_spill] sm:$0xff] %v7885_v11 }
 0x320   :  { %3551 = vmatmul.mubr.bf16.gmra.mrb[52].mxu1 %v7744_v20 }
 0x321   :  { %v5396_v58 = vpop.f32.mrb[216].mxu0  ;;  %3560 = vmatprep.mubr.bf16.mxu1 %v6226_v0 }
 0x322   :  { %v5397_v29 = vpop.f32.mrb[217].mxu0 }
 0x323   :  { %v7889_v24 = vadd.f32 %v5397_v29, %v5396_v58  ;;  %v5399_v52 = vpop.f32.mrb[218].mxu0 }
 0x324   :  { %v5400_v18 = vpop.f32.mrb[219].mxu0 }
 0x325   :  { %8227 = vst [vmem:[#allocation22_spill] sm:$0xff] %v7889_v24  ;;  %v7891_v12 = vadd.f32 %v5400_v18, %v5399_v52 }
 0x327   :  { %8228 = vst [vmem:[#allocation23_spill] sm:$0xff] %v7891_v12 }
 0x328   :  { %3561 = vmatmul.mubr.bf16.gmra.mrb[56].mxu1 %v7754_v37 }
 0x329   :  { %v5402_v16 = vpop.f32.mrb[220].mxu0  ;;  %3570 = vmatprep.mubr.bf16.mxu1 %v6226_v0 }
 0x32a   :  { %v5403_v10 = vpop.f32.mrb[221].mxu0 }
 0x32b   :  { %v7895_v45 = vadd.f32 %v5403_v10, %v5402_v16  ;;  %v5405_v1 = vpop.f32.mrb[222].mxu0 }
 0x32c   :  { %v5406_v20 = vpop.f32.mrb[223].mxu0 }
 0x32d   :  { %8229 = vst [vmem:[#allocation24_spill] sm:$0xff] %v7895_v45  ;;  %v7897_v11 = vadd.f32 %v5406_v20, %v5405_v1 }
 0x32f   :  { %8230 = vst [vmem:[#allocation25_spill] sm:$0xff] %v7897_v11 }
 0x330   :  { %3571 = vmatmul.mubr.bf16.gmra.mrb[60].mxu1 %v7752_v36 }
 0x331   :  { %3774 = vmatprep.mubr.bf16.mxu1 %v7592_v28 }
 0x338   :  { %3775 = vmatmul.mubr.bf16.vlgmr.msra.gmra.mrb[64].mxu1 %v7526_v32 }
 0x339   :  { %3782 = vmatprep.mubr.bf16.mxu1 %v7590_v22 }
 0x340   :  { %3783 = vmatmul.mubr.bf16.gmra.mrb[68].mxu1 %v7524_v26 }
 0x341   :  { %3790 = vmatprep.mubr.bf16.mxu1 %v7613_v27 }
 0x348   :  { %3791 = vmatmul.mubr.bf16.gmra.mrb[72].mxu1 %v7537_v44 }
 0x349   :  { %3798 = vmatprep.mubr.bf16.mxu1 %v7611_v42 }
 0x34b   :  { %v7907_v0 = vpop.f32.mrb[224].mxu0 }
 0x34c   :  { %v7909_v37 = vpop.f32.mrb[225].mxu0 }
 0x34d   :  { %v7911_v58 = vpop.f32.mrb[226].mxu0 }
 0x34e   :  { %v7913_v36 = vpop.f32.mrb[227].mxu0 }
 0x350   :  { %3799 = vmatmul.mubr.bf16.gmra.mrb[76].mxu1 %v7535_v40 }
 0x351   :  { %3806 = vmatprep.mubr.bf16.mxu1 %v7633_v43 }
 0x353   :  { %v7917_v32 = vpop.f32.mrb[228].mxu0 }
 0x354   :  { %v7919_v26 = vpop.f32.mrb[229].mxu0 }
 0x355   :  { %v7921_v22 = vpop.f32.mrb[230].mxu0 }
 0x356   :  { %v7923_v44 = vpop.f32.mrb[231].mxu0 }
 0x358   :  { %3807 = vmatmul.mubr.bf16.gmra.mrb[80].mxu1 %v7545_v48 }
 0x359   :  { %3814 = vmatprep.mubr.bf16.mxu1 %v7631_v50 }
 0x35b   :  { %v7927_v28 = vpop.f32.mrb[232].mxu0 }
 0x35c   :  { %v7929_v42 = vpop.f32.mrb[233].mxu0 }
 0x35d   :  { %v7931_v27 = vpop.f32.mrb[234].mxu0 }
 0x35e   :  { %v7933_v40 = vpop.f32.mrb[235].mxu0 }
 0x360   :  { %3815 = vmatmul.mubr.bf16.gmra.mrb[84].mxu1 %v7543_v46 }
 0x361   :  { %3822 = vmatprep.mubr.bf16.mxu1 %v7653_v59 }
 0x363   :  { %v7937_v43 = vpop.f32.mrb[236].mxu0 }
 0x364   :  { %8231 = vst [vmem:[#allocation26_spill] sm:$0xff] %v7937_v43  ;;  %v7939_v29 = vpop.f32.mrb[237].mxu0 }
 0x365   :  { %v7941_v52 = vpop.f32.mrb[238].mxu0 }
 0x366   :  { %8232 = vst [vmem:[#allocation27_spill] sm:$0xff] %v7941_v52  ;;  %v7943_v48 = vpop.f32.mrb[239].mxu0  ;;  %v2338_v52 = vld [vmem:[#allocation2 + $0x240] sm:$0xff] }
 0x368   :  { %3823 = vmatmul.mubr.bf16.gmra.mrb[88].mxu1 %v7553_v54 }
 0x369   :  { %3830 = vmatprep.mubr.bf16.mxu1 %v7651_v62 }
 0x36b   :  { %v7947_v50 = vpop.f32.mrb[240].mxu0 }
 0x36c   :  { %8233 = vst [vmem:[#allocation28_spill] sm:$0xff] %v7947_v50  ;;  %v7949_v18 = vpop.f32.mrb[241].mxu0 }
 0x36d   :  { %8234 = vst [vmem:[#allocation29_spill] sm:$0xff] %v7949_v18  ;;  %v7951_v16 = vpop.f32.mrb[242].mxu0 }
 0x36e   :  { %8235 = vst [vmem:[#allocation30_spill] sm:$0xff] %v7951_v16  ;;  %v7953_v46 = vpop.f32.mrb[243].mxu0 }
 0x36f   :  { %8236 = vst [vmem:[#allocation31_spill] sm:$0xff] %v7953_v46 }
 0x370   :  { %3831 = vmatmul.mubr.bf16.gmra.mrb[92].mxu1 %v7551_v49 }
 0x371   :  { %3838 = vmatprep.mubr.bf16.mxu1 %v7673_v15  ;;  %v6175_v15 = vld [vmem:[%s8205_s4 + $0x40] sm:$0xff]  }
 0x372   :  { %5544 = vmatprep.subr.bf16.mxu0 %v6175_v15  ;;  %v6179_v15 = vld [vmem:[%s8205_s4 + $0x50] sm:$0xff]  }
 0x373   :  { %v7957_v59 = vpop.f32.mrb[244].mxu0 }
 0x374   :  { %8237 = vst [vmem:[#allocation32_spill] sm:$0xff] %v7957_v59  ;;  %v7959_v10 = vpop.f32.mrb[245].mxu0 }
 0x375   :  { %8238 = vst [vmem:[#allocation33_spill] sm:$0xff] %v7959_v10  ;;  %v7961_v1 = vpop.f32.mrb[246].mxu0 }
 0x376   :  { %8239 = vst [vmem:[#allocation34_spill] sm:$0xff] %v7961_v1  ;;  %v7963_v54 = vpop.f32.mrb[247].mxu0  ;;  %v2276_v1 = vld [vmem:[#allocation2 + $0x50] sm:$0xff] }
 0x377   :  { %8240 = vst [vmem:[#allocation35_spill] sm:$0xff] %v7963_v54 }
 0x378   :  { %3839 = vmatmul.mubr.bf16.gmra.mrb[96].mxu1 %v7561_v2  ;;  %v6176_v2 = vld [vmem:[%s8205_s4] sm:$0xff]  }
 0x379   :  { %3846 = vmatprep.mubr.bf16.mxu1 %v7671_v31  ;;  %5545 = vmatpush3.bf16.msra.mxu0 %v6176_v2  ;;  %v2266_v2 = vld [vmem:[#allocation2] sm:$0xff] }
 0x37b   :  { %v7967_v62 = vpop.f32.mrb[248].mxu0 }
 0x37c   :  { %8241 = vst [vmem:[#allocation36_spill] sm:$0xff] %v7967_v62  ;;  %v7969_v20 = vpop.f32.mrb[249].mxu0 }
 0x37d   :  { %8242 = vst [vmem:[#allocation37_spill] sm:$0xff] %v7969_v20  ;;  %v7971_v11 = vpop.f32.mrb[250].mxu0 }
 0x37e   :  { %8243 = vst [vmem:[#allocation38_spill] sm:$0xff] %v7971_v11  ;;  %v7973_v49 = vpop.f32.mrb[251].mxu0  ;;  %v2269_v11 = vld [vmem:[#allocation2 + $0x18] sm:$0xff] }
 0x37f   :  { %8244 = vst [vmem:[#allocation39_spill] sm:$0xff] %v7973_v49 }
 0x380   :  { %3847 = vmatmul.mubr.bf16.gmra.mrb[100].mxu1 %v7559_v61  ;;  %v6177_v61 = vld [vmem:[%s8205_s4 + $0x48] sm:$0xff]  }
 0x381   :  { %3854 = vmatprep.mubr.bf16.mxu1 %v7680_v39  ;;  %v6178_v39 = vld [vmem:[%s8205_s4 + $0x8] sm:$0xff]   ;;  %5546 = vmatprep.subr.bf16.mxu0 %v6177_v61 }
 0x382   :  { %5547 = vmatpush3.bf16.msra.mxu0 %v6178_v39 }
 0x383   :  { %v7983_v31 = vpop.f32.mrb[252].mxu0  ;;  %5548 = vmatprep.subr.bf16.mxu0 %v6179_v15 }
 0x384   :  { %8245 = vst [vmem:[#allocation40_spill] sm:$0xff] %v7983_v31  ;;  %v7985_v45 = vpop.f32.mrb[253].mxu0  ;;  %v2267_v31 = vld [vmem:[#allocation2 + $0x8] sm:$0xff] }
 0x385   :  { %8246 = vst [vmem:[#allocation41_spill] sm:$0xff] %v7985_v45  ;;  %v7990_v12 = vpop.f32.mrb[254].mxu0 }
 0x386   :  { %8247 = vst [vmem:[#allocation42_spill] sm:$0xff] %v7990_v12  ;;  %v7995_v24 = vpop.f32.mrb[255].mxu0  ;;  %v6180_v12 = vld [vmem:[%s8205_s4 + $0x10] sm:$0xff]  }
 0x387   :  { %8248 = vst [vmem:[#allocation43_spill] sm:$0xff] %v7995_v24  ;;  %5549 = vmatpush3.bf16.msra.mxu0 %v6180_v12  ;;  %v2270_v24 = vld [vmem:[#allocation2 + $0x20] sm:$0xff] }
 0x388   :  { %3855 = vmatmul.mubr.bf16.gmra.mrb[104].mxu1 %v7569_v4  ;;  %v6181_v4 = vld [vmem:[%s8205_s4 + $0x58] sm:$0xff]  }
 0x389   :  { %3862 = vmatprep.mubr.bf16.mxu1 %v7678_v33  ;;  %v6182_v33 = vld [vmem:[%s8205_s4 + $0x18] sm:$0xff]   ;;  %5550 = vmatprep.subr.bf16.mxu0 %v6181_v4 }
 0x38b   :  { %v3422_v45 = vpop.f32.mrb[0].mxu1  ;;  %5551 = vmatpush3.bf16.msra.mxu0 %v6182_v33 }
 0x38c   :  { %v5811_v61 = vadd.f32 %v3422_v45, %v2266_v2  ;;  %v3424_v39 = vpop.f32.mrb[1].mxu1  ;;  %v6183_v45 = vld [vmem:[%s8205_s4 + $0x60] sm:$0xff]  }
 0x38d   :  { %v5812_v62 = vadd.f32 %v3424_v39, %v2267_v31  ;;  %v3426_v38 = vpop.f32.mrb[2].mxu1  ;;  %v2272_v39 = vld [vmem:[#allocation2 + $0x30] sm:$0xff]  ;;  %5552 = vmatprep.subr.bf16.mxu0 %v6183_v45 }
 0x38e   :  { %v5813_v49 = vadd.f32 %v3426_v38, %v2269_v11  ;;  %v3428_v20 = vpop.f32.mrb[3].mxu1  ;;  %v4064_v35 = vmax.f32 %v5811_v61, 0.0  ;;  %v6184_v11 = vld [vmem:[%s8205_s4 + $0x20] sm:$0xff]   ;;  %v2275_v61 = vld [vmem:[#allocation2 + $0x48] sm:$0xff] }
 0x38f   :  { %v5814_v15 = vadd.f32 %v3428_v20, %v2270_v24  ;;  %v4065_v2 = vmax.f32 %v5812_v62, 0.0  ;;  %v2273_v24 = vld [vmem:[#allocation2 + $0x38] sm:$0xff]  ;;  %5553 = vmatpush3.bf16.msra.mxu0 %v6184_v11 }
 0x390   :  { %v4067_v12 = vmax.f32 %v5813_v49, 0.0  ;;  %3863 = vmatmul.mubr.bf16.gmra.mrb[108].mxu1 %v7567_v3 }
 0x391   :  { %v4068_v31 = vmax.f32 %v5814_v15, 0.0  ;;  %3870 = vmatprep.mubr.bf16.mxu1 %v7686_v55  ;;  %v6185_v55 = vld [vmem:[%s8205_s4 + $0x68] sm:$0xff]  }
 0x392   :  { %v4160_v38 = vmax.f32 %v4064_v35, %v4067_v12  ;;  %v6186_v35 = vld [vmem:[%s8205_s4 + $0x28] sm:$0xff]   ;;  %5554 = vmatprep.subr.bf16.mxu0 %v6185_v55  ;;  %v2281_v55 = vld [vmem:[#allocation2 + $0x78] sm:$0xff] }
 0x393   :  { %v4167_v20 = vmax.f32 %v4065_v2, %v4068_v31  ;;  %v3432_v49 = vpop.f32.mrb[4].mxu1  ;;  %5555 = vmatpush3.bf16.msra.mxu0 %v6186_v35 }
 0x394   :  { %v4161_v3 = vrot.slane %v4160_v38, 4  ;;  %v5815_v4 = vadd.f32 %v3432_v49, %v2272_v39  ;;  %v3434_v33 = vpop.f32.mrb[5].mxu1 }
 0x395   :  { %v4168_v62 = vrot.slane %v4167_v20, 4  ;;  %v5816_v15 = vadd.f32 %v3434_v33, %v2273_v24  ;;  %v3436_v59 = vpop.f32.mrb[6].mxu1  ;;  %v6187_v24 = vld [vmem:[%s8205_s4 + $0x70] sm:$0xff]  }
 0x396   :  { %v4162_v12 = vmax.f32 %v4160_v38, %v4161_v3  ;;  %v5817_v45 = vadd.f32 %v3436_v59, %v2275_v61  ;;  %v3438_v2 = vpop.f32.mrb[7].mxu1  ;;  %v4070_v49 = vmax.f32 %v5815_v4, 0.0  ;;  %v2278_v59 = vld [vmem:[#allocation2 + $0x60] sm:$0xff]  ;;  %v2279_v61 = vld [vmem:[#allocation2 + $0x68] sm:$0xff]  ;;  %5556 = vmatprep.subr.bf16.mxu0 %v6187_v24 }
 0x397   :  { %v4169_v31 = vmax.f32 %v4167_v20, %v4168_v62  ;;  %v5818_v11 = vadd.f32 %v3438_v2, %v2276_v1  ;;  %v4071_v54 = vmax.f32 %v5816_v15, 0.0  ;;  %v6188_v1 = vld [vmem:[%s8205_s4 + $0x30] sm:$0xff]  }
 0x398   :  { %v4163_v39 = vrot.slane %v4162_v12, 2  ;;  %v4073_v13 = vmax.f32 %v5817_v45, 0.0  ;;  %3871 = vmatmul.mubr.bf16.gmra.mrb[112].mxu1 %v7577_v17  ;;  %5557 = vmatpush3.bf16.msra.mxu0 %v6188_v1  ;;  %v2282_v45 = vld [vmem:[#allocation2 + $0x80] sm:$0xff] }
 0x399   :  { %v4170_v33 = vrot.slane %v4169_v31, 2  ;;  %v4074_v10 = vmax.f32 %v5818_v11, 0.0  ;;  %3878 = vmatprep.mubr.bf16.mxu1 %v7684_v34  ;;  %v6189_v34 = vld [vmem:[%s8205_s4 + $0x78] sm:$0xff]  }
 0x39a   :  { %v4164_v38 = vmax.f32 %v4162_v12, %v4163_v39  ;;  %v4181_v20 = vmax.f32 %v4070_v49, %v4073_v13  ;;  %v6190_v13 = vld [vmem:[%s8205_s4 + $0x38] sm:$0xff]   ;;  %5558 = vmatprep.subr.bf16.mxu0 %v6189_v34 }
 0x39b   :  { %v4171_v3 = vmax.f32 %v4169_v31, %v4170_v33  ;;  %v4188_v17 = vmax.f32 %v4071_v54, %v4074_v10  ;;  %v3442_v4 = vpop.f32.mrb[8].mxu1  ;;  %v2285_v34 = vld [vmem:[#allocation2 + $0x98] sm:$0xff] }
 0x39c   :  { %v4182_v62 = vrot.slane %v4181_v20, 4  ;;  %v5819_v35 = vadd.f32 %v3442_v4, %v2278_v59  ;;  %v3444_v15 = vpop.f32.mrb[9].mxu1  ;;  %v4165_v12 = vrot.slane %v4164_v38, 1  ;;  %5559 = vmatpush3.bf16.msra.mxu0 %v6190_v13 }
 0x39d   :  { %v4189_v2 = vrot.slane %v4188_v17, 4  ;;  %v5820_v11 = vadd.f32 %v3444_v15, %v2279_v61  ;;  %v3446_v6 = vpop.f32.mrb[10].mxu1  ;;  %v4172_v39 = vrot.slane %v4171_v3, 1  ;;  %v8249_v61 = vmov 0.0  }
 0x39e   :  { %v4183_v10 = vmax.f32 %v4181_v20, %v4182_v62  ;;  %v5821_v54 = vadd.f32 %v3446_v6, %v2281_v55  ;;  %v3448_v31 = vpop.f32.mrb[11].mxu1  ;;  %v4076_v59 = vmax.f32 %v5819_v35, 0.0  ;;  %5791 = vmatprep.subr.bf16.mxu0 %v8249_v61  ;;  %v2284_v20 = vld [vmem:[#allocation2 + $0x90] sm:$0xff]  ;;  %v4166_v6 = vmax.f32 %v4164_v38, %v4165_v12  ;;  %v2287_v35 = vld [vmem:[#allocation2 + $0xa8] sm:$0xff] }
 0x39f   :  { %v4190_v49 = vmax.f32 %v4188_v17, %v4189_v2  ;;  %v5822_v24 = vadd.f32 %v3448_v31, %v2282_v45  ;;  %v4077_v15 = vmax.f32 %v5820_v11, 0.0  ;;  %v4173_v17 = vmax.f32 %v4171_v3, %v4172_v39 }
 0x3a0   :  { %v4184_v33 = vrot.slane %v4183_v10, 2  ;;  %v4079_v1 = vmax.f32 %v5821_v54, 0.0  ;;  %3879 = vmatmul.mubr.bf16.gmra.mrb[116].mxu1 %v7575_v8  ;;  %v4496_v18 = vpack.c.bf16 %v4166_v6, %v4166_v6  ;;  %v2290_v6 = vld [vmem:[#allocation2 + $0xc0] sm:$0xff] }
 0x3a1   :  { %v4191_v4 = vrot.slane %v4190_v49, 2  ;;  %v4080_v16 = vmax.f32 %v5822_v24, 0.0  ;;  %3886 = vmatprep.mubr.bf16.mxu1 %v7692_v56  ;;  %v4497_v3 = vpack.c.bf16 %v4173_v17, %v4173_v17 }
 0x3a2   :  { %v4185_v55 = vmax.f32 %v4183_v10, %v4184_v33  ;;  %v4202_v62 = vmax.f32 %v4076_v59, %v4079_v1 }
 0x3a3   :  { %v4192_v45 = vmax.f32 %v4190_v49, %v4191_v4  ;;  %v4209_v2 = vmax.f32 %v4077_v15, %v4080_v16  ;;  %v3452_v13 = vpop.f32.mrb[12].mxu1 }
 0x3a4   :  { %v4186_v54 = vrot.slane %v4185_v55, 1  ;;  %v4203_v31 = vrot.slane %v4202_v62, 4  ;;  %v5823_v8 = vadd.f32 %v3452_v13, %v2284_v20  ;;  %v3454_v50 = vpop.f32.mrb[13].mxu1 }
 0x3a5   :  { %v4193_v11 = vrot.slane %v4192_v45, 1  ;;  %v4210_v24 = vrot.slane %v4209_v2, 4  ;;  %v5824_v46 = vadd.f32 %v3454_v50, %v2285_v34  ;;  %v3456_v56 = vpop.f32.mrb[14].mxu1 }
 0x3a6   :  { %v4187_v38 = vmax.f32 %v4185_v55, %v4186_v54  ;;  %v4204_v12 = vmax.f32 %v4202_v62, %v4203_v31  ;;  %v5825_v10 = vadd.f32 %v3456_v56, %v2287_v35  ;;  %v3458_v33 = vpop.f32.mrb[15].mxu1  ;;  %v4082_v4 = vmax.f32 %v5823_v8, 0.0  ;;  %v2293_v8 = vld [vmem:[#allocation2 + $0xd8] sm:$0xff] }
 0x3a7   :  { %v4194_v39 = vmax.f32 %v4192_v45, %v4193_v11  ;;  %v4211_v16 = vmax.f32 %v4209_v2, %v4210_v24  ;;  %v5826_v49 = vadd.f32 %v3458_v33, %v2288_v57  ;;  %v4083_v63 = vmax.f32 %v5824_v46, 0.0  ;;  %v2291_v45 = vld [vmem:[#allocation2 + $0xc8] sm:$0xff] }
 0x3a8   :  { %v4499_v59 = vpack.c.bf16 %v4187_v38, %v4187_v38  ;;  %v4205_v1 = vrot.slane %v4204_v12, 2  ;;  %v4085_v15 = vmax.f32 %v5825_v10, 0.0  ;;  %3887 = vmatmul.mubr.bf16.gmra.mrb[120].mxu1 %v7585_v9  ;;  %v4647_v55 = vunpack.c.l.b16 %v4496_v18  ;;  %v2294_v38 = vld [vmem:[#allocation2 + $0xe0] sm:$0xff] }
 0x3a9   :  { %v4500_v20 = vpack.c.bf16 %v4194_v39, %v4194_v39  ;;  %v4212_v13 = vrot.slane %v4211_v16, 2  ;;  %v4086_v50 = vmax.f32 %v5826_v49, 0.0  ;;  %3894 = vmatprep.mubr.bf16.mxu1 %v7690_v47  ;;  %v4648_v2 = vunpack.c.l.b16 %v4497_v3 }
 0x3aa   :  { %v4650_v62 = vunpack.c.l.b16 %v4499_v59  ;;  %v4206_v34 = vmax.f32 %v4204_v12, %v4205_v1  ;;  %v4223_v17 = vmax.f32 %v4082_v4, %v4085_v15 }
 0x3ab   :  { %v4651_v57 = vunpack.c.l.b16 %v4500_v20  ;;  %v4213_v35 = vmax.f32 %v4211_v16, %v4212_v13  ;;  %v4230_v54 = vmax.f32 %v4083_v63, %v4086_v50  ;;  %v3462_v31 = vpop.f32.mrb[16].mxu1 }
 0x3ac   :  { %v4696_v9 = vsel %vm4695_vm4, %v4650_v62, %v4647_v55  ;;  %v4207_v11 = vrot.slane %v4206_v34, 1  ;;  %v4224_v24 = vrot.slane %v4223_v17, 4  ;;  %v5827_v46 = vadd.f32 %v3462_v31, %v2290_v6  ;;  %v3464_v56 = vpop.f32.mrb[17].mxu1 }
 0x3ad   :  { %v4709_v47 = vsel %vm4695_vm4, %v4651_v57, %v4648_v2  ;;  %v4214_v18 = vrot.slane %v4213_v35, 1  ;;  %v4231_v10 = vrot.slane %v4230_v54, 4  ;;  %v5828_v12 = vadd.f32 %v3464_v56, %v2291_v45  ;;  %v3466_v33 = vpop.f32.mrb[18].mxu1  ;;  %v2296_v45 = vld [vmem:[#allocation2 + $0xf0] sm:$0xff]  ;;  %v2297_v57 = vld [vmem:[#allocation2 + $0xf8] sm:$0xff] }
 0x3ae   :  { %v4208_v39 = vmax.f32 %v4206_v34, %v4207_v11  ;;  %v4225_v3 = vmax.f32 %v4223_v17, %v4224_v24  ;;  %v5829_v49 = vadd.f32 %v3466_v33, %v2293_v8  ;;  %v3468_v16 = vpop.f32.mrb[19].mxu1  ;;  %v4088_v20 = vmax.f32 %v5827_v46, 0.0  ;;  %v2299_v11 = vld [vmem:[#allocation2 + $0x108] sm:$0xff] }
 0x3af   :  { %v4215_v63 = vmax.f32 %v4213_v35, %v4214_v18  ;;  %v4232_v59 = vmax.f32 %v4230_v54, %v4231_v10  ;;  %v5830_v1 = vadd.f32 %v3468_v16, %v2294_v38  ;;  %v4089_v55 = vmax.f32 %v5828_v12, 0.0  ;;  %v2300_v18 = vld [vmem:[#allocation2 + $0x110] sm:$0xff] }
 0x3b0   :  { %v4502_v4 = vpack.c.bf16 %v4208_v39, %v4208_v39  ;;  %v4226_v15 = vrot.slane %v4225_v3, 2  ;;  %v4091_v13 = vmax.f32 %v5829_v49, 0.0  ;;  %3895 = vmatmul.mubr.bf16.gmra.mrb[124].mxu1 %v7583_v19 }
 0x3b1   :  { %v4503_v50 = vpack.c.bf16 %v4215_v63, %v4215_v63  ;;  %v4233_v6 = vrot.slane %v4232_v59, 2  ;;  %v4092_v62 = vmax.f32 %v5830_v1, 0.0 }
 0x3b2   :  { %v4653_v2 = vunpack.c.l.b16 %v4502_v4  ;;  %v4227_v34 = vmax.f32 %v4225_v3, %v4226_v15  ;;  %v4244_v17 = vmax.f32 %v4088_v20, %v4091_v13 }
 0x3b3   :  { %v4654_v31 = vunpack.c.l.b16 %v4503_v50  ;;  %v4234_v8 = vmax.f32 %v4232_v59, %v4233_v6  ;;  %v4251_v35 = vmax.f32 %v4089_v55, %v4092_v62  ;;  %v3472_v54 = vpop.f32.mrb[20].mxu1 }
 0x3b4   :  { %v4698_v24 = vsel %vm4697_vm11, %v4653_v2, %v4696_v9  ;;  %v4228_v46 = vrot.slane %v4227_v34, 1  ;;  %v4245_v56 = vrot.slane %v4244_v17, 4  ;;  %v5831_v38 = vadd.f32 %v3472_v54, %v2296_v45  ;;  %v3474_v19 = vpop.f32.mrb[21].mxu1  ;;  %v2302_v45 = vld [vmem:[#allocation2 + $0x120] sm:$0xff] }
 0x3b5   :  { %v4710_v10 = vsel %vm4697_vm11, %v4654_v31, %v4709_v47  ;;  %v4235_v12 = vrot.slane %v4234_v8, 1  ;;  %v4252_v33 = vrot.slane %v4251_v35, 4  ;;  %v5832_v39 = vadd.f32 %v3474_v19, %v2297_v57  ;;  %v3476_v3 = vpop.f32.mrb[22].mxu1 }
 0x3b6   :  { %v4229_v49 = vmax.f32 %v4227_v34, %v4228_v46  ;;  %v4246_v16 = vmax.f32 %v4244_v17, %v4245_v56  ;;  %v5833_v63 = vadd.f32 %v3476_v3, %v2299_v11  ;;  %v3478_v59 = vpop.f32.mrb[23].mxu1  ;;  %v4094_v13 = vmax.f32 %v5831_v38, 0.0  ;;  %v2303_v34 = vld [vmem:[#allocation2 + $0x128] sm:$0xff] }
 0x3b7   :  { %v4236_v1 = vmax.f32 %v4234_v8, %v4235_v12  ;;  %v4253_v4 = vmax.f32 %v4251_v35, %v4252_v33  ;;  %v5834_v15 = vadd.f32 %v3478_v59, %v2300_v18  ;;  %v4095_v62 = vmax.f32 %v5832_v39, 0.0  ;;  %v2305_v8 = vld [vmem:[#allocation2 + $0x138] sm:$0xff]  ;;  %v2306_v12 = vld [vmem:[#allocation2 + $0x140] sm:$0xff] }
 0x3b8   :  { %v4505_v9 = vpack.c.bf16 %v4229_v49, %v4229_v49  ;;  %v4247_v20 = vrot.slane %v4246_v16, 2  ;;  %v4097_v50 = vmax.f32 %v5833_v63, 0.0 }
 0x3b9   :  { %v4506_v6 = vpack.c.bf16 %v4236_v1, %v4236_v1  ;;  %v4254_v55 = vrot.slane %v4253_v4, 2  ;;  %v4098_v47 = vmax.f32 %v5834_v15, 0.0 }
 0x3ba   :  { %v4656_v2 = vunpack.c.l.b16 %v4505_v9  ;;  %v4248_v57 = vmax.f32 %v4246_v16, %v4247_v20  ;;  %v4265_v31 = vmax.f32 %v4094_v13, %v4097_v50 }
 0x3bb   :  { %v4657_v17 = vunpack.c.l.b16 %v4506_v6  ;;  %v4255_v54 = vmax.f32 %v4253_v4, %v4254_v55  ;;  %v4272_v11 = vmax.f32 %v4095_v62, %v4098_v47  ;;  %v3482_v46 = vpop.f32.mrb[24].mxu1 }
 0x3bc   :  { %v4700_v35 = vsel %vm4699_vm12, %v4656_v2, %v4698_v24  ;;  %v4249_v56 = vrot.slane %v4248_v57, 1  ;;  %v4266_v19 = vrot.slane %v4265_v31, 4  ;;  %v5835_v38 = vadd.f32 %v3482_v46, %v2302_v45  ;;  %v3484_v18 = vpop.f32.mrb[25].mxu1  ;;  %v2308_v2 = vld [vmem:[#allocation2 + $0x150] sm:$0xff] }
 0x3bd   :  { %v4256_v33 = vrot.slane %v4255_v54, 1  ;;  %v4273_v39 = vrot.slane %v4272_v11, 4  ;;  %v5836_v3 = vadd.f32 %v3484_v18, %v2303_v34  ;;  %v3486_v49 = vpop.f32.mrb[26].mxu1  ;;  %v4711_v16 = vsel %vm4699_vm12, %v4657_v17, %v4710_v10 }
 0x3be   :  { %v4250_v63 = vmax.f32 %v4248_v57, %v4249_v56  ;;  %v4267_v59 = vmax.f32 %v4265_v31, %v4266_v19  ;;  %v5837_v1 = vadd.f32 %v3486_v49, %v2305_v8  ;;  %v3488_v4 = vpop.f32.mrb[27].mxu1  ;;  %v4100_v50 = vmax.f32 %v5835_v38, 0.0  ;;  %v2309_v57 = vld [vmem:[#allocation2 + $0x158] sm:$0xff] }
 0x3bf   :  { %v4257_v15 = vmax.f32 %v4255_v54, %v4256_v33  ;;  %v4274_v9 = vmax.f32 %v4272_v11, %v4273_v39  ;;  %v5838_v20 = vadd.f32 %v3488_v4, %v2306_v12  ;;  %v4101_v47 = vmax.f32 %v5836_v3, 0.0  ;;  %v2311_v54 = vld [vmem:[#allocation2 + $0x168] sm:$0xff]  ;;  %v2312_v33 = vld [vmem:[#allocation2 + $0x170] sm:$0xff] }
 0x3c0   :  { %v4508_v24 = vpack.c.bf16 %v4250_v63, %v4250_v63  ;;  %v4268_v13 = vrot.slane %v4267_v59, 2  ;;  %v4103_v6 = vmax.f32 %v5837_v1, 0.0 }
 0x3c1   :  { %v4509_v55 = vpack.c.bf16 %v4257_v15, %v4257_v15  ;;  %v4275_v62 = vrot.slane %v4274_v9, 2  ;;  %v4104_v45 = vmax.f32 %v5838_v20, 0.0 }
 0x3c2   :  { %v4659_v34 = vunpack.c.l.b16 %v4508_v24  ;;  %v4269_v46 = vmax.f32 %v4267_v59, %v4268_v13  ;;  %v4286_v10 = vmax.f32 %v4100_v50, %v4103_v6 }
 0x3c3   :  { %v4660_v31 = vunpack.c.l.b16 %v4509_v55  ;;  %v4276_v17 = vmax.f32 %v4274_v9, %v4275_v62  ;;  %v4293_v8 = vmax.f32 %v4101_v47, %v4104_v45  ;;  %v3492_v56 = vpop.f32.mrb[28].mxu1 }
 0x3c4   :  { %v4702_v11 = vsel %vm4701_vm13, %v4659_v34, %v4700_v35  ;;  %v4270_v19 = vrot.slane %v4269_v46, 1  ;;  %v4287_v18 = vrot.slane %v4286_v10, 4  ;;  %v5839_v38 = vadd.f32 %v3492_v56, %v2308_v2  ;;  %v3494_v12 = vpop.f32.mrb[29].mxu1  ;;  %v2314_v34 = vld [vmem:[#allocation2 + $0x180] sm:$0xff] }
 0x3c5   :  { %v4277_v39 = vrot.slane %v4276_v17, 1  ;;  %v4294_v3 = vrot.slane %v4293_v8, 4  ;;  %v5840_v49 = vadd.f32 %v3494_v12, %v2309_v57  ;;  %v3496_v63 = vpop.f32.mrb[30].mxu1  ;;  %v4712_v59 = vsel %vm4701_vm13, %v4660_v31, %v4711_v16 }
 0x3c6   :  { %v4271_v1 = vmax.f32 %v4269_v46, %v4270_v19  ;;  %v4288_v4 = vmax.f32 %v4286_v10, %v4287_v18  ;;  %v5841_v15 = vadd.f32 %v3496_v63, %v2311_v54  ;;  %v3498_v9 = vpop.f32.mrb[31].mxu1  ;;  %v4106_v6 = vmax.f32 %v5839_v38, 0.0  ;;  %v2315_v46 = vld [vmem:[#allocation2 + $0x188] sm:$0xff] }
 0x3c7   :  { %v4278_v20 = vmax.f32 %v4276_v17, %v4277_v39  ;;  %v4295_v24 = vmax.f32 %v4293_v8, %v4294_v3  ;;  %v5842_v13 = vadd.f32 %v3498_v9, %v2312_v33  ;;  %v4107_v45 = vmax.f32 %v5840_v49, 0.0  ;;  %v2317_v17 = vld [vmem:[#allocation2 + $0x198] sm:$0xff]  ;;  %v2318_v39 = vld [vmem:[#allocation2 + $0x1a0] sm:$0xff] }
 0x3c8   :  { %v4511_v35 = vpack.c.bf16 %v4271_v1, %v4271_v1  ;;  %v4289_v50 = vrot.slane %v4288_v4, 2  ;;  %v4109_v55 = vmax.f32 %v5841_v15, 0.0 }
 0x3c9   :  { %v4512_v62 = vpack.c.bf16 %v4278_v20, %v4278_v20  ;;  %v4296_v47 = vrot.slane %v4295_v24, 2  ;;  %v4110_v2 = vmax.f32 %v5842_v13, 0.0 }
 0x3ca   :  { %v4662_v57 = vunpack.c.l.b16 %v4511_v35  ;;  %v4290_v56 = vmax.f32 %v4288_v4, %v4289_v50  ;;  %v4307_v16 = vmax.f32 %v4106_v6, %v4109_v55 }
 0x3cb   :  { %v4663_v10 = vunpack.c.l.b16 %v4512_v62  ;;  %v4297_v31 = vmax.f32 %v4295_v24, %v4296_v47  ;;  %v4314_v54 = vmax.f32 %v4107_v45, %v4110_v2  ;;  %v3502_v19 = vpop.f32.mrb[32].mxu1 }
 0x3cc   :  { %v4704_v8 = vsel %vm4703_vm14, %v4662_v57, %v4702_v11  ;;  %v4291_v18 = vrot.slane %v4290_v56, 1  ;;  %v4308_v12 = vrot.slane %v4307_v16, 4  ;;  %v5843_v38 = vadd.f32 %v3502_v19, %v2314_v34  ;;  %v3504_v33 = vpop.f32.mrb[33].mxu1  ;;  %v2320_v57 = vld [vmem:[#allocation2 + $0x1b0] sm:$0xff] }
 0x3cd   :  { %v4298_v3 = vrot.slane %v4297_v31, 1  ;;  %v4315_v49 = vrot.slane %v4314_v54, 4  ;;  %v5844_v63 = vadd.f32 %v3504_v33, %v2315_v46  ;;  %v3506_v1 = vpop.f32.mrb[34].mxu1  ;;  %v4713_v4 = vsel %vm4703_vm14, %v4663_v10, %v4712_v59 }
 0x3ce   :  { %v4292_v15 = vmax.f32 %v4290_v56, %v4291_v18  ;;  %v4309_v9 = vmax.f32 %v4307_v16, %v4308_v12  ;;  %v5845_v20 = vadd.f32 %v3506_v1, %v2317_v17  ;;  %v3508_v24 = vpop.f32.mrb[35].mxu1  ;;  %v4112_v55 = vmax.f32 %v5843_v38, 0.0  ;;  %v2321_v56 = vld [vmem:[#allocation2 + $0x1b8] sm:$0xff] }
 0x3cf   :  { %v4299_v13 = vmax.f32 %v4297_v31, %v4298_v3  ;;  %v4316_v35 = vmax.f32 %v4314_v54, %v4315_v49  ;;  %v5846_v50 = vadd.f32 %v3508_v24, %v2318_v39  ;;  %v4113_v2 = vmax.f32 %v5844_v63, 0.0  ;;  %v2323_v31 = vld [vmem:[#allocation2 + $0x1c8] sm:$0xff]  ;;  %v2324_v3 = vld [vmem:[#allocation2 + $0x1d0] sm:$0xff] }
 0x3d0   :  { %v4514_v11 = vpack.c.bf16 %v4292_v15, %v4292_v15  ;;  %v4310_v6 = vrot.slane %v4309_v9, 2  ;;  %v4115_v62 = vmax.f32 %v5845_v20, 0.0 }
 0x3d1   :  { %v4515_v47 = vpack.c.bf16 %v4299_v13, %v4299_v13  ;;  %v4317_v45 = vrot.slane %v4316_v35, 2  ;;  %v4116_v34 = vmax.f32 %v5846_v50, 0.0 }
 0x3d2   :  { %v4665_v46 = vunpack.c.l.b16 %v4514_v11  ;;  %v4311_v19 = vmax.f32 %v4309_v9, %v4310_v6  ;;  %v4328_v59 = vmax.f32 %v4112_v55, %v4115_v62 }
 0x3d3   :  { %v4666_v16 = vunpack.c.l.b16 %v4515_v47  ;;  %v4318_v10 = vmax.f32 %v4316_v35, %v4317_v45  ;;  %v4335_v17 = vmax.f32 %v4113_v2, %v4116_v34  ;;  %v3512_v18 = vpop.f32.mrb[36].mxu1 }
 0x3d4   :  { %v4706_v54 = vsel %vm4705_vm15, %v4665_v46, %v4704_v8  ;;  %v4312_v12 = vrot.slane %v4311_v19, 1  ;;  %v4329_v33 = vrot.slane %v4328_v59, 4  ;;  %v5847_v38 = vadd.f32 %v3512_v18, %v2320_v57  ;;  %v3514_v39 = vpop.f32.mrb[37].mxu1  ;;  %v2326_v46 = vld [vmem:[#allocation2 + $0x1e0] sm:$0xff] }
 0x3d5   :  { %v4319_v49 = vrot.slane %v4318_v10, 1  ;;  %v4336_v63 = vrot.slane %v4335_v17, 4  ;;  %v5848_v1 = vadd.f32 %v3514_v39, %v2321_v56  ;;  %v3516_v15 = vpop.f32.mrb[38].mxu1  ;;  %v4714_v9 = vsel %vm4705_vm15, %v4666_v16, %v4713_v4 }
 0x3d6   :  { %v4313_v20 = vmax.f32 %v4311_v19, %v4312_v12  ;;  %v4330_v24 = vmax.f32 %v4328_v59, %v4329_v33  ;;  %v5849_v13 = vadd.f32 %v3516_v15, %v2323_v31  ;;  %v3518_v35 = vpop.f32.mrb[39].mxu1  ;;  %v4118_v62 = vmax.f32 %v5847_v38, 0.0  ;;  %v2327_v19 = vld [vmem:[#allocation2 + $0x1e8] sm:$0xff] }
 0x3d7   :  { %v4320_v50 = vmax.f32 %v4318_v10, %v4319_v49  ;;  %v4337_v11 = vmax.f32 %v4335_v17, %v4336_v63  ;;  %v5850_v6 = vadd.f32 %v3518_v35, %v2324_v3  ;;  %v4119_v34 = vmax.f32 %v5848_v1, 0.0  ;;  %v2329_v10 = vld [vmem:[#allocation2 + $0x1f8] sm:$0xff]  ;;  %v2330_v3 = vld [vmem:[#allocation2 + $0x200] sm:$0xff] }
 0x3d8   :  { %v4517_v8 = vpack.c.bf16 %v4313_v20, %v4313_v20  ;;  %v4331_v55 = vrot.slane %v4330_v24, 2  ;;  %v4121_v47 = vmax.f32 %v5849_v13, 0.0 }
 0x3d9   :  { %v4518_v45 = vpack.c.bf16 %v4320_v50, %v4320_v50  ;;  %v4338_v2 = vrot.slane %v4337_v11, 2  ;;  %v4122_v57 = vmax.f32 %v5850_v6, 0.0 }
 0x3da   :  { %v4668_v56 = vunpack.c.l.b16 %v4517_v8  ;;  %v4332_v18 = vmax.f32 %v4330_v24, %v4331_v55  ;;  %v4349_v4 = vmax.f32 %v4118_v62, %v4121_v47 }
 0x3db   :  { %v4339_v59 = vmax.f32 %v4337_v11, %v4338_v2  ;;  %v4356_v16 = vmax.f32 %v4119_v34, %v4122_v57  ;;  %v3522_v31 = vpop.f32.mrb[40].mxu1  ;;  %v4669_v17 = vunpack.c.l.b16 %v4518_v45  ;;  %v2332_v2 = vld [vmem:[#allocation2 + $0x210] sm:$0xff] }
 0x3dc   :  { %v4350_v12 = vrot.slane %v4349_v4, 4  ;;  %v5851_v33 = vadd.f32 %v3522_v31, %v2326_v46  ;;  %v3524_v39 = vpop.f32.mrb[41].mxu1  ;;  %v8058_v38 = vsel %vm4707_vm0, %v4668_v56, %v4706_v54  ;;  %v4333_v20 = vrot.slane %v4332_v18, 1  ;;  %v2333_v56 = vld [vmem:[#allocation2 + $0x218] sm:$0xff] }
 0x3dd   :  { %v4357_v49 = vrot.slane %v4356_v16, 4  ;;  %v5852_v63 = vadd.f32 %v3524_v39, %v2327_v19  ;;  %v3526_v1 = vpop.f32.mrb[42].mxu1  ;;  %v8061_v15 = vsel %vm4707_vm0, %v4669_v17, %v4714_v9  ;;  %v4340_v50 = vrot.slane %v4339_v59, 1 }
 0x3de   :  { %v4351_v24 = vmax.f32 %v4349_v4, %v4350_v12  ;;  %v5853_v13 = vadd.f32 %v3526_v1, %v2329_v10  ;;  %v3528_v35 = vpop.f32.mrb[43].mxu1  ;;  %v4124_v55 = vmax.f32 %v5851_v33, 0.0  ;;  %v4334_v34 = vmax.f32 %v4332_v18, %v4333_v20  ;;  %v2335_v10 = vld [vmem:[#allocation2 + $0x228] sm:$0xff] }
 0x3df   :  { %v4358_v11 = vmax.f32 %v4356_v16, %v4357_v49  ;;  %v5854_v6 = vadd.f32 %v3528_v35, %v2330_v3  ;;  %v4125_v45 = vmax.f32 %v5852_v63, 0.0  ;;  %v4341_v9 = vmax.f32 %v4339_v59, %v4340_v50  ;;  %v2336_v3 = vld [vmem:[#allocation2 + $0x230] sm:$0xff] }
 0x3e0   :  { %v4352_v8 = vrot.slane %v4351_v24, 2  ;;  %v4127_v62 = vmax.f32 %v5853_v13, 0.0  ;;  %v4520_v13 = vpack.c.bf16 %v4334_v34, %v4334_v34 }
 0x3e1   :  { %v4359_v47 = vrot.slane %v4358_v11, 2  ;;  %v4128_v54 = vmax.f32 %v5854_v6, 0.0  ;;  %v4521_v6 = vpack.c.bf16 %v4341_v9, %v4341_v9 }
 0x3e2   :  { %v4353_v57 = vmax.f32 %v4351_v24, %v4352_v8  ;;  %v4370_v46 = vmax.f32 %v4124_v55, %v4127_v62 }
 0x3e3   :  { %v4360_v19 = vmax.f32 %v4358_v11, %v4359_v47  ;;  %v4377_v31 = vmax.f32 %v4125_v45, %v4128_v54  ;;  %v3532_v4 = vpop.f32.mrb[44].mxu1 }
 0x3e4   :  { %v4354_v17 = vrot.slane %v4353_v57, 1  ;;  %v4371_v12 = vrot.slane %v4370_v46, 4  ;;  %v5855_v16 = vadd.f32 %v3532_v4, %v2332_v2  ;;  %v3534_v39 = vpop.f32.mrb[45].mxu1 }
 0x3e5   :  { %v4361_v33 = vrot.slane %v4360_v19, 1  ;;  %v4378_v49 = vrot.slane %v4377_v31, 4  ;;  %v5856_v1 = vadd.f32 %v3534_v39, %v2333_v56  ;;  %v3536_v63 = vpop.f32.mrb[46].mxu1  ;;  %v4671_v56 = vunpack.c.l.b16 %v4520_v13 }
 0x3e6   :  { %v4355_v35 = vmax.f32 %v4353_v57, %v4354_v17  ;;  %v4372_v18 = vmax.f32 %v4370_v46, %v4371_v12  ;;  %v5857_v20 = vadd.f32 %v3536_v63, %v2335_v10  ;;  %v3538_v24 = vpop.f32.mrb[47].mxu1  ;;  %v4130_v62 = vmax.f32 %v5855_v16, 0.0  ;;  %v2339_v46 = vld [vmem:[#allocation2 + $0x248] sm:$0xff]  ;;  %v2341_v12 = vld [vmem:[#allocation2 + $0x258] sm:$0xff] }
 0x3e7   :  { %v4362_v59 = vmax.f32 %v4360_v19, %v4361_v33  ;;  %v4379_v50 = vmax.f32 %v4377_v31, %v4378_v49  ;;  %v5858_v11 = vadd.f32 %v3538_v24, %v2336_v3  ;;  %v4131_v2 = vmax.f32 %v5856_v1, 0.0  ;;  %v2342_v1 = vld [vmem:[#allocation2 + $0x260] sm:$0xff] }
 0x3e8   :  { %v4523_v8 = vpack.c.bf16 %v4355_v35, %v4355_v35  ;;  %v4373_v55 = vrot.slane %v4372_v18, 2  ;;  %v4133_v47 = vmax.f32 %v5857_v20, 0.0  ;;  %v4672_v10 = vunpack.c.l.b16 %v4521_v6 }
 0x3e9   :  { %v4524_v45 = vpack.c.bf16 %v4362_v59, %v4362_v59  ;;  %v4380_v54 = vrot.slane %v4379_v50, 2  ;;  %v4134_v4 = vmax.f32 %v5858_v11, 0.0 }
 0x3ea   :  { %v4674_v39 = vunpack.c.l.b16 %v4523_v8  ;;  %v4374_v34 = vmax.f32 %v4372_v18, %v4373_v55  ;;  %v4391_v57 = vmax.f32 %v4130_v62, %v4133_v47 }
 0x3eb   :  { %v4675_v17 = vunpack.c.l.b16 %v4524_v45  ;;  %v4381_v9 = vmax.f32 %v4379_v50, %v4380_v54  ;;  %v4398_v19 = vmax.f32 %v4131_v2, %v4134_v4  ;;  %v3542_v31 = vpop.f32.mrb[48].mxu1 }
 0x3ec   :  { %v4723_v3 = vsel %vm4695_vm4, %v4674_v39, %v4671_v56  ;;  %v4375_v16 = vrot.slane %v4374_v34, 1  ;;  %v4392_v33 = vrot.slane %v4391_v57, 4  ;;  %v5859_v49 = vadd.f32 %v3542_v31, %v2338_v52  ;;  %v3544_v63 = vpop.f32.mrb[49].mxu1 }
 0x3ed   :  { %v4730_v35 = vsel %vm4695_vm4, %v4675_v17, %v4672_v10  ;;  %v4382_v13 = vrot.slane %v4381_v9, 1  ;;  %v4399_v20 = vrot.slane %v4398_v19, 4  ;;  %v5860_v18 = vadd.f32 %v3544_v63, %v2339_v46  ;;  %v3546_v24 = vpop.f32.mrb[50].mxu1  ;;  %v2344_v10 = vld [vmem:[#allocation2 + $0x270] sm:$0xff]  ;;  %v2345_v63 = vld [vmem:[#allocation2 + $0x278] sm:$0xff] }
 0x3ee   :  { %v4376_v59 = vmax.f32 %v4374_v34, %v4375_v16  ;;  %v4393_v6 = vmax.f32 %v4391_v57, %v4392_v33  ;;  %v5861_v11 = vadd.f32 %v3546_v24, %v2341_v12  ;;  %v3548_v50 = vpop.f32.mrb[51].mxu1  ;;  %v4136_v54 = vmax.f32 %v5859_v49, 0.0 }
 0x3ef   :  { %v4383_v8 = vmax.f32 %v4381_v9, %v4382_v13  ;;  %v4400_v55 = vmax.f32 %v4398_v19, %v4399_v20  ;;  %v5862_v62 = vadd.f32 %v3548_v50, %v2342_v1  ;;  %v4137_v56 = vmax.f32 %v5860_v18, 0.0  ;;  %v2347_v9 = vld [vmem:[#allocation2 + $0x288] sm:$0xff]  ;;  %v2348_v20 = vld [vmem:[#allocation2 + $0x290] sm:$0xff] }
 0x3f0   :  { %v4526_v47 = vpack.c.bf16 %v4376_v59, %v4376_v59  ;;  %v4394_v45 = vrot.slane %v4393_v6, 2  ;;  %v4139_v2 = vmax.f32 %v5861_v11, 0.0 }
 0x3f1   :  { %v4527_v52 = vpack.c.bf16 %v4383_v8, %v4383_v8  ;;  %v4401_v4 = vrot.slane %v4400_v55, 2  ;;  %v4140_v39 = vmax.f32 %v5862_v62, 0.0 }
 0x3f2   :  { %v4677_v17 = vunpack.c.l.b16 %v4526_v47  ;;  %v4395_v31 = vmax.f32 %v4393_v6, %v4394_v45  ;;  %v4412_v46 = vmax.f32 %v4136_v54, %v4139_v2 }
 0x3f3   :  { %v4678_v34 = vunpack.c.l.b16 %v4527_v52  ;;  %v4402_v57 = vmax.f32 %v4400_v55, %v4401_v4  ;;  %v4419_v12 = vmax.f32 %v4137_v56, %v4140_v39  ;;  %v3552_v16 = vpop.f32.mrb[52].mxu1 }
 0x3f4   :  { %v4724_v19 = vsel %vm4697_vm11, %v4677_v17, %v4723_v3  ;;  %v4396_v33 = vrot.slane %v4395_v31, 1  ;;  %v4413_v1 = vrot.slane %v4412_v46, 4  ;;  %v5863_v49 = vadd.f32 %v3552_v16, %v2344_v10  ;;  %v3554_v13 = vpop.f32.mrb[53].mxu1 }
 0x3f5   :  { %v4731_v18 = vsel %vm4697_vm11, %v4678_v34, %v4730_v35  ;;  %v4403_v24 = vrot.slane %v4402_v57, 1  ;;  %v4420_v59 = vrot.slane %v4419_v12, 4  ;;  %v5864_v11 = vadd.f32 %v3554_v13, %v2345_v63  ;;  %v3556_v6 = vpop.f32.mrb[54].mxu1  ;;  %v2350_v35 = vld [vmem:[#allocation2 + $0x2a0] sm:$0xff]  ;;  %v2351_v13 = vld [vmem:[#allocation2 + $0x2a8] sm:$0xff] }
 0x3f6   :  { %v4397_v50 = vmax.f32 %v4395_v31, %v4396_v33  ;;  %v4414_v8 = vmax.f32 %v4412_v46, %v4413_v1  ;;  %v5865_v62 = vadd.f32 %v3556_v6, %v2347_v9  ;;  %v3558_v55 = vpop.f32.mrb[55].mxu1  ;;  %v4142_v52 = vmax.f32 %v5863_v49, 0.0 }
 0x3f7   :  { %v4404_v47 = vmax.f32 %v4402_v57, %v4403_v24  ;;  %v4421_v45 = vmax.f32 %v4419_v12, %v4420_v59  ;;  %v5866_v54 = vadd.f32 %v3558_v55, %v2348_v20  ;;  %v4143_v10 = vmax.f32 %v5864_v11, 0.0  ;;  %v2353_v57 = vld [vmem:[#allocation2 + $0x2b8] sm:$0xff]  ;;  %v2354_v59 = vld [vmem:[#allocation2 + $0x2c0] sm:$0xff] }
 0x3f8   :  { %v4529_v2 = vpack.c.bf16 %v4397_v50, %v4397_v50  ;;  %v4415_v3 = vrot.slane %v4414_v8, 2  ;;  %v4145_v4 = vmax.f32 %v5865_v62, 0.0 }
 0x3f9   :  { %v4530_v56 = vpack.c.bf16 %v4404_v47, %v4404_v47  ;;  %v4422_v39 = vrot.slane %v4421_v45, 2  ;;  %v4146_v17 = vmax.f32 %v5866_v54, 0.0 }
 0x3fa   :  { %v4680_v34 = vunpack.c.l.b16 %v4529_v2  ;;  %v4416_v16 = vmax.f32 %v4414_v8, %v4415_v3  ;;  %v4433_v63 = vmax.f32 %v4142_v52, %v4145_v4 }
 0x3fb   :  { %v4681_v31 = vunpack.c.l.b16 %v4530_v56  ;;  %v4423_v46 = vmax.f32 %v4421_v45, %v4422_v39  ;;  %v4440_v9 = vmax.f32 %v4143_v10, %v4146_v17  ;;  %v3562_v33 = vpop.f32.mrb[56].mxu1 }
 0x3fc   :  { %v4725_v12 = vsel %vm4699_vm12, %v4680_v34, %v4724_v19  ;;  %v4417_v1 = vrot.slane %v4416_v16, 1  ;;  %v4434_v20 = vrot.slane %v4433_v63, 4  ;;  %v5867_v49 = vadd.f32 %v3562_v33, %v2350_v35  ;;  %v3564_v24 = vpop.f32.mrb[57].mxu1  ;;  %v2356_v33 = vld [vmem:[#allocation2 + $0x2d0] sm:$0xff] }
 0x3fd   :  { %v4424_v6 = vrot.slane %v4423_v46, 1  ;;  %v4441_v11 = vrot.slane %v4440_v9, 4  ;;  %v5868_v50 = vadd.f32 %v3564_v24, %v2351_v13  ;;  %v3566_v62 = vpop.f32.mrb[58].mxu1  ;;  %v4732_v8 = vsel %vm4699_vm12, %v4681_v31, %v4731_v18  ;;  %v2357_v18 = vld [vmem:[#allocation2 + $0x2d8] sm:$0xff] }
 0x3fe   :  { %v4418_v55 = vmax.f32 %v4416_v16, %v4417_v1  ;;  %v4435_v47 = vmax.f32 %v4433_v63, %v4434_v20  ;;  %v5869_v54 = vadd.f32 %v3566_v62, %v2353_v57  ;;  %v3568_v45 = vpop.f32.mrb[59].mxu1  ;;  %v4148_v56 = vmax.f32 %v5867_v49, 0.0 }
 0x3ff   :  { %v4425_v2 = vmax.f32 %v4423_v46, %v4424_v6  ;;  %v4442_v3 = vmax.f32 %v4440_v9, %v4441_v11  ;;  %v5870_v52 = vadd.f32 %v3568_v45, %v2354_v59  ;;  %v4149_v35 = vmax.f32 %v5868_v50, 0.0  ;;  %v2359_v46 = vld [vmem:[#allocation2 + $0x2e8] sm:$0xff]  ;;  %v2360_v6 = vld [vmem:[#allocation2 + $0x2f0] sm:$0xff] }
 0x400   :  { %v4532_v4 = vpack.c.bf16 %v4418_v55, %v4418_v55  ;;  %v4436_v19 = vrot.slane %v4435_v47, 2  ;;  %v4151_v39 = vmax.f32 %v5869_v54, 0.0 }
 0x401   :  { %v4533_v10 = vpack.c.bf16 %v4425_v2, %v4425_v2  ;;  %v4443_v17 = vrot.slane %v4442_v3, 2  ;;  %v4152_v34 = vmax.f32 %v5870_v52, 0.0 }
 0x402   :  { %v4683_v13 = vunpack.c.l.b16 %v4532_v4  ;;  %v4437_v24 = vmax.f32 %v4435_v47, %v4436_v19  ;;  %v4454_v43 = vmax.f32 %v4148_v56, %v4151_v39 }
 0x403   :  { %v4684_v16 = vunpack.c.l.b16 %v4533_v10  ;;  %v4444_v63 = vmax.f32 %v4442_v3, %v4443_v17  ;;  %v4461_v31 = vmax.f32 %v4149_v35, %v4152_v34  ;;  %v3572_v57 = vpop.f32.mrb[60].mxu1  ;;  %v2268_v17 = vld [vmem:[#allocation2 + $0x10] sm:$0xff] }
 0x404   :  { %v4726_v9 = vsel %vm4701_vm13, %v4683_v13, %v4725_v12  ;;  %v4438_v1 = vrot.slane %v4437_v24, 1  ;;  %v4455_v20 = vrot.slane %v4454_v43, 4  ;;  %v5871_v49 = vadd.f32 %v3572_v57, %v2356_v33  ;;  %v3574_v59 = vpop.f32.mrb[61].mxu1 }
 0x405   :  { %v4445_v11 = vrot.slane %v4444_v63, 1  ;;  %v4462_v50 = vrot.slane %v4461_v31, 4  ;;  %v5872_v62 = vadd.f32 %v3574_v59, %v2357_v18  ;;  %v3576_v55 = vpop.f32.mrb[62].mxu1  ;;  %v4733_v47 = vsel %vm4701_vm13, %v4684_v16, %v4732_v8  ;;  %v2271_v8 = vld [vmem:[#allocation2 + $0x28] sm:$0xff] }
 0x406   :  { %v4439_v54 = vmax.f32 %v4437_v24, %v4438_v1  ;;  %v4456_v45 = vmax.f32 %v4454_v43, %v4455_v20  ;;  %v5873_v2 = vadd.f32 %v3576_v55, %v2359_v46  ;;  %v3578_v3 = vpop.f32.mrb[63].mxu1  ;;  %v4154_v39 = vmax.f32 %v5871_v49, 0.0 }
 0x407   :  { %v4446_v52 = vmax.f32 %v4444_v63, %v4445_v11  ;;  %v4463_v4 = vmax.f32 %v4461_v31, %v4462_v50  ;;  %v5874_v19 = vadd.f32 %v3578_v3, %v2360_v6  ;;  %v4155_v33 = vmax.f32 %v5872_v62, 0.0 }
 0x408   :  { %v4535_v56 = vpack.c.bf16 %v4439_v54, %v4439_v54  ;;  %v4457_v12 = vrot.slane %v4456_v45, 2  ;;  %v4157_v10 = vmax.f32 %v5873_v2, 0.0  ;;  %v3616_v63 = vadd.f32 %v7760_v30, %v2268_v17 }
 0x409   :  { %v4536_v35 = vpack.c.bf16 %v4446_v52, %v4446_v52  ;;  %v4464_v34 = vrot.slane %v4463_v4, 2  ;;  %v4158_v13 = vmax.f32 %v5874_v19, 0.0  ;;  %v3619_v54 = vadd.f32 %v7762_v53, %v2271_v8 }
 0x40a   :  { %v4686_v18 = vunpack.c.l.b16 %v4535_v56  ;;  %v4458_v57 = vmax.f32 %v4456_v45, %v4457_v12  ;;  %v4475_v59 = vmax.f32 %v4154_v39, %v4157_v10  ;;  %v2274_v12 = vld [vmem:[#allocation2 + $0x40] sm:$0xff] }
 0x40b   :  { %v4687_v24 = vunpack.c.l.b16 %v4536_v35  ;;  %v4465_v43 = vmax.f32 %v4463_v4, %v4464_v34  ;;  %v4482_v16 = vmax.f32 %v4155_v33, %v4158_v13  ;;  %v5424_v46 = vpop.f32.mrb[64].mxu1 }
 0x40c   :  { %v4727_v31 = vsel %vm4703_vm14, %v4686_v18, %v4726_v9  ;;  %v4459_v1 = vrot.slane %v4458_v57, 1  ;;  %v4476_v20 = vrot.slane %v4475_v59, 4  ;;  %v5425_v49 = vpop.f32.mrb[65].mxu1 }
 0x40d   :  { %v4466_v6 = vrot.slane %v4465_v43, 1  ;;  %v4483_v11 = vrot.slane %v4482_v16, 4  ;;  %v5426_v50 = vadd.f32 %v5425_v49, %v5424_v46  ;;  %v5427_v62 = vpop.f32.mrb[66].mxu1  ;;  %v4734_v55 = vsel %vm4703_vm14, %v4687_v24, %v4733_v47  ;;  %v2277_v47 = vld [vmem:[#allocation2 + $0x58] sm:$0xff] }
 0x40e   :  { %v4460_v45 = vmax.f32 %v4458_v57, %v4459_v1  ;;  %v4477_v2 = vmax.f32 %v4475_v59, %v4476_v20  ;;  %v5428_v3 = vpop.f32.mrb[67].mxu1  ;;  %v3624_v59 = vadd.f32 %v7778_v25, %v2274_v12  ;;  %v3627_v49 = vadd.f32 %v7780_v14, %v2277_v47  ;;  %v8250_v47 = vld [vmem:[#allocation5_spill] sm:$0xff] }
 0x40f   :  { %v4467_v52 = vmax.f32 %v4465_v43, %v4466_v6  ;;  %v4484_v4 = vmax.f32 %v4482_v16, %v4483_v11  ;;  %v3777_v19 = vadd.f32 %v5426_v50, %v3616_v63  ;;  %v5429_v30 = vadd.f32 %v5428_v3, %v5427_v62 }
 0x410   :  { %v4538_v56 = vpack.c.bf16 %v4460_v45, %v4460_v45  ;;  %v4478_v9 = vrot.slane %v4477_v2, 2  ;;  %v2280_v45 = vld [vmem:[#allocation2 + $0x70] sm:$0xff] }
 0x411   :  { %v4539_v39 = vpack.c.bf16 %v4467_v52, %v4467_v52  ;;  %v4485_v10 = vrot.slane %v4484_v4, 2  ;;  %v3938_v17 = vadd.f32 %v7909_v37, %v3777_v19  ;;  %v3780_v35 = vadd.f32 %v5429_v30, %v3619_v54  ;;  %v2283_v19 = vld [vmem:[#allocation2 + $0x88] sm:$0xff] }
 0x412   :  { %v4689_v34 = vunpack.c.l.b16 %v4538_v56  ;;  %v4479_v33 = vmax.f32 %v4477_v2, %v4478_v9  ;;  %v3632_v9 = vadd.f32 %v7796_v21, %v2280_v45  ;;  %v6191_v21 = vld [vmem:[%s8205_s4 + $0x80] sm:$0xff]  }
 0x413   :  { %v4690_v13 = vunpack.c.l.b16 %v4539_v39  ;;  %v4486_v53 = vmax.f32 %v4484_v4, %v4485_v10  ;;  %v3941_v18 = vadd.f32 %v7913_v36, %v3780_v35  ;;  %v5430_v57 = vpop.f32.mrb[68].mxu1  ;;  %v4066_v43 = vmax.f32 %v3938_v17, 0.0 }
 0x414   :  { %v4728_v8 = vsel %vm4705_vm15, %v4689_v34, %v4727_v31  ;;  %v4480_v24 = vrot.slane %v4479_v33, 1  ;;  %v5431_v16 = vpop.f32.mrb[69].mxu1 }
 0x415   :  { %v4487_v46 = vrot.slane %v4486_v53, 1  ;;  %v4069_v63 = vmax.f32 %v3941_v18, 0.0  ;;  %v5432_v1 = vadd.f32 %v5431_v16, %v5430_v57  ;;  %v5433_v37 = vpop.f32.mrb[70].mxu1  ;;  %v4735_v20 = vsel %vm4705_vm15, %v4690_v13, %v4734_v55 }
 0x416   :  { %v4481_v6 = vmax.f32 %v4479_v33, %v4480_v24  ;;  %v5434_v11 = vpop.f32.mrb[71].mxu1  ;;  %v3635_v13 = vadd.f32 %v8250_v47, %v2283_v19 }
 0x417   :  { %v4488_v50 = vmax.f32 %v4486_v53, %v4487_v46  ;;  %v4174_v36 = vmax.f32 %v4066_v43, %v4069_v63  ;;  %v3785_v62 = vadd.f32 %v5432_v1, %v3624_v59  ;;  %v5435_v54 = vadd.f32 %v5434_v11, %v5433_v37  ;;  %v2286_v43 = vld [vmem:[#allocation2 + $0xa0] sm:$0xff] }
 0x418   :  { %v4541_v25 = vpack.c.bf16 %v4481_v6, %v4481_v6 }
 0x419   :  { %v4542_v31 = vpack.c.bf16 %v4488_v50, %v4488_v50  ;;  %v4175_v2 = vrot.slane %v4174_v36, 4  ;;  %v3946_v3 = vadd.f32 %v7907_v0, %v3785_v62  ;;  %v3788_v52 = vadd.f32 %v5435_v54, %v3627_v49  ;;  %v8251_v49 = vld [vmem:[#allocation6_spill] sm:$0xff]  ;;  %v2289_v50 = vld [vmem:[#allocation2 + $0xb8] sm:$0xff] }
 0x41a   :  { %v4692_v4 = vunpack.c.l.b16 %v4541_v25  ;;  %v3640_v6 = vadd.f32 %v8251_v49, %v2286_v43  ;;  %v6195_v43 = vld [vmem:[%s8205_s4 + $0xa0] sm:$0xff]   ;;  %v6196_v49 = vld [vmem:[%s8205_s4 + $0xa8] sm:$0xff]  }
 0x41b   :  { %v4176_v30 = vmax.f32 %v4174_v36, %v4175_v2  ;;  %v3949_v55 = vadd.f32 %v7911_v58, %v3788_v52  ;;  %v5436_v56 = vpop.f32.mrb[72].mxu1  ;;  %v4693_v14 = vunpack.c.l.b16 %v4542_v31  ;;  %v4072_v12 = vmax.f32 %v3946_v3, 0.0 }
 0x41c   :  { %v5437_v39 = vpop.f32.mrb[73].mxu1  ;;  %v4729_v10 = vsel %vm4707_vm0, %v4692_v4, %v4728_v8  ;;  %v8252_v4 = vld [vmem:[#allocation7_spill] sm:$0xff] }
 0x41d   :  { %v4177_v17 = vrot.slane %v4176_v30, 2  ;;  %v4075_v35 = vmax.f32 %v3949_v55, 0.0  ;;  %v5438_v34 = vadd.f32 %v5437_v39, %v5436_v56  ;;  %v5439_v33 = vpop.f32.mrb[74].mxu1  ;;  %v4736_v0 = vsel %vm4707_vm0, %v4693_v14, %v4735_v20 }
 0x41e   :  { %v5440_v53 = vpop.f32.mrb[75].mxu1  ;;  %v4744_v18 = vpack.c.b16 %v4729_v10, %v8058_v38  ;;  %v4745_v58 = vpack.c.b16 %v4736_v0, %v8061_v15  ;;  %v6192_v38 = vld [vmem:[%s8205_s4 + $0x88] sm:$0xff]   ;;  %v3643_v19 = vadd.f32 %v8252_v4, %v2289_v50  ;;  %v6194_v10 = vld [vmem:[%s8205_s4 + $0x98] sm:$0xff]  }
 0x41f   :  { %v4178_v57 = vmax.f32 %v4176_v30, %v4177_v17  ;;  %v4195_v59 = vmax.f32 %v4072_v12, %v4075_v35  ;;  %v3793_v8 = vadd.f32 %v5438_v34, %v3632_v9  ;;  %v5441_v24 = vadd.f32 %v5440_v53, %v5439_v33  ;;  %v2292_v9 = vld [vmem:[#allocation2 + $0xd0] sm:$0xff]  ;;  %v2295_v17 = vld [vmem:[#allocation2 + $0xe8] sm:$0xff] }
 0x420   :  { %4926 = vmatprep.mubr.bf16.mxu0 %v4745_v58 }
 0x421   :  { %v4196_v16 = vrot.slane %v4195_v59, 4  ;;  %v3954_v46 = vadd.f32 %v7919_v26, %v3793_v8  ;;  %v3796_v63 = vadd.f32 %v5441_v24, %v3635_v13  ;;  %4927 = vmatmul.mubr.bf16.vlgmr.msra.gmra.mrb[0].mxu0 %v4744_v18  ;;  %v4179_v1 = vrot.slane %v4178_v57, 1 }
 0x422   :  { %5792 = vmatpush3.bf16.msra.mxu0 %v6191_v21  ;;  %5807 = vmatprep.mubr.msk.bf16.mxu0 %vm6228_vm1, %v8249_v61  ;;  %v3648_v13 = vadd.f32 %v7829_v60, %v2292_v9  ;;  %v3651_v21 = vadd.f32 %v7831_v41, %v2295_v17  ;;  %v2307_v17 = vld [vmem:[#allocation2 + $0x148] sm:$0xff] }
 0x423   :  { %v4197_v15 = vmax.f32 %v4195_v59, %v4196_v16  ;;  %v3957_v37 = vadd.f32 %v7923_v44, %v3796_v63  ;;  %v5442_v20 = vpop.f32.mrb[76].mxu1  ;;  %5793 = vmatprep.subr.bf16.mxu0 %v8249_v61  ;;  %v4078_v26 = vmax.f32 %v3954_v46, 0.0  ;;  %v4180_v45 = vmax.f32 %v4178_v57, %v4179_v1  ;;  %v6193_v44 = vld [vmem:[%s8205_s4 + $0x90] sm:$0xff]   ;;  %v2298_v1 = vld [vmem:[#allocation2 + $0x100] sm:$0xff] }
 0x424   :  { %v5443_v11 = vpop.f32.mrb[77].mxu1 }
 0x425   :  { %v4198_v36 = vrot.slane %v4197_v15, 2  ;;  %v4081_v62 = vmax.f32 %v3957_v37, 0.0  ;;  %v5444_v54 = vadd.f32 %v5443_v11, %v5442_v20  ;;  %v5445_v25 = vpop.f32.mrb[78].mxu1  ;;  %v4498_v12 = vpack.c.bf16 %v4180_v45, %v4180_v45 }
 0x426   :  { %v5446_v31 = vpop.f32.mrb[79].mxu1  ;;  %5794 = vmatpush3.bf16.msra.mxu0 %v6192_v38 }
 0x427   :  { %v4199_v2 = vmax.f32 %v4197_v15, %v4198_v36  ;;  %v4216_v3 = vmax.f32 %v4078_v26, %v4081_v62  ;;  %v3801_v52 = vadd.f32 %v5444_v54, %v3640_v6  ;;  %5795 = vmatprep.subr.bf16.mxu0 %v8249_v61  ;;  %v5447_v30 = vadd.f32 %v5446_v31, %v5445_v25  ;;  %v2301_v6 = vld [vmem:[#allocation2 + $0x118] sm:$0xff] }
 0x428   :  { %v4649_v57 = vunpack.c.l.b16 %v4498_v12  ;;  %v3656_v26 = vadd.f32 %v7835_v5, %v2298_v1 }
 0x429   :  { %v4200_v55 = vrot.slane %v4199_v2, 1  ;;  %v4217_v56 = vrot.slane %v4216_v3, 4  ;;  %v3962_v14 = vadd.f32 %v7917_v32, %v3801_v52  ;;  %v3804_v39 = vadd.f32 %v5447_v30, %v3643_v19 }
 0x42a   :  { %5796 = vmatpush3.bf16.msra.mxu0 %v6193_v44 }
 0x42b   :  { %v4201_v35 = vmax.f32 %v4199_v2, %v4200_v55  ;;  %v4218_v34 = vmax.f32 %v4216_v3, %v4217_v56  ;;  %v5448_v33 = vpop.f32.mrb[80].mxu1  ;;  %5797 = vmatprep.subr.bf16.mxu0 %v8249_v61  ;;  %v3965_v0 = vadd.f32 %v7921_v22, %v3804_v39  ;;  %v4084_v59 = vmax.f32 %v3962_v14, 0.0  ;;  %v2304_v56 = vld [vmem:[#allocation2 + $0x130] sm:$0xff] }
 0x42c   :  { %v5449_v47 = vpop.f32.mrb[81].mxu1  ;;  %v3659_v2 = vadd.f32 %v7837_v7, %v2301_v6 }
 0x42d   :  { %v4501_v32 = vpack.c.bf16 %v4201_v35, %v4201_v35  ;;  %v4219_v53 = vrot.slane %v4218_v34, 2  ;;  %v5450_v18 = vadd.f32 %v5449_v47, %v5448_v33  ;;  %v5451_v58 = vpop.f32.mrb[82].mxu1  ;;  %v4087_v8 = vmax.f32 %v3965_v0, 0.0 }
 0x42e   :  { %v5452_v24 = vpop.f32.mrb[83].mxu1  ;;  %5798 = vmatpush3.bf16.msra.mxu0 %v6194_v10  ;;  %v6198_v10 = vld [vmem:[%s8205_s4 + $0xb8] sm:$0xff]   ;;  %v3664_v0 = vadd.f32 %v7841_v51, %v2304_v56 }
 0x42f   :  { %v4652_v16 = vunpack.c.l.b16 %v4501_v32  ;;  %v4220_v22 = vmax.f32 %v4218_v34, %v4219_v53  ;;  %v3809_v46 = vadd.f32 %v5450_v18, %v3648_v13  ;;  %v5453_v63 = vadd.f32 %v5452_v24, %v5451_v58  ;;  %5799 = vmatprep.subr.bf16.mxu0 %v8249_v61 }
 0x430   :  { %v4237_v60 = vmax.f32 %v4084_v59, %v4087_v8 }
 0x431   :  { %v4716_v38 = vsel %vm4695_vm4, %v4652_v16, %v4649_v57  ;;  %v4221_v41 = vrot.slane %v4220_v22, 1  ;;  %v3970_v15 = vadd.f32 %v7929_v42, %v3809_v46  ;;  %v3812_v37 = vadd.f32 %v5453_v63, %v3651_v21  ;;  %v8253_v21 = vld [vmem:[#allocation8_spill] sm:$0xff] }
 0x432   :  { %v4238_v20 = vrot.slane %v4237_v60, 4  ;;  %5800 = vmatpush3.bf16.msra.mxu0 %v6195_v43  ;;  %v3667_v57 = vadd.f32 %v8253_v21, %v2307_v17 }
 0x433   :  { %v4222_v11 = vmax.f32 %v4220_v22, %v4221_v41  ;;  %v3973_v50 = vadd.f32 %v7933_v40, %v3812_v37  ;;  %v5454_v36 = vpop.f32.mrb[84].mxu1  ;;  %5801 = vmatprep.subr.bf16.mxu0 %v8249_v61  ;;  %v4090_v42 = vmax.f32 %v3970_v15, 0.0  ;;  %v6197_v40 = vld [vmem:[%s8205_s4 + $0xb0] sm:$0xff]  }
 0x434   :  { %v4239_v62 = vmax.f32 %v4237_v60, %v4238_v20  ;;  %v5455_v54 = vpop.f32.mrb[85].mxu1 }
 0x435   :  { %v4504_v25 = vpack.c.bf16 %v4222_v11, %v4222_v11  ;;  %v4093_v45 = vmax.f32 %v3973_v50, 0.0  ;;  %v5456_v31 = vadd.f32 %v5455_v54, %v5454_v36  ;;  %v5457_v44 = vpop.f32.mrb[86].mxu1  ;;  %v2313_v11 = vld [vmem:[#allocation2 + $0x178] sm:$0xff] }
 0x436   :  { %v4240_v3 = vrot.slane %v4239_v62, 2  ;;  %v5458_v52 = vpop.f32.mrb[87].mxu1  ;;  %5802 = vmatpush3.bf16.msra.mxu0 %v6196_v49 }
 0x437   :  { %v4655_v4 = vunpack.c.l.b16 %v4504_v25  ;;  %v4258_v19 = vmax.f32 %v4090_v42, %v4093_v45  ;;  %v3817_v30 = vadd.f32 %v5456_v31, %v3656_v26  ;;  %v5459_v5 = vadd.f32 %v5458_v52, %v5457_v44  ;;  %5803 = vmatprep.subr.bf16.mxu0 %v8249_v61  ;;  %v8254_v44 = vld [vmem:[#allocation9_spill] sm:$0xff] }
 0x438   :  { %v4241_v55 = vmax.f32 %v4239_v62, %v4240_v3 }
 0x439   :  { %v4717_v14 = vsel %vm4697_vm11, %v4655_v4, %v4716_v38  ;;  %v4259_v9 = vrot.slane %v4258_v19, 4  ;;  %v3978_v7 = vadd.f32 %v7927_v28, %v3817_v30  ;;  %v3820_v12 = vadd.f32 %v5459_v5, %v3659_v2  ;;  %v2319_v5 = vld [vmem:[#allocation2 + $0x1a8] sm:$0xff] }
 0x43a   :  { %v4242_v39 = vrot.slane %v4241_v55, 1  ;;  %5804 = vmatpush3.bf16.msra.mxu0 %v6197_v40  ;;  %v3675_v2 = vadd.f32 %v8254_v44, %v2313_v11  ;;  %v8255_v40 = vld [vmem:[#allocation26_spill] sm:$0xff] }
 0x43b   :  { %v4260_v35 = vmax.f32 %v4258_v19, %v4259_v9  ;;  %v3981_v34 = vadd.f32 %v7931_v27, %v3820_v12  ;;  %v5460_v33 = vpop.f32.mrb[88].mxu1  ;;  %5805 = vmatprep.subr.bf16.mxu0 %v8249_v61  ;;  %v4096_v28 = vmax.f32 %v3978_v7, 0.0  ;;  %v2310_v61 = vld [vmem:[#allocation2 + $0x160] sm:$0xff]  ;;  %v2316_v19 = vld [vmem:[#allocation2 + $0x190] sm:$0xff] }
 0x43c   :  { %v4243_v47 = vmax.f32 %v4241_v55, %v4242_v39  ;;  %v5461_v13 = vpop.f32.mrb[89].mxu1  ;;  %v3672_v20 = vadd.f32 %v7847_v23, %v2310_v61  ;;  %v8256_v9 = vld [vmem:[#allocation27_spill] sm:$0xff]  ;;  %v8257_v39 = vld [vmem:[#allocation10_spill] sm:$0xff]  ;;  %v2325_v61 = vld [vmem:[#allocation2 + $0x1d8] sm:$0xff] }
 0x43d   :  { %v4261_v32 = vrot.slane %v4260_v35, 2  ;;  %v4099_v53 = vmax.f32 %v3981_v34, 0.0  ;;  %v5462_v18 = vadd.f32 %v5461_v13, %v5460_v33  ;;  %v5463_v58 = vpop.f32.mrb[90].mxu1 }
 0x43e   :  { %v4507_v59 = vpack.c.bf16 %v4243_v47, %v4243_v47  ;;  %v5464_v8 = vpop.f32.mrb[91].mxu1  ;;  %5806 = vmatpush3.bf16.msra.mxu0 %v6198_v10  ;;  %v3680_v10 = vadd.f32 %v8257_v39, %v2316_v19  ;;  %v8264_v19 = vld [vmem:[#allocation30_spill] sm:$0xff] }
 0x43f   :  { %v4262_v24 = vmax.f32 %v4260_v35, %v4261_v32  ;;  %v4279_v43 = vmax.f32 %v4096_v28, %v4099_v53  ;;  %v3825_v27 = vadd.f32 %v5462_v18, %v3664_v0  ;;  %v5465_v16 = vadd.f32 %v5464_v8, %v5463_v58  ;;  %v8258_v0 = vld [vmem:[#allocation11_spill] sm:$0xff] }
 0x440   :  { %v4658_v22 = vunpack.c.l.b16 %v4507_v59  ;;  %v3683_v47 = vadd.f32 %v8258_v0, %v2319_v5  ;;  %v2322_v59 = vld [vmem:[#allocation2 + $0x1c0] sm:$0xff] }
 0x441   :  { %v4263_v46 = vrot.slane %v4262_v24, 1  ;;  %v4280_v51 = vrot.slane %v4279_v43, 4  ;;  %v3986_v63 = vadd.f32 %v7939_v29, %v3825_v27  ;;  %v3828_v60 = vadd.f32 %v5465_v16, %v3667_v57 }
 0x442   :  { %v4718_v1 = vsel %vm4699_vm12, %v4658_v22, %v4717_v14 }
 0x443   :  { %v4264_v38 = vmax.f32 %v4262_v24, %v4263_v46  ;;  %v4281_v41 = vmax.f32 %v4279_v43, %v4280_v51  ;;  %v3989_v15 = vadd.f32 %v7943_v48, %v3828_v60  ;;  %v5466_v37 = vpop.f32.mrb[92].mxu1  ;;  %v4102_v49 = vmax.f32 %v3986_v63, 0.0  ;;  %v8259_v43 = vld [vmem:[#allocation29_spill] sm:$0xff]  ;;  %v8260_v51 = vld [vmem:[#allocation31_spill] sm:$0xff] }
 0x444   :  { %v5467_v6 = vpop.f32.mrb[93].mxu1 }
 0x445   :  { %v4510_v50 = vpack.c.bf16 %v4264_v38, %v4264_v38  ;;  %v4282_v36 = vrot.slane %v4281_v41, 2  ;;  %v4105_v26 = vmax.f32 %v3989_v15, 0.0  ;;  %v5468_v62 = vadd.f32 %v5467_v6, %v5466_v37  ;;  %v5469_v54 = vpop.f32.mrb[94].mxu1 }
 0x446   :  { %v5470_v25 = vpop.f32.mrb[95].mxu1 }
 0x447   :  { %v4661_v29 = vunpack.c.l.b16 %v4510_v50  ;;  %v4283_v42 = vmax.f32 %v4281_v41, %v4282_v36  ;;  %v4300_v45 = vmax.f32 %v4102_v49, %v4105_v26  ;;  %v3833_v31 = vadd.f32 %v5468_v62, %v3672_v20  ;;  %v8262_v50 = vld [vmem:[#allocation13_spill] sm:$0xff] }
 0x448   :  { %v5471_v3 = vadd.f32 %v5470_v25, %v5469_v54  ;;  %v3691_v36 = vadd.f32 %v8262_v50, %v2325_v61  ;;  %v8269_v61 = vld [vmem:[#allocation16_spill] sm:$0xff]  ;;  %v8270_v50 = vld [vmem:[#allocation17_spill] sm:$0xff] }
 0x449   :  { %v4719_v48 = vsel %vm4701_vm13, %v4661_v29, %v4718_v1  ;;  %v4284_v52 = vrot.slane %v4283_v42, 1  ;;  %v4301_v23 = vrot.slane %v4300_v45, 4  ;;  %v3994_v4 = vadd.f32 %v8255_v40, %v3833_v31  ;;  %v8261_v1 = vld [vmem:[#allocation12_spill] sm:$0xff]  ;;  %v2328_v31 = vld [vmem:[#allocation2 + $0x1f0] sm:$0xff]  ;;  %v2331_v40 = vld [vmem:[#allocation2 + $0x208] sm:$0xff] }
 0x44a   :  { %v3836_v30 = vadd.f32 %v5471_v3, %v3675_v2  ;;  %v3688_v38 = vadd.f32 %v8261_v1, %v2322_v59  ;;  %v8263_v3 = vld [vmem:[#allocation28_spill] sm:$0xff] }
 0x44b   :  { %v4285_v55 = vmax.f32 %v4283_v42, %v4284_v52  ;;  %v4302_v56 = vmax.f32 %v4300_v45, %v4301_v23  ;;  %v5472_v14 = vpop.f32.mrb[96].mxu1  ;;  %v4108_v13 = vmax.f32 %v3994_v4, 0.0 }
 0x44c   :  { %v3997_v7 = vadd.f32 %v8256_v9, %v3836_v30  ;;  %v5473_v12 = vpop.f32.mrb[97].mxu1 }
 0x44d   :  { %v4513_v17 = vpack.c.bf16 %v4285_v55, %v4285_v55  ;;  %v4303_v35 = vrot.slane %v4302_v56, 2  ;;  %v5474_v34 = vadd.f32 %v5473_v12, %v5472_v14  ;;  %v5475_v33 = vpop.f32.mrb[98].mxu1  ;;  %v8265_v55 = vld [vmem:[#allocation14_spill] sm:$0xff] }
 0x44e   :  { %v4111_v32 = vmax.f32 %v3997_v7, 0.0  ;;  %v5476_v28 = vpop.f32.mrb[99].mxu1 }
 0x44f   :  { %v4664_v53 = vunpack.c.l.b16 %v4513_v17  ;;  %v4304_v18 = vmax.f32 %v4302_v56, %v4303_v35  ;;  %v3841_v58 = vadd.f32 %v5474_v34, %v3680_v10  ;;  %v5477_v21 = vadd.f32 %v5476_v28, %v5475_v33  ;;  %v8266_v35 = vld [vmem:[#allocation15_spill] sm:$0xff] }
 0x450   :  { %v4321_v57 = vmax.f32 %v4108_v13, %v4111_v32  ;;  %v3696_v56 = vadd.f32 %v8265_v55, %v2328_v31  ;;  %v3699_v34 = vadd.f32 %v8266_v35, %v2331_v40 }
 0x451   :  { %v4720_v8 = vsel %vm4703_vm14, %v4664_v53, %v4719_v48  ;;  %v4305_v24 = vrot.slane %v4304_v18, 1  ;;  %v4002_v27 = vadd.f32 %v8259_v43, %v3841_v58  ;;  %v3844_v16 = vadd.f32 %v5477_v21, %v3683_v47  ;;  %v8267_v21 = vld [vmem:[#allocation33_spill] sm:$0xff] }
 0x452   :  { %v4322_v22 = vrot.slane %v4321_v57, 4 }
 0x453   :  { %v4306_v46 = vmax.f32 %v4304_v18, %v4305_v24  ;;  %v4005_v63 = vadd.f32 %v8260_v51, %v3844_v16  ;;  %v5478_v60 = vpop.f32.mrb[100].mxu1  ;;  %v4114_v20 = vmax.f32 %v4002_v27, 0.0  ;;  %v2334_v18 = vld [vmem:[#allocation2 + $0x220] sm:$0xff]  ;;  %v8268_v27 = vld [vmem:[#allocation35_spill] sm:$0xff] }
 0x454   :  { %v4323_v41 = vmax.f32 %v4321_v57, %v4322_v22  ;;  %v5479_v15 = vpop.f32.mrb[101].mxu1 }
 0x455   :  { %v4516_v37 = vpack.c.bf16 %v4306_v46, %v4306_v46  ;;  %v4117_v49 = vmax.f32 %v4005_v63, 0.0  ;;  %v5480_v6 = vadd.f32 %v5479_v15, %v5478_v60  ;;  %v5481_v11 = vpop.f32.mrb[102].mxu1  ;;  %v3704_v46 = vadd.f32 %v8269_v61, %v2334_v18  ;;  %v2337_v63 = vld [vmem:[#allocation2 + $0x238] sm:$0xff] }
 0x456   :  { %v4324_v26 = vrot.slane %v4323_v41, 2  ;;  %v5482_v62 = vpop.f32.mrb[103].mxu1 }
 0x457   :  { %v4667_v54 = vunpack.c.l.b16 %v4516_v37  ;;  %v4342_v25 = vmax.f32 %v4114_v20, %v4117_v49  ;;  %v3849_v29 = vadd.f32 %v5480_v6, %v3688_v38  ;;  %v5483_v42 = vadd.f32 %v5482_v62, %v5481_v11 }
 0x458   :  { %v4325_v45 = vmax.f32 %v4323_v41, %v4324_v26 }
 0x459   :  { %v4721_v44 = vsel %vm4705_vm15, %v4667_v54, %v4720_v8  ;;  %v4343_v2 = vrot.slane %v4342_v25, 4  ;;  %v4010_v48 = vadd.f32 %v8263_v3, %v3849_v29  ;;  %v3852_v52 = vadd.f32 %v5483_v42, %v3691_v36  ;;  %v2340_v42 = vld [vmem:[#allocation2 + $0x250] sm:$0xff] }
 0x45a   :  { %v4326_v23 = vrot.slane %v4325_v45, 1  ;;  %v3707_v36 = vadd.f32 %v8270_v50, %v2337_v63 }
 0x45b   :  { %v4344_v4 = vmax.f32 %v4342_v25, %v4343_v2  ;;  %v4013_v30 = vadd.f32 %v8264_v19, %v3852_v52  ;;  %v5484_v5 = vpop.f32.mrb[104].mxu1  ;;  %v4120_v12 = vmax.f32 %v4010_v48, 0.0  ;;  %v8271_v25 = vld [vmem:[#allocation32_spill] sm:$0xff]  ;;  %v8272_v52 = vld [vmem:[#allocation34_spill] sm:$0xff] }
 0x45c   :  { %v4327_v14 = vmax.f32 %v4325_v45, %v4326_v23  ;;  %v5485_v9 = vpop.f32.mrb[105].mxu1 }
 0x45d   :  { %v4345_v7 = vrot.slane %v4344_v4, 2  ;;  %v4123_v39 = vmax.f32 %v4013_v30, 0.0  ;;  %v5486_v10 = vadd.f32 %v5485_v9, %v5484_v5  ;;  %v5487_v17 = vpop.f32.mrb[106].mxu1 }
 0x45e   :  { %v4519_v33 = vpack.c.bf16 %v4327_v14, %v4327_v14  ;;  %v5488_v0 = vpop.f32.mrb[107].mxu1  ;;  %v8274_v14 = vld [vmem:[#allocation19_spill] sm:$0xff] }
 0x45f   :  { %v4346_v47 = vmax.f32 %v4344_v4, %v4345_v7  ;;  %v4363_v13 = vmax.f32 %v4120_v12, %v4123_v39  ;;  %v3857_v32 = vadd.f32 %v5486_v10, %v3696_v56  ;;  %v5489_v28 = vadd.f32 %v5488_v0, %v5487_v17  ;;  %v8273_v4 = vld [vmem:[#allocation18_spill] sm:$0xff] }
 0x460   :  { %v4670_v53 = vunpack.c.l.b16 %v4519_v33  ;;  %v3712_v19 = vadd.f32 %v8273_v4, %v2340_v42 }
 0x461   :  { %v4364_v58 = vrot.slane %v4363_v13, 4  ;;  %v4018_v57 = vadd.f32 %v8267_v21, %v3857_v32  ;;  %v3860_v59 = vadd.f32 %v5489_v28, %v3699_v34  ;;  %v4347_v24 = vrot.slane %v4346_v47, 1  ;;  %v8275_v28 = vld [vmem:[#allocation37_spill] sm:$0xff]  ;;  %v2349_v21 = vld [vmem:[#allocation2 + $0x298] sm:$0xff] }
 0x462   :  { %v8161_v8 = vsel %vm4707_vm0, %v4670_v53, %v4721_v44  ;;  %v2343_v44 = vld [vmem:[#allocation2 + $0x268] sm:$0xff] }
 0x463   :  { %v4365_v43 = vmax.f32 %v4363_v13, %v4364_v58  ;;  %v4021_v16 = vadd.f32 %v8268_v27, %v3860_v59  ;;  %v5490_v22 = vpop.f32.mrb[108].mxu1  ;;  %v4126_v1 = vmax.f32 %v4018_v57, 0.0  ;;  %v4348_v37 = vmax.f32 %v4346_v47, %v4347_v24  ;;  %v2346_v47 = vld [vmem:[#allocation2 + $0x280] sm:$0xff]  ;;  %v8276_v59 = vld [vmem:[#allocation39_spill] sm:$0xff]  ;;  %v8277_v27 = vld [vmem:[#allocation20_spill] sm:$0xff] }
 0x464   :  { %v5491_v51 = vpop.f32.mrb[109].mxu1  ;;  %v3715_v9 = vadd.f32 %v8274_v14, %v2343_v44  ;;  %v8280_v44 = vld [vmem:[#allocation38_spill] sm:$0xff] }
 0x465   :  { %v4366_v60 = vrot.slane %v4365_v43, 2  ;;  %v4129_v38 = vmax.f32 %v4021_v16, 0.0  ;;  %v5492_v41 = vadd.f32 %v5491_v51, %v5490_v22  ;;  %v5493_v15 = vpop.f32.mrb[110].mxu1  ;;  %v4522_v45 = vpack.c.bf16 %v4348_v37, %v4348_v37 }
 0x466   :  { %v5494_v20 = vpop.f32.mrb[111].mxu1  ;;  %v3720_v16 = vadd.f32 %v8277_v27, %v2346_v47  ;;  %v8283_v47 = vld [vmem:[#allocation41_spill] sm:$0xff] }
 0x467   :  { %v4367_v49 = vmax.f32 %v4365_v43, %v4366_v60  ;;  %v4384_v6 = vmax.f32 %v4126_v1, %v4129_v38  ;;  %v3865_v11 = vadd.f32 %v5492_v41, %v3704_v46  ;;  %v5495_v26 = vadd.f32 %v5494_v20, %v5493_v15  ;;  %v8278_v38 = vld [vmem:[#allocation21_spill] sm:$0xff] }
 0x468   :  { %v4673_v7 = vunpack.c.l.b16 %v4522_v45  ;;  %v3723_v41 = vadd.f32 %v8278_v38, %v2349_v21  ;;  %v2355_v45 = vld [vmem:[#allocation2 + $0x2c8] sm:$0xff] }
 0x469   :  { %v4368_v62 = vrot.slane %v4367_v49, 1  ;;  %v4385_v54 = vrot.slane %v4384_v6, 4  ;;  %v4026_v29 = vadd.f32 %v8271_v25, %v3865_v11  ;;  %v3868_v31 = vadd.f32 %v5495_v26, %v3707_v36  ;;  %v2352_v36 = vld [vmem:[#allocation2 + $0x2b0] sm:$0xff] }
 0x46b   :  { %v4369_v2 = vmax.f32 %v4367_v49, %v4368_v62  ;;  %v4386_v3 = vmax.f32 %v4384_v6, %v4385_v54  ;;  %v5496_v48 = vpop.f32.mrb[112].mxu1  ;;  %v4029_v23 = vadd.f32 %v8272_v52, %v3868_v31  ;;  %v4132_v12 = vmax.f32 %v4026_v29, 0.0  ;;  %v8279_v54 = vld [vmem:[#allocation36_spill] sm:$0xff] }
 0x46c   :  { %v5497_v40 = vpop.f32.mrb[113].mxu1 }
 0x46d   :  { %v4525_v30 = vpack.c.bf16 %v4369_v2, %v4369_v2  ;;  %v4387_v5 = vrot.slane %v4386_v3, 2  ;;  %v5498_v55 = vadd.f32 %v5497_v40, %v5496_v48  ;;  %v5499_v56 = vpop.f32.mrb[114].mxu1  ;;  %v4135_v39 = vmax.f32 %v4029_v23, 0.0  ;;  %v8281_v48 = vld [vmem:[#allocation22_spill] sm:$0xff] }
 0x46e   :  { %v5500_v10 = vpop.f32.mrb[115].mxu1  ;;  %v3728_v52 = vadd.f32 %v8281_v48, %v2352_v36  ;;  %v8287_v36 = vld [vmem:[#allocation40_spill] sm:$0xff] }
 0x46f   :  { %v4676_v17 = vunpack.c.l.b16 %v4525_v30  ;;  %v4388_v35 = vmax.f32 %v4386_v3, %v4387_v5  ;;  %v3873_v34 = vadd.f32 %v5498_v55, %v3712_v19  ;;  %v5501_v33 = vadd.f32 %v5500_v10, %v5499_v56  ;;  %v8282_v56 = vld [vmem:[#allocation23_spill] sm:$0xff] }
 0x470   :  { %v4405_v0 = vmax.f32 %v4132_v12, %v4135_v39  ;;  %v3731_v14 = vadd.f32 %v8282_v56, %v2355_v45 }
 0x471   :  { %v4737_v13 = vsel %vm4695_vm4, %v4676_v17, %v4673_v7  ;;  %v4389_v32 = vrot.slane %v4388_v35, 1  ;;  %v4034_v53 = vadd.f32 %v8275_v28, %v3873_v34  ;;  %v3876_v18 = vadd.f32 %v5501_v33, %v3715_v9  ;;  %v2358_v34 = vld [vmem:[#allocation2 + $0x2e0] sm:$0xff] }
 0x472   :  { %v4406_v58 = vrot.slane %v4405_v0, 4 }
 0x473   :  { %v4390_v57 = vmax.f32 %v4388_v35, %v4389_v32  ;;  %v4037_v24 = vadd.f32 %v8276_v59, %v3876_v18  ;;  %v5502_v43 = vpop.f32.mrb[116].mxu1  ;;  %v4138_v51 = vmax.f32 %v4034_v53, 0.0  ;;  %v8285_v59 = vld [vmem:[#allocation24_spill] sm:$0xff] }
 0x474   :  { %v4407_v22 = vmax.f32 %v4405_v0, %v4406_v58  ;;  %v5503_v61 = vpop.f32.mrb[117].mxu1  ;;  %v8284_v58 = vld [vmem:[#allocation43_spill] sm:$0xff] }
 0x475   :  { %v4528_v46 = vpack.c.bf16 %v4390_v57, %v4390_v57  ;;  %v4141_v63 = vmax.f32 %v4037_v24, 0.0  ;;  %v5504_v60 = vadd.f32 %v5503_v61, %v5502_v43  ;;  %v5505_v1 = vpop.f32.mrb[118].mxu1  ;;  %v3736_v24 = vadd.f32 %v8285_v59, %v2358_v34 }
 0x476   :  { %v4408_v15 = vrot.slane %v4407_v22, 2  ;;  %v5506_v37 = vpop.f32.mrb[119].mxu1 }
 0x477   :  { %v4679_v20 = vunpack.c.l.b16 %v4528_v46  ;;  %v4426_v49 = vmax.f32 %v4138_v51, %v4141_v63  ;;  %v3881_v6 = vadd.f32 %v5504_v60, %v3720_v16  ;;  %v5507_v11 = vadd.f32 %v5506_v37, %v5505_v1  ;;  %v2361_v16 = vld [vmem:[#allocation2 + $0x2f8] sm:$0xff]  ;;  %v8286_v37 = vld [vmem:[#allocation25_spill] sm:$0xff] }
 0x478   :  { %v4409_v50 = vmax.f32 %v4407_v22, %v4408_v15 }
 0x479   :  { %v4738_v26 = vsel %vm4697_vm11, %v4679_v20, %v4737_v13  ;;  %v4427_v62 = vrot.slane %v4426_v49, 4  ;;  %v4042_v25 = vadd.f32 %v8279_v54, %v3881_v6  ;;  %v3884_v29 = vadd.f32 %v5507_v11, %v3723_v41 }
 0x47a   :  { %v4410_v42 = vrot.slane %v4409_v50, 1  ;;  %v3739_v20 = vadd.f32 %v8286_v37, %v2361_v16 }
 0x47b   :  { %v4428_v31 = vmax.f32 %v4426_v49, %v4427_v62  ;;  %v4045_v2 = vadd.f32 %v8280_v44, %v3884_v29  ;;  %v5508_v3 = vpop.f32.mrb[120].mxu1  ;;  %v4144_v19 = vmax.f32 %v4042_v25, 0.0  ;;  %v8288_v29 = vld [vmem:[#allocation42_spill] sm:$0xff] }
 0x47c   :  { %v4411_v23 = vmax.f32 %v4409_v50, %v4410_v42  ;;  %v5509_v40 = vpop.f32.mrb[121].mxu1 }
 0x47d   :  { %v4429_v4 = vrot.slane %v4428_v31, 2  ;;  %v4147_v30 = vmax.f32 %v4045_v2, 0.0  ;;  %v5510_v5 = vadd.f32 %v5509_v40, %v5508_v3  ;;  %v5511_v55 = vpop.f32.mrb[122].mxu1 }
 0x47e   :  { %v4531_v9 = vpack.c.bf16 %v4411_v23, %v4411_v23  ;;  %v5512_v7 = vpop.f32.mrb[123].mxu1 }
 0x47f   :  { %v4430_v12 = vmax.f32 %v4428_v31, %v4429_v4  ;;  %v4447_v39 = vmax.f32 %v4144_v19, %v4147_v30  ;;  %v3889_v10 = vadd.f32 %v5510_v5, %v3728_v52  ;;  %v5513_v17 = vadd.f32 %v5512_v7, %v5511_v55 }
 0x480   :  { %v4682_v35 = vunpack.c.l.b16 %v4531_v9 }
 0x481   :  { %v4431_v33 = vrot.slane %v4430_v12, 1  ;;  %v4448_v0 = vrot.slane %v4447_v39, 4  ;;  %v4050_v13 = vadd.f32 %v8283_v47, %v3889_v10  ;;  %v3892_v32 = vadd.f32 %v5513_v17, %v3731_v14 }
 0x482   :  { %v4739_v28 = vsel %vm4699_vm12, %v4682_v35, %v4738_v26 }
 0x483   :  { %v4432_v53 = vmax.f32 %v4430_v12, %v4431_v33  ;;  %v4449_v18 = vmax.f32 %v4447_v39, %v4448_v0  ;;  %v4053_v21 = vadd.f32 %v8284_v58, %v3892_v32  ;;  %v5514_v57 = vpop.f32.mrb[124].mxu1  ;;  %v4150_v43 = vmax.f32 %v4050_v13, 0.0 }
 0x484   :  { %v5515_v27 = vpop.f32.mrb[125].mxu1 }
 0x485   :  { %v4534_v22 = vpack.c.bf16 %v4432_v53, %v4432_v53  ;;  %v4450_v61 = vrot.slane %v4449_v18, 2  ;;  %v4153_v46 = vmax.f32 %v4053_v21, 0.0  ;;  %v5516_v51 = vadd.f32 %v5515_v27, %v5514_v57  ;;  %v5517_v63 = vpop.f32.mrb[126].mxu1 }
 0x486   :  { %v5518_v60 = vpop.f32.mrb[127].mxu1 }
 0x487   :  { %v4685_v1 = vunpack.c.l.b16 %v4534_v22  ;;  %v4451_v38 = vmax.f32 %v4449_v18, %v4450_v61  ;;  %v4468_v41 = vmax.f32 %v4150_v43, %v4153_v46  ;;  %v3897_v15 = vadd.f32 %v5516_v51, %v3736_v24 }
 0x488   :  { %v5519_v49 = vadd.f32 %v5518_v60, %v5517_v63 }
 0x489   :  { %v4740_v6 = vsel %vm4701_vm13, %v4685_v1, %v4739_v28  ;;  %v4452_v11 = vrot.slane %v4451_v38, 1  ;;  %v4469_v50 = vrot.slane %v4468_v41, 4  ;;  %v4058_v26 = vadd.f32 %v8287_v36, %v3897_v15  ;;  %v5187_v28 = vld [vmem:[%s8206_s5] ss:$0 sm:$0xff] }
 0x48a   :  { %v3900_v62 = vadd.f32 %v5519_v49, %v3739_v20 }
 0x48b   :  { %v4453_v54 = vmax.f32 %v4451_v38, %v4452_v11  ;;  %v4470_v25 = vmax.f32 %v4468_v41, %v4469_v50  ;;  %v4156_v44 = vmax.f32 %v4058_v26, 0.0 }
 0x48c   :  { %v4061_v42 = vadd.f32 %v8288_v29, %v3900_v62 }
 0x48d   :  { %v4537_v45 = vpack.c.bf16 %v4453_v54, %v4453_v54  ;;  %v4471_v31 = vrot.slane %v4470_v25, 2 }
 0x48e   :  { %v4159_v2 = vmax.f32 %v4061_v42, 0.0 }
 0x48f   :  { %v4688_v3 = vunpack.c.l.b16 %v4537_v45  ;;  %v4472_v48 = vmax.f32 %v4470_v25, %v4471_v31 }
 0x490   :  { %v4489_v52 = vmax.f32 %v4156_v44, %v4159_v2 }
 0x491   :  { %v4741_v23 = vsel %vm4703_vm14, %v4688_v3, %v4740_v6  ;;  %v4473_v40 = vrot.slane %v4472_v48, 1 }
 0x492   :  { %v4490_v4 = vrot.slane %v4489_v52, 4 }
 0x493   :  { %v4474_v19 = vmax.f32 %v4472_v48, %v4473_v40 }
 0x494   :  { %v4491_v30 = vmax.f32 %v4489_v52, %v4490_v4 }
 0x495   :  { %v4540_v5 = vpack.c.bf16 %v4474_v19, %v4474_v19 }
 0x496   :  { %v4492_v55 = vrot.slane %v4491_v30, 2 }
 0x497   :  { %v4691_v56 = vunpack.c.l.b16 %v4540_v5 }
 0x498   :  { %v4493_v14 = vmax.f32 %v4491_v30, %v4492_v55 }
 0x499   :  { %v4742_v9 = vsel %vm4705_vm15, %v4691_v56, %v4741_v23 }
 0x49a   :  { %v4494_v7 = vrot.slane %v4493_v14, 1 }
 0x49c   :  { %v4495_v12 = vmax.f32 %v4493_v14, %v4494_v7 }
 0x49e   :  { %v4543_v39 = vpack.c.bf16 %v4495_v12, %v4495_v12 }
 0x4a0   :  { %v4694_v10 = vunpack.c.l.b16 %v4543_v39 }
 0x4a2   :  { %v4743_v17 = vsel %vm4707_vm0, %v4694_v10, %v4742_v9 }
 0x4a3   :  { %v4746_v35 = vpack.c.b16 %v4743_v17, %v8161_v8 }
 0x4a5   :  { %5808 = vmatmul.mubr.bf16.vlgmr.msra.gmra.mrb[4].mxu0 %v4746_v35 }
 0x4f4   :  { %v5560_v34 = vpop.f32.mrb[0].mxu0 }
 0x4f5   :  { %v5561_v33 = vpop.f32.mrb[1].mxu0 }
 0x4f6   :  { %v5562_v0 = vadd.f32 %v5561_v33, %v5560_v34  ;;  %v5563_v47 = vpop.f32.mrb[2].mxu0 }
 0x4f7   :  { %v5564_v13 = vpop.f32.mrb[3].mxu0 }
 0x4f8   :  { %v5565_v32 = vadd.f32 %v5564_v13, %v5563_v47  ;;  %v4929_v53 = vadd.f32 %v5562_v0, %v5187_v28 }
 0x4fa   :  { %v4932_v57 = vadd.f32 %v5565_v32, %v5187_v28 }
 0x578   :  { %v4969_v18 = vpop.f32.mrb[4].mxu0 }
 0x579   :  { %v4970_v58 = vadd.f32 %v4969_v18, %v4929_v53  ;;  %v5809_v21 = vpop.f32.mrb[5].mxu0 }
 0x57a   :  { %v4972_v59 = vpop.f32.mrb[6].mxu0 }
 0x57b   :  { %4976 = vst [vmem:[%s8207_s6] sm:$0xff] %v4970_v58  ;;  %v4973_v8 = vadd.f32 %v4972_v59, %v4932_v57  ;;  %v5810_v24 = vpop.f32.mrb[7].mxu0 }
 0x57d   :  { %4977 = vst [vmem:[%s8207_s6 + $0x8] sm:$0xff] %v4973_v8 }
 0x57e   :  { %4982 = vsyncpa [#allocation3], 1 }

</bundles_post_ra>
